<compile_context>
chip_gen: v6e
topology: v6e:2x2x1
jax: 0.10.0
libtpu: 0.0.40
codegen_flags: <defaults>
</compile_context>

<pallas_src>
import math
import jax
import jax.numpy as jnp
from jax.experimental import pallas as pl
from jax.experimental.pallas import tpu as pltpu


def _mish_fast(x):
    # mish(x) = x * tanh(softplus(x)) = x * ((1+e^x)^2 - 1) / ((1+e^x)^2 + 1)
    # One exp + one approx reciprocal on the EUP; the rest is VPU.
    # Clamp: for x > 20, mish(x) == x to f32 precision (avoids exp overflow).
    e = jnp.exp(jnp.minimum(x, 20.0))
    s2 = (1.0 + e) * (1.0 + e)
    return x * (s2 - 1.0) * pl.reciprocal(s2 + 1.0, approx=True)


def _mish_ref(x):
    # Exact PyTorch nn.Mish semantics: x * tanh(softplus(x))
    return x * jnp.tanh(jnp.logaddexp(x, 0.0))


def q_function_kernel(
    sa_ref,                                             # (bm, S+A+1) f32: [state, action, time]
    freqs_ref,                                          # (1, t_dim) f32: [f_0..f_{h-1}, f_0..f_{h-1}]
    wt1_ref, bt1_ref,                                   # (t_dim, 2t) bf16, (1, 2t) f32
    wt2_ref, bt2_ref,                                   # (2t, t_dim) bf16, (1, t_dim) f32
    w1sa_ref, w1t_ref, b1_ref,                          # (S+A+1, H) bf16 (zero last row), (t_dim, H) bf16, (1, H) f32
    w2_ref, b2_ref, w3_ref, b3_ref,                     # (H, H) bf16, (1, H) f32, ...
    wf_ref, bf_ref,                                     # (1, H) f32, (1, 1) f32
    out_ref,                                            # (1, 1, bm) f32 -- lane-dense row
):
    f32, bf16 = jnp.float32, jnp.bfloat16
    bm = out_ref.shape[-1]
    t_dim = freqs_ref.shape[1]
    half = t_dim // 2

    sa = sa_ref[...]                                    # (bm, S+A+1) f32
    t = sa[:, sa.shape[1] - 1:]                         # (bm, 1) exact f32 time column

    # ---- SinusoidalPosEmb: sin on lanes [0, half), cos on lanes [half, t_dim) ----
    ang = t * freqs_ref[...]                            # (bm, t_dim)
    lane = jax.lax.broadcasted_iota(jnp.int32, ang.shape, 1)
    emb = jnp.where(lane < half, jnp.sin(ang), jnp.cos(ang))

    # ---- time_mlp: Linear(t_dim, 2t) -> Mish -> Linear(2t, t_dim) (single fused dot) ----
    h = jnp.dot(emb.astype(bf16), wt1_ref[...], preferred_element_type=f32) + bt1_ref[...]
    h = _mish_fast(h)
    temb = jnp.dot(h.astype(bf16), wt2_ref[...], preferred_element_type=f32) + bt2_ref[...]

    # ---- mid_layer: concat([state, action, temb]) @ W1 == [state,action,time] @ W1_sa0 + temb @ W1_t
    x = (jnp.dot(sa.astype(bf16), w1sa_ref[...], preferred_element_type=f32)
         + jnp.dot(temb.astype(bf16), w1t_ref[...], preferred_element_type=f32)
         + b1_ref[...])
    x = _mish_fast(x)
    x = _mish_fast(jnp.dot(x.astype(bf16), w2_ref[...], preferred_element_type=f32) + b2_ref[...])
    x = _mish_fast(jnp.dot(x.astype(bf16), w3_ref[...], preferred_element_type=f32) + b3_ref[...])

    # ---- final Linear(H, 1), written lane-dense: wf (1,H) · x (bm,H)^T -> (1, bm) ----
    q = jax.lax.dot_general(wf_ref[...], x, (((1,), (1,)), ((), ())),
                            preferred_element_type=f32)
    out_ref[...] = (q + bf_ref[...]).reshape(1, 1, bm)


def _round_up(x, m):
    return ((x + m - 1) // m) * m


def q_function_pallas(state, action, time, params, *, block_m=256):
    """state: (B, S), action: (B, A), time: (B,) float32 -> (B, 1) float32."""
    f32, bf16 = jnp.float32, jnp.bfloat16
    B, S = state.shape
    A = action.shape[1]
    SA = S + A
    H = params["w2"].shape[0]

    # Streamed slab: [state, action, time] as one f32 tile per grid step (time kept
    # exact f32; it is only 24 lanes so streaming it f32 is negligible DMA).
    x_in = jnp.concatenate(
        [state.astype(f32), action.astype(f32), time.reshape(B, 1).astype(f32)], axis=1)

    # ---- pack VMEM-resident weights (constant-folded / hoisted under jit) ----
    freqs2 = jnp.tile(params["freqs"], (1, 2)).astype(f32)                 # (1, t_dim)
    wt1 = params["wt1"].astype(bf16)
    wt2 = params["wt2"].astype(bf16)
    w1 = params["w1"]
    w1_sa = jnp.concatenate([w1[:SA], jnp.zeros((1, H), f32)], axis=0).astype(bf16)  # zero row for time lane
    w1_t = w1[SA:].astype(bf16)
    w2 = params["w2"].astype(bf16)
    w3 = params["w3"].astype(bf16)
    wf_row = params["wf"].T.astype(f32)                                    # (1, H)
    bt1 = params["bt1"].astype(f32)
    bt2 = params["bt2"].astype(f32)
    b1 = params["b1"].astype(f32)
    b2 = params["b2"].astype(f32)
    b3 = params["b3"].astype(f32)
    bf = params["bf"].astype(f32)

    # Batch tile: as large as possible, but keep >= 2 tiles at small B so both v7x
    # TensorCores get work; always a multiple of 8 sublanes.
    bm = min(block_m, _round_up(pl.cdiv(B, 2), 8))
    bm = max(8, (bm // 8) * 8)
    n_tiles = pl.cdiv(B, bm)
    Bp = n_tiles * bm
    if Bp != B:
        x_in = jnp.pad(x_in, ((0, Bp - B), (0, 0)))

    weights = (freqs2, wt1, bt1, wt2, bt2, w1_sa, w1_t, b1, w2, b2, w3, b3, wf_row, bf)
    # Full-shape blocks + constant index_map -> fetched once, VMEM-resident across steps.
    weight_specs = [pl.BlockSpec(w.shape, lambda i: (0, 0)) for w in weights]

    out = pl.pallas_call(
        q_function_kernel,
        out_shape=jax.ShapeDtypeStruct((n_tiles, 1, bm), f32),
        grid_spec=pltpu.PrefetchScalarGridSpec(
            num_scalar_prefetch=0,
            grid=(n_tiles,),
            in_specs=[pl.BlockSpec((bm, SA + 1), lambda i: (i, 0))] + weight_specs,
            out_specs=pl.BlockSpec((1, 1, bm), lambda i: (i, 0, 0)),     # lane-dense row
        ),
        compiler_params=pltpu.CompilerParams(
            dimension_semantics=("parallel",)),   # batch tiles shard across TCs on v7x
    )(x_in, *weights)

    return out.reshape(Bp, 1)[:B]


def q_function_ref(state, action, time, params):
    """Pure-JAX reference with exact PyTorch semantics (real concats, exact Mish, f32)."""
    B = state.shape[0]
    ang = time.reshape(B, 1) * params["freqs"]
    emb = jnp.concatenate([jnp.sin(ang), jnp.cos(ang)], axis=1)            # (B, t_dim)
    h = _mish_ref(emb @ params["wt1"] + params["bt1"])
    temb = h @ params["wt2"] + params["bt2"]
    x = jnp.concatenate([state, action, temb], axis=1)
    x = _mish_ref(x @ params["w1"] + params["b1"])
    x = _mish_ref(x @ params["w2"] + params["b2"])
    x = _mish_ref(x @ params["w3"] + params["b3"])
    return x @ params["wf"] + params["bf"]


def init_params(key, state_dim, action_dim, t_dim, hidden_dim):
    half = t_dim // 2
    ks = jax.random.split(key, 6)

    def lin(k, fan_in, fan_out):
        bound = 1.0 / math.sqrt(fan_in)
        kw, kb = jax.random.split(k)
        w = jax.random.uniform(kw, (fan_in, fan_out), jnp.float32, -bound, bound)
        b = jax.random.uniform(kb, (1, fan_out), jnp.float32, -bound, bound)
        return w, b

    # SinusoidalPosEmb frequencies: exp(arange(half) * -(log(10000)/(half-1)))
    freqs = jnp.exp(jnp.arange(half, dtype=jnp.float32)
                    * (-math.log(10000.0) / (half - 1))).reshape(1, half)

    wt1, bt1 = lin(ks[0], t_dim, 2 * t_dim)
    wt2, bt2 = lin(ks[1], 2 * t_dim, t_dim)
    in_dim = state_dim + action_dim + t_dim
    w1, b1 = lin(ks[2], in_dim, hidden_dim)
    w2, b2 = lin(ks[3], hidden_dim, hidden_dim)
    w3, b3 = lin(ks[4], hidden_dim, hidden_dim)
    wf, bf = lin(ks[5], hidden_dim, 1)

    return {
        "freqs": freqs,
        "wt1": wt1, "bt1": bt1, "wt2": wt2, "bt2": bt2,
        "w1": w1, "b1": b1, "w2": w2, "b2": b2, "w3": w3, "b3": b3,
        "wf": wf, "bf": bf,
    }


if __name__ == "__main__":
    # Batch not a multiple of the tile so the padding + 2-tile (v7x) path runs.
    B, STATE_DIM, ACTION_DIM, T_DIM, HIDDEN = 200, 17, 6, 16, 32

    key = jax.random.PRNGKey(0)
    kp, ks, ka, kt = jax.random.split(key, 4)

    params = init_params(kp, STATE_DIM, ACTION_DIM, T_DIM, HIDDEN)
    state = jax.random.normal(ks, (B, STATE_DIM), jnp.float32)
    action = jax.random.normal(ka, (B, ACTION_DIM), jnp.float32)
    time_steps = jax.random.randint(kt, (B,), 0, 100).astype(jnp.float32)

    out = q_function_pallas(state, action, time_steps, params)
    out = jax.block_until_ready(out)

    ref = q_function_ref(state, action, time_steps, params)
    assert out.shape == (B, 1)
    # Tolerance accounts for bf16 MXU feed + approx reciprocal in Mish.
    assert jnp.allclose(out, ref, rtol=3e-2, atol=1.5e-2), (
        float(jnp.max(jnp.abs(out - ref))), out[:4], ref[:4])

    print("KERNEL_OK")
</pallas_src>

<mosaic_0001>
module attributes {stable_mosaic.version = 11 : i64} {
  func.func @q_function_kernel(%arg0: i32, %arg1: memref<104x24xf32, #tpu.memory_space<vmem>>, %arg2: memref<1x16xf32, #tpu.memory_space<vmem>>, %arg3: memref<16x32xbf16, #tpu.memory_space<vmem>>, %arg4: memref<1x32xf32, #tpu.memory_space<vmem>>, %arg5: memref<32x16xbf16, #tpu.memory_space<vmem>>, %arg6: memref<1x16xf32, #tpu.memory_space<vmem>>, %arg7: memref<24x32xbf16, #tpu.memory_space<vmem>>, %arg8: memref<16x32xbf16, #tpu.memory_space<vmem>>, %arg9: memref<1x32xf32, #tpu.memory_space<vmem>>, %arg10: memref<32x32xbf16, #tpu.memory_space<vmem>>, %arg11: memref<1x32xf32, #tpu.memory_space<vmem>>, %arg12: memref<32x32xbf16, #tpu.memory_space<vmem>>, %arg13: memref<1x32xf32, #tpu.memory_space<vmem>>, %arg14: memref<1x32xf32, #tpu.memory_space<vmem>>, %arg15: memref<1x1xf32, #tpu.memory_space<vmem>>, %arg16: memref<1x1x104xf32, #tpu.memory_space<vmem>>) attributes {dimension_semantics = [#tpu.dimension_semantics<parallel>], iteration_bounds = array<i64: 2>, scalar_prefetch = 0 : i64, scratch_operands = 0 : i64, tpu.core_type = #tpu.core_type<tc>, window_params = [{transform_indices = @transform_0, window_bounds = array<i64: 104, 24>}, {pipeline_mode = #tpu.pipeline_mode<synchronous>, transform_indices = @transform_1, window_bounds = array<i64: 1, 16>}, {pipeline_mode = #tpu.pipeline_mode<synchronous>, transform_indices = @transform_2, window_bounds = array<i64: 16, 32>}, {pipeline_mode = #tpu.pipeline_mode<synchronous>, transform_indices = @transform_3, window_bounds = array<i64: 1, 32>}, {pipeline_mode = #tpu.pipeline_mode<synchronous>, transform_indices = @transform_4, window_bounds = array<i64: 32, 16>}, {pipeline_mode = #tpu.pipeline_mode<synchronous>, transform_indices = @transform_5, window_bounds = array<i64: 1, 16>}, {pipeline_mode = #tpu.pipeline_mode<synchronous>, transform_indices = @transform_6, window_bounds = array<i64: 24, 32>}, {pipeline_mode = #tpu.pipeline_mode<synchronous>, transform_indices = @transform_7, window_bounds = array<i64: 16, 32>}, {pipeline_mode = #tpu.pipeline_mode<synchronous>, transform_indices = @transform_8, window_bounds = array<i64: 1, 32>}, {pipeline_mode = #tpu.pipeline_mode<synchronous>, transform_indices = @transform_9, window_bounds = array<i64: 32, 32>}, {pipeline_mode = #tpu.pipeline_mode<synchronous>, transform_indices = @transform_10, window_bounds = array<i64: 1, 32>}, {pipeline_mode = #tpu.pipeline_mode<synchronous>, transform_indices = @transform_11, window_bounds = array<i64: 32, 32>}, {pipeline_mode = #tpu.pipeline_mode<synchronous>, transform_indices = @transform_12, window_bounds = array<i64: 1, 32>}, {pipeline_mode = #tpu.pipeline_mode<synchronous>, transform_indices = @transform_13, window_bounds = array<i64: 1, 32>}, {pipeline_mode = #tpu.pipeline_mode<synchronous>, transform_indices = @transform_14, window_bounds = array<i64: 1, 1>}, {transform_indices = @transform_15, window_bounds = array<i64: 1, 1, 104>}]} {
    %c0 = arith.constant 0 : index
    %c0_0 = arith.constant 0 : index
    %0 = vector.load %arg1[%c0, %c0_0] : memref<104x24xf32, #tpu.memory_space<vmem>>, vector<104x24xf32>
    %1 = vector.extract_strided_slice %0 {offsets = [0, 23], sizes = [104, 1], strides = [1, 1]} : vector<104x24xf32> to vector<104x1xf32>
    %c0_1 = arith.constant 0 : index
    %c0_2 = arith.constant 0 : index
    %2 = vector.load %arg2[%c0_1, %c0_2] : memref<1x16xf32, #tpu.memory_space<vmem>>, vector<1x16xf32>
    %3 = vector.broadcast %1 : vector<104x1xf32> to vector<104x16xf32>
    %4 = vector.broadcast %2 : vector<1x16xf32> to vector<104x16xf32>
    %5 = arith.mulf %3, %4 : vector<104x16xf32>
    %6 = tpu.iota {dimensions = array<i32: 1>} : vector<104x16xi32>
    %c8_i32 = arith.constant 8 : i32
    %7 = vector.broadcast %c8_i32 : i32 to vector<104x16xi32>
    %8 = arith.cmpi slt, %6, %7 : vector<104x16xi32>
    %9 = math.sin %5 : vector<104x16xf32>
    %10 = math.cos %5 : vector<104x16xf32>
    %11 = arith.select %8, %9, %10 : vector<104x16xi1>, vector<104x16xf32>
    %12 = arith.truncf %11 : vector<104x16xf32> to vector<104x16xbf16>
    %c0_3 = arith.constant 0 : index
    %c0_4 = arith.constant 0 : index
    %13 = vector.load %arg3[%c0_3, %c0_4] : memref<16x32xbf16, #tpu.memory_space<vmem>>, vector<16x32xbf16>
    %cst = arith.constant dense<0.000000e+00> : vector<104x32xf32>
    %14 = tpu.matmul %12, %13, %cst {dimension_numbers = #tpu.dot_dimension_numbers<[1], [0], [0], [1], [0, 0, 1, 1], [], []>} : vector<104x16xbf16>, vector<16x32xbf16>, vector<104x32xf32> -> vector<104x32xf32>
    %c0_5 = arith.constant 0 : index
    %c0_6 = arith.constant 0 : index
    %15 = vector.load %arg4[%c0_5, %c0_6] : memref<1x32xf32, #tpu.memory_space<vmem>>, vector<1x32xf32>
    %16 = vector.broadcast %15 : vector<1x32xf32> to vector<104x32xf32>
    %17 = arith.addf %14, %16 : vector<104x32xf32>
    %cst_7 = arith.constant 2.000000e+01 : f32
    %18 = vector.broadcast %cst_7 : f32 to vector<104x32xf32>
    %19 = arith.minimumf %17, %18 : vector<104x32xf32>
    %20 = math.exp %19 : vector<104x32xf32>
    %cst_8 = arith.constant 1.000000e+00 : f32
    %21 = vector.broadcast %cst_8 : f32 to vector<104x32xf32>
    %22 = arith.addf %21, %20 : vector<104x32xf32>
    %cst_9 = arith.constant 1.000000e+00 : f32
    %23 = vector.broadcast %cst_9 : f32 to vector<104x32xf32>
    %24 = arith.addf %23, %20 : vector<104x32xf32>
    %25 = arith.mulf %22, %24 : vector<104x32xf32>
    %cst_10 = arith.constant 1.000000e+00 : f32
    %26 = vector.broadcast %cst_10 : f32 to vector<104x32xf32>
    %27 = arith.subf %25, %26 : vector<104x32xf32>
    %28 = arith.mulf %17, %27 : vector<104x32xf32>
    %cst_11 = arith.constant 1.000000e+00 : f32
    %29 = vector.broadcast %cst_11 : f32 to vector<104x32xf32>
    %30 = arith.addf %25, %29 : vector<104x32xf32>
    %31 = tpu.reciprocal %30 {approx = true} : vector<104x32xf32> -> vector<104x32xf32>
    %32 = arith.mulf %28, %31 : vector<104x32xf32>
    %33 = arith.truncf %32 : vector<104x32xf32> to vector<104x32xbf16>
    %c0_12 = arith.constant 0 : index
    %c0_13 = arith.constant 0 : index
    %34 = vector.load %arg5[%c0_12, %c0_13] : memref<32x16xbf16, #tpu.memory_space<vmem>>, vector<32x16xbf16>
    %cst_14 = arith.constant dense<0.000000e+00> : vector<104x16xf32>
    %35 = tpu.matmul %33, %34, %cst_14 {dimension_numbers = #tpu.dot_dimension_numbers<[1], [0], [0], [1], [0, 0, 1, 1], [], []>} : vector<104x32xbf16>, vector<32x16xbf16>, vector<104x16xf32> -> vector<104x16xf32>
    %c0_15 = arith.constant 0 : index
    %c0_16 = arith.constant 0 : index
    %36 = vector.load %arg6[%c0_15, %c0_16] : memref<1x16xf32, #tpu.memory_space<vmem>>, vector<1x16xf32>
    %37 = vector.broadcast %36 : vector<1x16xf32> to vector<104x16xf32>
    %38 = arith.addf %35, %37 : vector<104x16xf32>
    %39 = arith.truncf %0 : vector<104x24xf32> to vector<104x24xbf16>
    %c0_17 = arith.constant 0 : index
    %c0_18 = arith.constant 0 : index
    %40 = vector.load %arg7[%c0_17, %c0_18] : memref<24x32xbf16, #tpu.memory_space<vmem>>, vector<24x32xbf16>
    %cst_19 = arith.constant dense<0.000000e+00> : vector<104x32xf32>
    %41 = tpu.matmul %39, %40, %cst_19 {dimension_numbers = #tpu.dot_dimension_numbers<[1], [0], [0], [1], [0, 0, 1, 1], [], []>} : vector<104x24xbf16>, vector<24x32xbf16>, vector<104x32xf32> -> vector<104x32xf32>
    %42 = arith.truncf %38 : vector<104x16xf32> to vector<104x16xbf16>
    %c0_20 = arith.constant 0 : index
    %c0_21 = arith.constant 0 : index
    %43 = vector.load %arg8[%c0_20, %c0_21] : memref<16x32xbf16, #tpu.memory_space<vmem>>, vector<16x32xbf16>
    %cst_22 = arith.constant dense<0.000000e+00> : vector<104x32xf32>
    %44 = tpu.matmul %42, %43, %cst_22 {dimension_numbers = #tpu.dot_dimension_numbers<[1], [0], [0], [1], [0, 0, 1, 1], [], []>} : vector<104x16xbf16>, vector<16x32xbf16>, vector<104x32xf32> -> vector<104x32xf32>
    %45 = arith.addf %41, %44 : vector<104x32xf32>
    %c0_23 = arith.constant 0 : index
    %c0_24 = arith.constant 0 : index
    %46 = vector.load %arg9[%c0_23, %c0_24] : memref<1x32xf32, #tpu.memory_space<vmem>>, vector<1x32xf32>
    %47 = vector.broadcast %46 : vector<1x32xf32> to vector<104x32xf32>
    %48 = arith.addf %45, %47 : vector<104x32xf32>
    %cst_25 = arith.constant 2.000000e+01 : f32
    %49 = vector.broadcast %cst_25 : f32 to vector<104x32xf32>
    %50 = arith.minimumf %48, %49 : vector<104x32xf32>
    %51 = math.exp %50 : vector<104x32xf32>
    %cst_26 = arith.constant 1.000000e+00 : f32
    %52 = vector.broadcast %cst_26 : f32 to vector<104x32xf32>
    %53 = arith.addf %52, %51 : vector<104x32xf32>
    %cst_27 = arith.constant 1.000000e+00 : f32
    %54 = vector.broadcast %cst_27 : f32 to vector<104x32xf32>
    %55 = arith.addf %54, %51 : vector<104x32xf32>
    %56 = arith.mulf %53, %55 : vector<104x32xf32>
    %cst_28 = arith.constant 1.000000e+00 : f32
    %57 = vector.broadcast %cst_28 : f32 to vector<104x32xf32>
    %58 = arith.subf %56, %57 : vector<104x32xf32>
    %59 = arith.mulf %48, %58 : vector<104x32xf32>
    %cst_29 = arith.constant 1.000000e+00 : f32
    %60 = vector.broadcast %cst_29 : f32 to vector<104x32xf32>
    %61 = arith.addf %56, %60 : vector<104x32xf32>
    %62 = tpu.reciprocal %61 {approx = true} : vector<104x32xf32> -> vector<104x32xf32>
    %63 = arith.mulf %59, %62 : vector<104x32xf32>
    %64 = arith.truncf %63 : vector<104x32xf32> to vector<104x32xbf16>
    %c0_30 = arith.constant 0 : index
    %c0_31 = arith.constant 0 : index
    %65 = vector.load %arg10[%c0_30, %c0_31] : memref<32x32xbf16, #tpu.memory_space<vmem>>, vector<32x32xbf16>
    %cst_32 = arith.constant dense<0.000000e+00> : vector<104x32xf32>
    %66 = tpu.matmul %64, %65, %cst_32 {dimension_numbers = #tpu.dot_dimension_numbers<[1], [0], [0], [1], [0, 0, 1, 1], [], []>} : vector<104x32xbf16>, vector<32x32xbf16>, vector<104x32xf32> -> vector<104x32xf32>
    %c0_33 = arith.constant 0 : index
    %c0_34 = arith.constant 0 : index
    %67 = vector.load %arg11[%c0_33, %c0_34] : memref<1x32xf32, #tpu.memory_space<vmem>>, vector<1x32xf32>
    %68 = vector.broadcast %67 : vector<1x32xf32> to vector<104x32xf32>
    %69 = arith.addf %66, %68 : vector<104x32xf32>
    %cst_35 = arith.constant 2.000000e+01 : f32
    %70 = vector.broadcast %cst_35 : f32 to vector<104x32xf32>
    %71 = arith.minimumf %69, %70 : vector<104x32xf32>
    %72 = math.exp %71 : vector<104x32xf32>
    %cst_36 = arith.constant 1.000000e+00 : f32
    %73 = vector.broadcast %cst_36 : f32 to vector<104x32xf32>
    %74 = arith.addf %73, %72 : vector<104x32xf32>
    %cst_37 = arith.constant 1.000000e+00 : f32
    %75 = vector.broadcast %cst_37 : f32 to vector<104x32xf32>
    %76 = arith.addf %75, %72 : vector<104x32xf32>
    %77 = arith.mulf %74, %76 : vector<104x32xf32>
    %cst_38 = arith.constant 1.000000e+00 : f32
    %78 = vector.broadcast %cst_38 : f32 to vector<104x32xf32>
    %79 = arith.subf %77, %78 : vector<104x32xf32>
    %80 = arith.mulf %69, %79 : vector<104x32xf32>
    %cst_39 = arith.constant 1.000000e+00 : f32
    %81 = vector.broadcast %cst_39 : f32 to vector<104x32xf32>
    %82 = arith.addf %77, %81 : vector<104x32xf32>
    %83 = tpu.reciprocal %82 {approx = true} : vector<104x32xf32> -> vector<104x32xf32>
    %84 = arith.mulf %80, %83 : vector<104x32xf32>
    %85 = arith.truncf %84 : vector<104x32xf32> to vector<104x32xbf16>
    %c0_40 = arith.constant 0 : index
    %c0_41 = arith.constant 0 : index
    %86 = vector.load %arg12[%c0_40, %c0_41] : memref<32x32xbf16, #tpu.memory_space<vmem>>, vector<32x32xbf16>
    %cst_42 = arith.constant dense<0.000000e+00> : vector<104x32xf32>
    %87 = tpu.matmul %85, %86, %cst_42 {dimension_numbers = #tpu.dot_dimension_numbers<[1], [0], [0], [1], [0, 0, 1, 1], [], []>} : vector<104x32xbf16>, vector<32x32xbf16>, vector<104x32xf32> -> vector<104x32xf32>
    %c0_43 = arith.constant 0 : index
    %c0_44 = arith.constant 0 : index
    %88 = vector.load %arg13[%c0_43, %c0_44] : memref<1x32xf32, #tpu.memory_space<vmem>>, vector<1x32xf32>
    %89 = vector.broadcast %88 : vector<1x32xf32> to vector<104x32xf32>
    %90 = arith.addf %87, %89 : vector<104x32xf32>
    %cst_45 = arith.constant 2.000000e+01 : f32
    %91 = vector.broadcast %cst_45 : f32 to vector<104x32xf32>
    %92 = arith.minimumf %90, %91 : vector<104x32xf32>
    %93 = math.exp %92 : vector<104x32xf32>
    %cst_46 = arith.constant 1.000000e+00 : f32
    %94 = vector.broadcast %cst_46 : f32 to vector<104x32xf32>
    %95 = arith.addf %94, %93 : vector<104x32xf32>
    %cst_47 = arith.constant 1.000000e+00 : f32
    %96 = vector.broadcast %cst_47 : f32 to vector<104x32xf32>
    %97 = arith.addf %96, %93 : vector<104x32xf32>
    %98 = arith.mulf %95, %97 : vector<104x32xf32>
    %cst_48 = arith.constant 1.000000e+00 : f32
    %99 = vector.broadcast %cst_48 : f32 to vector<104x32xf32>
    %100 = arith.subf %98, %99 : vector<104x32xf32>
    %101 = arith.mulf %90, %100 : vector<104x32xf32>
    %cst_49 = arith.constant 1.000000e+00 : f32
    %102 = vector.broadcast %cst_49 : f32 to vector<104x32xf32>
    %103 = arith.addf %98, %102 : vector<104x32xf32>
    %104 = tpu.reciprocal %103 {approx = true} : vector<104x32xf32> -> vector<104x32xf32>
    %105 = arith.mulf %101, %104 : vector<104x32xf32>
    %c0_50 = arith.constant 0 : index
    %c0_51 = arith.constant 0 : index
    %106 = vector.load %arg14[%c0_50, %c0_51] : memref<1x32xf32, #tpu.memory_space<vmem>>, vector<1x32xf32>
    %cst_52 = arith.constant dense<0.000000e+00> : vector<1x104xf32>
    %107 = tpu.matmul %106, %105, %cst_52 {dimension_numbers = #tpu.dot_dimension_numbers<[1], [1], [0], [0], [0, 0, 1, 0], [], []>} : vector<1x32xf32>, vector<104x32xf32>, vector<1x104xf32> -> vector<1x104xf32>
    %c0_53 = arith.constant 0 : index
    %c0_54 = arith.constant 0 : index
    %108 = vector.load %arg15[%c0_53, %c0_54] : memref<1x1xf32, #tpu.memory_space<vmem>>, vector<1x1xf32>
    %109 = vector.broadcast %108 : vector<1x1xf32> to vector<1x104xf32>
    %110 = arith.addf %107, %109 : vector<1x104xf32>
    %111 = vector.shape_cast %110 : vector<1x104xf32> to vector<1x1x104xf32>
    %c0_55 = arith.constant 0 : index
    %c0_56 = arith.constant 0 : index
    %c0_57 = arith.constant 0 : index
    %112 = vector.load %arg16[%c0_55, %c0_56, %c0_57] : memref<1x1x104xf32, #tpu.memory_space<vmem>>, vector<1x1x104xf32>
    tpu.vector_store %arg16[%c0_55, %c0_56, %c0_57], %111 {strides = array<i32>} : memref<1x1x104xf32, #tpu.memory_space<vmem>>, vector<1x1x104xf32>,
    return
  }
  func.func @transform_0(%arg0: i32) -> (i32, i32) {
    %c0_i32 = arith.constant 0 : i32
    %c0_i32_0 = arith.constant 0 : i32
    return %arg0, %c0_i32 : i32, i32
  }
  func.func @transform_1(%arg0: i32) -> (i32, i32) {
    %c0_i32 = arith.constant 0 : i32
    %c0_i32_0 = arith.constant 0 : i32
    %c0_i32_1 = arith.constant 0 : i32
    return %c0_i32, %c0_i32_0 : i32, i32
  }
  func.func @transform_2(%arg0: i32) -> (i32, i32) {
    %c0_i32 = arith.constant 0 : i32
    %c0_i32_0 = arith.constant 0 : i32
    %c0_i32_1 = arith.constant 0 : i32
    return %c0_i32, %c0_i32_0 : i32, i32
  }
  func.func @transform_3(%arg0: i32) -> (i32, i32) {
    %c0_i32 = arith.constant 0 : i32
    %c0_i32_0 = arith.constant 0 : i32
    %c0_i32_1 = arith.constant 0 : i32
    return %c0_i32, %c0_i32_0 : i32, i32
  }
  func.func @transform_4(%arg0: i32) -> (i32, i32) {
    %c0_i32 = arith.constant 0 : i32
    %c0_i32_0 = arith.constant 0 : i32
    %c0_i32_1 = arith.constant 0 : i32
    return %c0_i32, %c0_i32_0 : i32, i32
  }
  func.func @transform_5(%arg0: i32) -> (i32, i32) {
    %c0_i32 = arith.constant 0 : i32
    %c0_i32_0 = arith.constant 0 : i32
    %c0_i32_1 = arith.constant 0 : i32
    return %c0_i32, %c0_i32_0 : i32, i32
  }
  func.func @transform_6(%arg0: i32) -> (i32, i32) {
    %c0_i32 = arith.constant 0 : i32
    %c0_i32_0 = arith.constant 0 : i32
    %c0_i32_1 = arith.constant 0 : i32
    return %c0_i32, %c0_i32_0 : i32, i32
  }
  func.func @transform_7(%arg0: i32) -> (i32, i32) {
    %c0_i32 = arith.constant 0 : i32
    %c0_i32_0 = arith.constant 0 : i32
    %c0_i32_1 = arith.constant 0 : i32
    return %c0_i32, %c0_i32_0 : i32, i32
  }
  func.func @transform_8(%arg0: i32) -> (i32, i32) {
    %c0_i32 = arith.constant 0 : i32
    %c0_i32_0 = arith.constant 0 : i32
    %c0_i32_1 = arith.constant 0 : i32
    return %c0_i32, %c0_i32_0 : i32, i32
  }
  func.func @transform_9(%arg0: i32) -> (i32, i32) {
    %c0_i32 = arith.constant 0 : i32
    %c0_i32_0 = arith.constant 0 : i32
    %c0_i32_1 = arith.constant 0 : i32
    return %c0_i32, %c0_i32_0 : i32, i32
  }
  func.func @transform_10(%arg0: i32) -> (i32, i32) {
    %c0_i32 = arith.constant 0 : i32
    %c0_i32_0 = arith.constant 0 : i32
    %c0_i32_1 = arith.constant 0 : i32
    return %c0_i32, %c0_i32_0 : i32, i32
  }
  func.func @transform_11(%arg0: i32) -> (i32, i32) {
    %c0_i32 = arith.constant 0 : i32
    %c0_i32_0 = arith.constant 0 : i32
    %c0_i32_1 = arith.constant 0 : i32
    return %c0_i32, %c0_i32_0 : i32, i32
  }
  func.func @transform_12(%arg0: i32) -> (i32, i32) {
    %c0_i32 = arith.constant 0 : i32
    %c0_i32_0 = arith.constant 0 : i32
    %c0_i32_1 = arith.constant 0 : i32
    return %c0_i32, %c0_i32_0 : i32, i32
  }
  func.func @transform_13(%arg0: i32) -> (i32, i32) {
    %c0_i32 = arith.constant 0 : i32
    %c0_i32_0 = arith.constant 0 : i32
    %c0_i32_1 = arith.constant 0 : i32
    return %c0_i32, %c0_i32_0 : i32, i32
  }
  func.func @transform_14(%arg0: i32) -> (i32, i32) {
    %c0_i32 = arith.constant 0 : i32
    %c0_i32_0 = arith.constant 0 : i32
    %c0_i32_1 = arith.constant 0 : i32
    return %c0_i32, %c0_i32_0 : i32, i32
  }
  func.func @transform_15(%arg0: i32) -> (i32, i32, i32) {
    %c0_i32 = arith.constant 0 : i32
    %c0_i32_0 = arith.constant 0 : i32
    %c0_i32_1 = arith.constant 0 : i32
    return %arg0, %c0_i32, %c0_i32_0 : i32, i32, i32
  }
}

</mosaic_0001>

<bundles_post_ra>
// kernel: tpu_custom_call.1
= control target key start
LH: loop header
LB: loop body
LE: loop exit
PB: predicated region body
PF: predicated region fallthrough
CT: control target
= control target key end

     0   :  { %s7921_s0 = inlined_call_operand.vmem [shape: f32[208,24], index: 0, kind: input, shape index: {}]   ;;  %s7922_s1 = inlined_call_operand.vmem [shape: f32[1,16], index: 1, kind: input, shape index: {}]   ;;  %s7923_s2 = inlined_call_operand.vmem [shape: bf16[16,32], index: 2, kind: input, shape index: {}]   ;;  %s7924_s3 = inlined_call_operand.vmem [shape: f32[1,32], index: 3, kind: input, shape index: {}]   ;;  %s7925_s4 = inlined_call_operand.vmem [shape: bf16[32,16], index: 4, kind: input, shape index: {}]   ;;  %s7926_s5 = inlined_call_operand.vmem [shape: f32[1,16], index: 5, kind: input, shape index: {}]   ;;  %s7927_s6 = inlined_call_operand.vmem [shape: bf16[24,32], index: 6, kind: input, shape index: {}]   ;;  %s7928_s7 = inlined_call_operand.vmem [shape: bf16[16,32], index: 7, kind: input, shape index: {}]   ;;  %s7929_s8 = inlined_call_operand.vmem [shape: f32[1,32], index: 8, kind: input, shape index: {}]   ;;  %s7930_s9 = inlined_call_operand.vmem [shape: bf16[32,32], index: 9, kind: input, shape index: {}]   ;;  %s7931_s10 = inlined_call_operand.vmem [shape: f32[1,32], index: 10, kind: input, shape index: {}]   ;;  %s7932_s11 = inlined_call_operand.vmem [shape: bf16[32,32], index: 11, kind: input, shape index: {}]   ;;  %s7933_s12 = inlined_call_operand.vmem [shape: f32[1,32], index: 12, kind: input, shape index: {}]   ;;  %s7934_s13 = inlined_call_operand.vmem [shape: f32[1,32], index: 13, kind: input, shape index: {}]   ;;  %s7935_s14 = inlined_call_operand.<no memory space> [shape: f32[1,1], index: 14, kind: input, shape index: {}]   ;;  %s7936_s15 = inlined_call_operand.hbm [shape: f32[2,1,104], index: 15, kind: output, shape index: {}]  }
   0x1   :  { %8002 = sst [smem:[#allocation45_spill]] %s7921_s0  ;;  %v20_v0 = vstv %s7935_s14 }
   0x2   :  { %8003 = sst [smem:[#allocation46_spill]] %s7922_s1  ;;  %21 = vst [vmem:[#allocation2] sm:$0x1] %v20_v0 }
   0x3   :  { %8004 = sst [smem:[#allocation47_spill]] %s7923_s2 }
   0x4   :  { %8005 = sst [smem:[#allocation48_spill]] %s7924_s3 }
   0x5   :  { %22 = vsyncpa [#allocation4], 0 }
   0x6   :  { %24 = vsyncpa [#allocation4 + $0x1], 0  ;;  %s5894_s20 = smov 0   ;;  %s5896_s21 = smov 0  }
   0x7   :  { %s5898_s22 = smov 0   ;;  %s5900_s23 = smov 0  }
   0x8 LB: > { %s5915_s14 = sadd.s32 4294967295, %s5798_s23   ;;  %s4842_s24 = sadd.s32 4294967294, %s5798_s23   ;;  %s5798_s23 = sphi %s5900_s23, %s8147_s23   ;;  %s5794_s22 = sphi %s5898_s22, %s8146_s22   ;;  %s5790_s21 = sphi %s5896_s21, %s8145_s21   ;;  %s5786_s20 = sphi %s5894_s20, %s8144_s20  }
   0x9   : > { %s5919_s25 = sadd.s32 1, %s5798_s23   ;;  %s357_s26 = sadd.s32 1, %s5794_s22 }
   0xa   : > { %s354_s27 = ssub.s32 %s5798_s23, %s5919_s25  ;;  %p367_p0 = scmp.ne.s32.totalorder %s5794_s22, %s5790_s21 }
   0xb   : > { %p355_p1 = scmp.eq.s32.totalorder %s354_s27, 0  ;;  %p368_p2 = scmp.eq.s32.totalorder %s5915_s14, 1 }
   0xc   : > { %p373_p3 = scmp.ne.s32.totalorder %s5790_s21, %s5786_s20  ;;  %p374_p4 = scmp.eq.s32.totalorder %s4842_s24, 1 }
   0xd   : > { %s5930_s28 = scalar_select %p355_p1, %s5794_s22, %s357_s26  }
   0xe   : > { %p5932_p5 = por %p368_p2, %p367_p0  ;;  %p5936_p6 = por %p374_p4, %p373_p3 }
   0xf   : > { %p4845_p7 = scmp.ge.s32.totalorder %s5798_s23, 1  ;;  %p443_p8 = scmp.lt.s32.totalorder %s5798_s23, 3 }
  0x11   : > { %p444_p9 = pnand %p4845_p7, %p443_p8 }
  0x13   : > { %447 = sbr.rel (%p444_p9) target bundleno = 1948 (0x79c), region = 80 }
  0x18   : > { %s490_s16 = smul.u32 13, %s5915_s14  ;;  %v5800_v1 = vmov 23   ;;  %s8008_s0 = sld [smem:[#allocation45_spill]]  ;;  %v7950_v53 = vmov 683565275  }
  0x19   : > { %5463 = vset.pattern.permute.xlu1 %v5800_v1  ;;  %5462 = vset.pattern.permute.xlu0 %v5800_v1  ;;  %s8021_s1 = sld [smem:[#allocation46_spill]]  ;;  %v7948_v55 = vmov 2475754826   ;;  %v7946_v57 = vmov 2131351028   ;;  %s5075_s26 = sshll.u32 %s5915_s14, 4 }
  0x1a   : > { %p491_p10 = scmp.lt.s32.totalorder %s490_s16, 25  ;;  %v7944_v59 = vmov 2102212464   ;;  %v7942_v61 = vmov 920167782   ;;  %s8082_s2 = sld [smem:[#allocation47_spill]] }
  0x1b   : > { %s8124_s3 = sld [smem:[#allocation48_spill]]  ;;  %s7886_s18 = scalar_lea.hbm %s7936_s15, %s5075_s26 }
  0x1c   : > { %s8149_s16 = smov (!%p491_p10, %s490_s16), 25  ;;  %s5810_s14 = smov [#allocation3]  }
  0x1d   : > { %s4846_s17 = sshll.u32 %s8149_s16, 3 }
  0x1e   : > { %s5946_s24 = scalar_lea.vmem %s8008_s0, %s4846_s17 }
  0x1f   : > { %v5949_v2 = vld [vmem:[%s5946_s24 + $0x10] sm:$0xff]  ;;  %v5952_v3 = vld [vmem:[%s5946_s24 + $0x18] sm:$0xff]  ;;  %v5955_v4 = vld [vmem:[%s5946_s24] sm:$0xff] }
  0x20   : > { %8009 = vst [vmem:[#allocation6_spill] sm:$0xff] %v5949_v2  ;;  %8010 = vst [vmem:[#allocation7_spill] sm:$0xff] %v5952_v3  ;;  %523 = vperm.xlu1 %5463, %v5949_v2   ;;  %v5961_v6 = vld [vmem:[%s5946_s24 + $0x8] sm:$0xff]  ;;  %513 = vperm.xlu0 %5462, %v5955_v4   ;;  %v5968_v8 = vld [vmem:[%s5946_s24 + $0x20] sm:$0xff] }
  0x21   : > { %8011 = vst [vmem:[#allocation8_spill] sm:$0xff] %v5955_v4  ;;  %8012 = vst [vmem:[#allocation9_spill] sm:$0xff] %v5961_v6  ;;  %v5965_v7 = vld [vmem:[%s5946_s24 + $0x28] sm:$0xff]  ;;  %v5975_v11 = vld [vmem:[%s5946_s24 + $0x38] sm:$0xff] }
  0x22   : > { %8013 = vst [vmem:[#allocation10_spill] sm:$0xff] %v5965_v7  ;;  %8014 = vst [vmem:[#allocation11_spill] sm:$0xff] %v5968_v8  ;;  %v5978_v12 = vld [vmem:[%s5946_s24 + $0x30] sm:$0xff]  ;;  %v5981_v13 = vld [vmem:[%s5946_s24 + $0x48] sm:$0xff] }
  0x23   : > { %8015 = vst [vmem:[#allocation12_spill] sm:$0xff] %v5975_v11  ;;  %8016 = vst [vmem:[#allocation13_spill] sm:$0xff] %v5978_v12  ;;  %v5986_v15 = vld [vmem:[%s5946_s24 + $0x40] sm:$0xff]  ;;  %v5989_v16 = vld [vmem:[%s5946_s24 + $0x58] sm:$0xff] }
  0x24   : > { %8017 = vst [vmem:[#allocation14_spill] sm:$0xff] %v5981_v13  ;;  %8018 = vst [vmem:[#allocation15_spill] sm:$0xff] %v5986_v15  ;;  %v5992_v17 = vld [vmem:[%s5946_s24 + $0x50] sm:$0xff]  ;;  %528 = vperm.xlu1 %5463, %v5952_v3   ;;  %518 = vperm.xlu0 %5462, %v5961_v6   ;;  %v509_v20 = vld [vmem:[%s5946_s24 + $0x60] sm:$0xff] }
  0x25   : > { %8019 = vst [vmem:[#allocation16_spill] sm:$0xff] %v5989_v16  ;;  %8020 = vst [vmem:[#allocation17_spill] sm:$0xff] %v5992_v17  ;;  %v6012_v21 = vld [vmem:[%s8021_s1] ss:$0 sm:$0xff] }
  0x28   : > { %538 = vperm.xlu1 %5463, %v5965_v7   ;;  %533 = vperm.xlu0 %5462, %v5968_v8  }
  0x2c   : > { %548 = vperm.xlu1 %5463, %v5975_v11   ;;  %543 = vperm.xlu0 %5462, %v5978_v12  }
  0x30   : > { %558 = vperm.xlu1 %5463, %v5981_v13   ;;  %553 = vperm.xlu0 %5462, %v5986_v15  }
  0x34   : > { %568 = vperm.xlu1 %5463, %v5989_v16   ;;  %563 = vperm.xlu0 %5462, %v5992_v17  }
  0x38   : > { %573 = vperm.xlu0 %5462, %v509_v20  }
  0x9b   : > { %v524_v22 = vpop.permute.xlu1 %523  ;;  %v514_v23 = vpop.permute.xlu0 %513 }
  0x9c   : > { %v6015_v24 = vmul.f32 %v6012_v21, %v524_v22  ;;  %v6018_v25 = vmul.f32 %v6012_v21, %v514_v23 }
  0x9e   : > { %v806_v26 = vand.u32 2147483647, %v6015_v24  ;;  %v809_v27 = vand.u32 2139095040, %v6015_v24  ;;  %v598_v28 = vand.u32 2147483647, %v6018_v25  ;;  %v601_v29 = vand.u32 2139095040, %v6018_v25 }
  0x9f   : > { %v529_v30 = vpop.permute.xlu1 %528  ;;  %vm808_vm14 = vcmp.lt.s32.totalorder %v6015_v24, 0 }
  0xa0   : > { %v810_v31 = vshrl.u32 %v809_v27, 23  ;;  %v6025_v32 = vmul.f32 %v6012_v21, %v529_v30  ;;  %v813_v33 = vand.u32 8388607, %v806_v26  ;;  %v602_v34 = vshrl.u32 %v601_v29, 23 }
  0xa1   : > { %v605_v35 = vand.u32 8388607, %v598_v28  ;;  %v7938_v27 = vmov 1326507024  }
  0xa2   : > { %8022 = vst [vmem:[#allocation18_spill] sm:$0xff] %v6025_v32  ;;  %v4856_v36 = vadd.s32 4294967169, %v810_v31  ;;  %v4848_v37 = vadd.s32 4294967169, %v602_v34  ;;  %v913_v38 = vand.u32 2139095040, %v6025_v32  ;;  %v814_v40 = vor.u32 8388608, %v813_v33 }
  0xa3   : > { %v606_v41 = vor.u32 8388608, %v605_v35 }
  0xa4   : > { %v816_v39 = vadd.s32 1, %v4856_v36  ;;  %v608_v42 = vadd.s32 1, %v4848_v37  ;;  %v914_v43 = vshrl.u32 %v913_v38, 23  ;;  %v6032_v48 = vshll.u32 %v814_v40, 8 }
  0xa5   : > { %v6036_v50 = vshll.u32 %v606_v41, 8 }
  0xa6   : > { %vm817_vm0 = vcmp.gt.s32.totalorder %v816_v39, 0  ;;  %vm609_vm1 = vcmp.gt.s32.totalorder %v608_v42, 0  ;;  %v4860_v51 = vadd.s32 4294967169, %v914_v43 }
  0xa7   : > { %v818_v44 = vsel %vm817_vm0, %v816_v39, 0  ;;  %v610_v47 = vsel %vm609_vm1, %v608_v42, 0 }
  0xa8   : > { %v819_v45 = vshrl.u32 %v818_v44, 5  ;;  %v820_v46 = vand.u32 31, %v818_v44  ;;  %v6034_v49 = vand.u32 31, %v610_v47  ;;  %v6043_v63 = vshrl.u32 %v610_v47, 5 }
  0xa9   : > { %v920_v37 = vadd.s32 1, %v4860_v51 }
  0xaa   : > { %v821_v52 = vsub.s32 32, %v820_v46  ;;  %v823_v54 = vshll.u32 %v7950_v53, %v820_v46  ;;  %v826_v56 = vshll.u32 %v7948_v55, %v820_v46  ;;  %v829_v58 = vshll.u32 %v7946_v57, %v820_v46 }
  0xab   : > { %v832_v60 = vshll.u32 %v7944_v59, %v820_v46  ;;  %v835_v62 = vshll.u32 %v7942_v61, %v820_v46  ;;  %vm838_vm2 = vcmp.lt.s32.totalorder %v819_v45, 1  ;;  %vm840_vm3 = vcmp.lt.s32.totalorder %v819_v45, 3 }
  0xac   : > { %v822_v0 = vshrl.u32 %v7950_v53, %v821_v52  ;;  %v824_v1 = vshrl.u32 %v7948_v55, %v821_v52  ;;  %v827_v20 = vshrl.u32 %v7946_v57, %v821_v52  ;;  %v830_v22 = vshrl.u32 %v7944_v59, %v821_v52 }
  0xad   : > { %v833_v23 = vshrl.u32 %v7942_v61, %v821_v52  ;;  %v836_v29 = vshrl.u32 %v7938_v27, %v821_v52  ;;  %vm841_vm4 = vcmp.lt.s32.totalorder %v819_v45, 4  ;;  %v613_v34 = vsub.s32 32, %v6034_v49 }
  0xae   : > { %v825_v30 = vor.u32 %v824_v1, %v823_v54  ;;  %v828_v31 = vor.u32 %v827_v20, %v826_v56  ;;  %v831_v33 = vor.u32 %v830_v22, %v829_v58  ;;  %vm839_vm5 = vcmp.lt.s32.totalorder %v819_v45, 2 }
  0xaf   : > { %v834_v35 = vor.u32 %v833_v23, %v832_v60  ;;  %v837_v36 = vor.u32 %v836_v29, %v835_v62  ;;  %v615_v46 = vshll.u32 %v7950_v53, %v6034_v49  ;;  %v616_v51 = vshrl.u32 %v7948_v55, %v613_v34 }
  0xb0   : > { %v842_v38 = vsel %vm838_vm2, %v822_v0, %v825_v30  ;;  %v843_v39 = vsel %vm841_vm4, %v831_v33, 2102212464  ;;  %v846_v40 = vsel %vm838_vm2, %v825_v30, %v828_v31  ;;  %v850_v41 = vsel %vm838_vm2, %v828_v31, %v831_v33 }
  0xb1   : > { %v844_v42 = vsel %vm840_vm3, %v828_v31, %v843_v39  ;;  %v847_v43 = vsel %vm841_vm4, %v834_v35, 920167782  ;;  %v851_v44 = vsel %vm841_vm4, %v837_v36, 1326507024  ;;  %v618_v54 = vshll.u32 %v7948_v55, %v6034_v49 }
  0xb2   : > { %v848_v47 = vsel %vm840_vm3, %v831_v33, %v847_v43  ;;  %v852_v52 = vsel %vm840_vm3, %v834_v35, %v851_v44  ;;  %v845_v56 = vsel %vm839_vm5, %v842_v38, %v844_v42  ;;  %v619_v62 = vshrl.u32 %v7946_v57, %v613_v34 }
  0xb3   : > { %v849_v58 = vsel %vm839_vm5, %v846_v40, %v848_v47  ;;  %v853_v60 = vsel %vm839_vm5, %v850_v41, %v852_v52  ;;  %v617_v23 = vor.u32 %v616_v51, %v615_v46  ;;  %v621_v30 = vshll.u32 %v7946_v57, %v6034_v49 }
  0xb4   : > { %v6068_v0 = vmul.u32.u64.low %v6032_v48, %v853_v60  ;;  %v6069_v1 = vmul.u32.u64.high %v6032_v48, %v853_v60, %v6068_v0  ;;  %v6072_v20 = vmul.u32.u64.low %v6032_v48, %v849_v58  ;;  %v6073_v22 = vmul.u32.u64.high %v6032_v48, %v849_v58, %v6072_v20 }
  0xb5   : > { %v620_v29 = vor.u32 %v619_v62, %v618_v54  ;;  %v622_v31 = vshrl.u32 %v7944_v59, %v613_v34  ;;  %v614_v45 = vshrl.u32 %v7950_v53, %v613_v34  ;;  %v624_v33 = vshll.u32 %v7944_v59, %v6034_v49 }
  0xb6   : > { %v625_v35 = vshrl.u32 %v7942_v61, %v613_v34  ;;  %v628_v36 = vshrl.u32 %v7938_v27, %v613_v34  ;;  %v861_v38 = vmul.u32 %v6032_v48, %v845_v56  ;;  %v627_v40 = vshll.u32 %v7942_v61, %v6034_v49 }
  0xb7   : > { %v623_v39 = vor.u32 %v622_v31, %v621_v30  ;;  %vm630_vm6 = vcmp.lt.s32.totalorder %v6043_v63, 1  ;;  %vm863_vm7 = vc.u32 %v6069_v1, %v6072_v20  ;;  %v864_v41 = vadd.s32 1, %v6073_v22 }
  0xb8   : > { %v626_v42 = vor.u32 %v625_v35, %v624_v33  ;;  %vm631_vm8 = vcmp.lt.s32.totalorder %v6043_v63, 2  ;;  %v629_v43 = vor.u32 %v628_v36, %v627_v40  ;;  %vm632_vm9 = vcmp.lt.s32.totalorder %v6043_v63, 3  ;;  %v519_v36 = vpop.permute.xlu0 %518 }
  0xb9   : > { %vm633_vm10 = vcmp.lt.s32.totalorder %v6043_v63, 4  ;;  %v638_v48 = vsel %vm630_vm6, %v617_v23, %v620_v29  ;;  %v865_v34 = vsel %vm863_vm7, %v864_v41, %v6073_v22  ;;  %v642_v46 = vsel %vm630_vm6, %v620_v29, %v623_v39 }
  0xba   : > { %v635_v44 = vsel %vm633_vm10, %v623_v39, 2102212464  ;;  %v639_v49 = vsel %vm633_vm10, %v626_v42, 920167782  ;;  %v866_v47 = vadd.s32 %v865_v34, %v861_v38  ;;  %v634_v52 = vsel %vm630_vm6, %v614_v45, %v617_v23 }
  0xbb   : > { %v640_v51 = vsel %vm632_vm9, %v623_v39, %v639_v49  ;;  %v643_v54 = vsel %vm633_vm10, %v629_v43, 1326507024  ;;  %v636_v56 = vsel %vm632_vm9, %v620_v29, %v635_v44  ;;  %vm921_vm11 = vcmp.gt.s32.totalorder %v920_v37, 0 }
  0xbc   : > { %v641_v58 = vsel %vm631_vm8, %v638_v48, %v640_v51  ;;  %v644_v60 = vsel %vm632_vm9, %v626_v42, %v643_v54  ;;  %v867_v62 = vadd.s32 536870912, %v866_v47  ;;  %v922_v45 = vsel %vm921_vm11, %v920_v37, 0 }
  0xbd   : > { %v645_v0 = vsel %vm631_vm8, %v642_v46, %v644_v60  ;;  %v6100_v30 = vmul.u32.u64.low %v6036_v50, %v641_v58  ;;  %v6101_v22 = vmul.u32.u64.high %v6036_v50, %v641_v58, %v6100_v30  ;;  %v637_v33 = vsel %vm631_vm8, %v634_v52, %v636_v56 }
  0xbe   : > { %v6105_v31 = vmul.u32.u64.low %v6036_v50, %v645_v0  ;;  %v6106_v23 = vmul.u32.u64.high %v6036_v50, %v645_v0, %v6105_v31  ;;  %v6108_v29 = vshrl.u32 %v867_v62, 30  ;;  %v924_v35 = vand.u32 31, %v922_v45 }
  0xbf   : > { %v656_v39 = vadd.s32 1, %v6101_v22  ;;  %v653_v41 = vmul.u32 %v6036_v50, %v637_v33  ;;  %v910_v42 = vand.u32 2147483647, %v6025_v32  ;;  %v6119_v37 = vmul.f32 %v6012_v21, %v519_v36 }
  0xc0   : > { %v869_v38 = vshll.u32 %v6108_v29, 30  ;;  %v925_v40 = vsub.s32 32, %v924_v35  ;;  %vm655_vm12 = vc.u32 %v6106_v23, %v6100_v30  ;;  %v927_v48 = vshll.u32 %v7950_v53, %v924_v35 }
  0xc1   : > { %v657_v63 = vsel %vm655_vm12, %v656_v39, %v6101_v22  ;;  %v930_v49 = vshll.u32 %v7948_v55, %v924_v35  ;;  %v933_v52 = vshll.u32 %v7946_v57, %v924_v35  ;;  %v705_v56 = vand.u32 2139095040, %v6119_v37 }
  0xc2   : > { %v6121_v43 = vsub.s32 %v866_v47, %v869_v38  ;;  %v658_v34 = vadd.s32 %v657_v63, %v653_v41  ;;  %v928_v44 = vshrl.u32 %v7948_v55, %v925_v40  ;;  %v931_v50 = vshrl.u32 %v7946_v57, %v925_v40 }
  0xc3   : > { %v917_v47 = vand.u32 8388607, %v910_v42  ;;  %v934_v54 = vshrl.u32 %v7944_v59, %v925_v40  ;;  %v923_v60 = vshrl.u32 %v922_v45, 5  ;;  %v936_v62 = vshll.u32 %v7944_v59, %v924_v35 }
  0xc4   : > { %v872_v46 = vsub.s32 0, %v6121_v43  ;;  %v659_v51 = vadd.s32 536870912, %v658_v34  ;;  %v937_v0 = vshrl.u32 %v7942_v61, %v925_v40  ;;  %v929_v31 = vor.u32 %v928_v44, %v927_v48 }
  0xc5   : > { %v932_v33 = vor.u32 %v931_v50, %v930_v49  ;;  %v935_v36 = vor.u32 %v934_v54, %v933_v52  ;;  %v939_v41 = vshll.u32 %v7942_v61, %v924_v35  ;;  %v940_v63 = vshrl.u32 %v7938_v27, %v925_v40 }
  0xc6   : > { %v4857_v58 = vmin.u32 %v872_v46, %v6121_v43  ;;  %v6137_v22 = vshrl.u32 %v659_v51, 30  ;;  %v938_v39 = vor.u32 %v937_v0, %v936_v62  ;;  %v918_v18 = vor.u32 8388608, %v917_v47 }
  0xc7   : > { %v7937_v45 = vand.u32 2147483647, %v6119_v37  ;;  %v926_v14 = vshrl.u32 %v7950_v53, %v925_v40  ;;  %vm945_vm13 = vcmp.lt.s32.totalorder %v923_v60, 4  ;;  %v706_v51 = vshrl.u32 %v705_v56, 23 }
  0xc8   : > { %v874_v38 = vclz %v4857_v58  ;;  %v661_v19 = vshll.u32 %v6137_v22, 30  ;;  %vm942_vm15 = vcmp.lt.s32.totalorder %v923_v60, 1  ;;  %vm944_vm0 = vcmp.lt.s32.totalorder %v923_v60, 3 }
  0xc9   : > { %v951_v35 = vsel %vm945_vm13, %v938_v39, 920167782  ;;  %v941_v44 = vor.u32 %v940_v63, %v939_v41  ;;  %v950_v49 = vsel %vm942_vm15, %v929_v31, %v932_v33  ;;  %v862_v52 = vadd.s32 %v6072_v20, %v6069_v1 }
  0xca   : > { %v4858_v46 = vadd.s32 4294967294, %v874_v38  ;;  %v6145_v48 = vsub.s32 %v658_v34, %v661_v19  ;;  %v952_v50 = vsel %vm944_vm0, %v935_v36, %v951_v35  ;;  %v958_v54 = vshll.u32 %v918_v18, 8 }
  0xcb   : > { %v892_v19 = vsub.s32 4, %v6108_v29  ;;  %vm943_vm2 = vcmp.lt.s32.totalorder %v923_v60, 2  ;;  %v4852_v34 = vadd.s32 4294967169, %v706_v51  ;;  %v947_v62 = vsel %vm945_vm13, %v935_v36, 2102212464 }
  0xcc   : > { %vm4859_vm1 = vcmp.lt.s32.totalorder %v4858_v46, 0  ;;  %v664_v47 = vsub.s32 0, %v6145_v48  ;;  %v953_v0 = vsel %vm943_vm2, %v950_v49, %v952_v50  ;;  %v954_v38 = vsel %vm942_vm15, %v932_v33, %v935_v36  ;;  %v539_v36 = vpop.permute.xlu1 %538 }
  0xcd   : > { %v877_v40 = vsel %vm4859_vm1, 0, %v4858_v46  ;;  %v946_v1 = vsel %vm942_vm15, %v926_v14, %v929_v31  ;;  %v955_v20 = vsel %vm945_vm13, %v941_v44, 1326507024  ;;  %v712_v50 = vadd.s32 1, %v4852_v34 }
  0xce   : > { %v882_v56 = vsub.s32 4294967266, %v877_v40  ;;  %v4849_v58 = vmin.u32 %v664_v47, %v6145_v48  ;;  %v878_v41 = vsub.s32 32, %v877_v40  ;;  %v956_v46 = vsel %vm944_vm0, %v938_v39, %v955_v20 }
  0xcf   : > { %v6161_v35 = vmul.u32.u64.low %v958_v54, %v953_v0  ;;  %v6162_v10 = vmul.u32.u64.high %v958_v54, %v953_v0, %v6161_v35  ;;  %v948_v47 = vsel %vm944_vm0, %v932_v33, %v947_v62  ;;  %v957_v49 = vsel %vm943_vm2, %v954_v38, %v956_v46 }
  0xd0   : > { %v883_v63 = vadd.s32 127, %v882_v56  ;;  %v666_v18 = vclz %v4849_v58  ;;  %vm6169_vm3 = vcmp.le.f32.partialorder %v806_v26, 0.7853982  ;;  %v880_v56 = vshrl.u32 %v862_v52, %v878_v41 }
  0xd1   : > { %v6173_v44 = vmul.u32.u64.low %v958_v54, %v957_v49  ;;  %v6174_v39 = vmul.u32.u64.high %v958_v54, %v957_v49, %v6173_v44  ;;  %v893_v58 = vsel %vm808_vm14, %v892_v19, %v6108_v29  ;;  %v6181_v33 = vand.u32 8388607, %v7937_v45  ;;  %v534_v19 = vpop.permute.xlu0 %533 }
  0xd2   : > { %v884_v51 = vshll.u32 %v883_v63, 23  ;;  %v4850_v31 = vadd.s32 4294967294, %v666_v18  ;;  %vm713_vm4 = vcmp.gt.s32.totalorder %v712_v50, 0  ;;  %v949_v26 = vsel %vm943_vm2, %v946_v1, %v948_v47  ;;  %v549_v1 = vpop.permute.xlu1 %548 }
  0xd3   : > { %v968_v34 = vadd.s32 1, %v6162_v10  ;;  %v714_v62 = vsel %vm713_vm4, %v712_v50, 0  ;;  %v879_v0 = vshll.u32 %v6121_v43, %v877_v40  ;;  %v895_v41 = vsel %vm6169_vm3, 0, %v893_v58 }
  0xd4   : > { %vm4851_vm5 = vcmp.lt.s32.totalorder %v4850_v31, 0  ;;  %v885_v38 = vor.u32 4788187, %v884_v51  ;;  %v716_v52 = vand.u32 31, %v714_v62  ;;  %v965_v18 = vmul.u32 %v958_v54, %v949_v26 }
  0xd5   : > { %v669_v63 = vsel %vm4851_vm5, 0, %v4850_v31  ;;  %v881_v20 = vor.u32 %v880_v56, %v879_v0  ;;  %vm967_vm6 = vc.u32 %v6174_v39, %v6161_v35  ;;  %vm600_vm7 = vcmp.lt.s32.totalorder %v6018_v25, 0 }
  0xd6   : > { %v674_v29 = vsub.s32 4294967266, %v669_v63  ;;  %v717_v60 = vsub.s32 32, %v716_v52  ;;  %v969_v43 = vsel %vm967_vm6, %v968_v34, %v6162_v10  ;;  %v710_v40 = vor.u32 8388608, %v6181_v33 }
  0xd7   : > { %v6194_v51 = vmul.f32 %v6012_v21, %v539_v36  ;;  %v886_v47 = vand.u32 2147483647, %v885_v38  ;;  %v670_v49 = vsub.s32 32, %v669_v63  ;;  %v970_v50 = vadd.s32 %v969_v43, %v965_v18 }
  0xd8   : > { %v675_v46 = vadd.s32 127, %v674_v29  ;;  %v6197_v54 = vmul.f32 %v6012_v21, %v534_v19  ;;  %v6199_v31 = vadd.s32 3, %v895_v41  ;;  %v654_v44 = vadd.s32 %v6100_v30, %v6106_v23 }
  0xd9   : > { %8025 = vst [vmem:[#allocation19_spill] sm:$0xff] %v6194_v51  ;;  %v684_v56 = vsub.s32 4, %v6137_v22  ;;  %v6205_v10 = vmul.f32 %v6012_v21, %v549_v1  ;;  %v888_v58 = vcvt.s32.f32 %v881_v20  ;;  %v971_v36 = vadd.s32 536870912, %v970_v50 }
  0xda   : > { %8026 = vst [vmem:[#allocation20_spill] sm:$0xff] %v6197_v54  ;;  %v676_v33 = vshll.u32 %v675_v46, 23  ;;  %v720_v26 = vshrl.u32 %v7948_v55, %v717_v60  ;;  %v671_v34 = vshll.u32 %v6145_v48, %v669_v63  ;;  %v715_v0 = vshrl.u32 %v714_v62, 5 }
  0xdb   : > { %8027 = vst [vmem:[#allocation21_spill] sm:$0xff] %v6205_v10  ;;  %v723_v38 = vshrl.u32 %v7946_v57, %v717_v60  ;;  %v726_v29 = vshrl.u32 %v7944_v59, %v717_v60  ;;  %v6211_v19 = vmul.f32 %v888_v58, %v886_v47  ;;  %v672_v30 = vshrl.u32 %v654_v44, %v670_v49 }
  0xdc   : > { %v6213_v23 = vshrl.u32 %v971_v36, 30  ;;  %v719_v21 = vshll.u32 %v7950_v53, %v716_v52  ;;  %v722_v20 = vshll.u32 %v7948_v55, %v716_v52  ;;  %v725_v18 = vshll.u32 %v7946_v57, %v716_v52 }
  0xdd   : > { %v728_v1 = vshll.u32 %v7944_v59, %v716_v52  ;;  %v729_v48 = vshrl.u32 %v7942_v61, %v717_v60  ;;  %v677_v62 = vor.u32 4788187, %v676_v33  ;;  %v732_v43 = vshrl.u32 %v7938_v27, %v717_v60 }
  0xde   : > { %v973_v63 = vshll.u32 %v6213_v23, 30  ;;  %v721_v46 = vor.u32 %v720_v26, %v719_v21  ;;  %v724_v47 = vor.u32 %v723_v38, %v722_v20  ;;  %v727_v49 = vor.u32 %v726_v29, %v725_v18 }
  0xdf   : > { %v730_v44 = vor.u32 %v729_v48, %v728_v1  ;;  %v731_v58 = vshll.u32 %v7942_v61, %v716_v52  ;;  %v6223_v36 = vand.u32 3, %v895_v41  ;;  %vm6227_vm8 = vcmp.le.f32.partialorder %v598_v28, 0.7853982 }
  0xe0   : > { %v673_v9 = vor.u32 %v672_v30, %v671_v34  ;;  %v685_v33 = vsel %vm600_vm7, %v684_v56, %v6137_v22  ;;  %v6234_v26 = vsub.s32 %v970_v50, %v973_v63  ;;  %v890_v38 = vxor.u32 2147483648, %v6211_v19 }
  0xe1   : > { %8028 = vst [vmem:[#allocation22_spill] sm:$0xff] %v6223_v36  ;;  %v718_v29 = vshrl.u32 %v7950_v53, %v717_v60  ;;  %v733_v52 = vor.u32 %v732_v43, %v731_v58  ;;  %v750_v41 = vshll.u32 %v710_v40, 8  ;;  %v678_v21 = vand.u32 2147483647, %v677_v62 }
  0xe2   : > { %vm912_vm9 = vcmp.lt.s32.totalorder %v6025_v32, 0  ;;  %v976_v28 = vsub.s32 0, %v6234_v26  ;;  %vm734_vm10 = vcmp.lt.s32.totalorder %v715_v0, 1  ;;  %vm737_vm11 = vcmp.lt.s32.totalorder %v715_v0, 4 }
  0xe3   : > { %vm736_vm12 = vcmp.lt.s32.totalorder %v715_v0, 3  ;;  %v739_v34 = vsel %vm737_vm11, %v727_v49, 2102212464  ;;  %v742_v30 = vsel %vm734_vm10, %v721_v46, %v724_v47  ;;  %v743_v20 = vsel %vm737_vm11, %v730_v44, 920167782 }
  0xe4   : > { %v680_v22 = vcvt.s32.f32 %v673_v9  ;;  %v4861_v50 = vmin.u32 %v976_v28, %v6234_v26  ;;  %vm735_vm13 = vcmp.lt.s32.totalorder %v715_v0, 2  ;;  %v744_v56 = vsel %vm736_vm12, %v727_v49, %v743_v20 }
  0xe5   : > { %v996_v60 = vsub.s32 4, %v6213_v23  ;;  %v745_v40 = vsel %vm735_vm13, %v742_v30, %v744_v56  ;;  %v746_v18 = vsel %vm734_vm10, %v724_v47, %v727_v49  ;;  %v747_v1 = vsel %vm737_vm11, %v733_v52, 1326507024 }
  0xe6   : > { %v978_v48 = vclz %v4861_v50  ;;  %v738_v62 = vsel %vm734_vm10, %v718_v29, %v721_v46  ;;  %v740_v63 = vsel %vm736_vm12, %v724_v47, %v739_v34  ;;  %v748_v43 = vsel %vm736_vm12, %v730_v44, %v747_v1 }
  0xe7   : > { %v681_v58 = vmul.f32 %v680_v22, %v678_v21  ;;  %vm6245_vm15 = vcmp.le.f32.partialorder %v910_v42, 0.7853982  ;;  %v749_v9 = vsel %vm735_vm13, %v746_v18, %v748_v43  ;;  %v1121_v46 = vand.u32 2139095040, %v6194_v51 }
  0xe8   : > { %v6250_v28 = vmul.u32.u64.low %v750_v41, %v745_v40  ;;  %v6251_v20 = vmul.u32.u64.high %v750_v41, %v745_v40, %v6250_v28  ;;  %v4862_v27 = vadd.s32 4294967294, %v978_v48  ;;  %v6258_v47 = vand.u32 3, %v6199_v31 }
  0xe9   : > { %v6253_v30 = vmul.u32.u64.low %v750_v41, %v749_v9  ;;  %v6254_v49 = vmul.u32.u64.high %v750_v41, %v749_v9, %v6253_v30  ;;  %v687_v42 = vsel %vm6227_vm8, 0, %v685_v33  ;;  %v741_v44 = vsel %vm735_vm13, %v738_v62, %v740_v63 }
  0xea   : > { %v1017_v29 = vand.u32 2139095040, %v6197_v54  ;;  %v966_v52 = vadd.s32 %v6161_v35, %v6174_v39  ;;  %vm4863_vm0 = vcmp.lt.s32.totalorder %v4862_v27, 0  ;;  %v7941_v21 = vand.u32 2147483647, %v6194_v51 }
  0xeb   : > { %v1122_v34 = vshrl.u32 %v1121_v46, 23  ;;  %v891_v22 = vsel %vm808_vm14, %v890_v38, %v6211_v19  ;;  %v981_v31 = vsel %vm4863_vm0, 0, %v4862_v27  ;;  %v997_v33 = vsel %vm912_vm9, %v996_v60, %v6213_v23 }
  0xec   : > { %v760_v0 = vadd.s32 1, %v6251_v20  ;;  %v682_v50 = vxor.u32 2147483648, %v681_v58  ;;  %v982_v56 = vsub.s32 32, %v981_v31  ;;  %v986_v40 = vsub.s32 4294967266, %v981_v31 }
  0xed   : > { %v757_v18 = vmul.u32 %v750_v41, %v741_v44  ;;  %vm759_vm1 = vc.u32 %v6254_v49, %v6250_v28  ;;  %v4868_v35 = vadd.s32 4294967169, %v1122_v34  ;;  %v7940_v39 = vand.u32 2147483647, %v6197_v54 }
  0xee   : > { %v1018_v1 = vshrl.u32 %v1017_v29, 23  ;;  %v894_v27 = vsel %vm6169_vm3, %v6015_v24, %v891_v22  ;;  %v987_v19 = vadd.s32 127, %v986_v40  ;;  %v761_v38 = vsel %vm759_vm1, %v760_v0, %v6251_v20 }
  0xef   : > { %v1125_v23 = vand.u32 8388607, %v7941_v21  ;;  %v984_v60 = vshrl.u32 %v966_v52, %v982_v56  ;;  %v762_v48 = vadd.s32 %v761_v38, %v757_v18  ;;  %v1128_v62 = vadd.s32 1, %v4868_v35 }
  0xf0   : > { %v4864_v41 = vadd.s32 4294967169, %v1018_v1  ;;  %v683_v63 = vsel %vm600_vm7, %v682_v50, %v681_v58  ;;  %v691_v43 = vadd.s32 3, %v687_v42  ;;  %v6284_v9 = vand.u32 3, %v687_v42 }
  0xf1   : > { %v6288_v14 = vsel %vm6245_vm15, 0, %v997_v33  ;;  %v983_v30 = vshll.u32 %v6234_v26, %v981_v31  ;;  %v763_v20 = vadd.s32 536870912, %v762_v48  ;;  %vm1129_vm14 = vcmp.gt.s32.totalorder %v1128_v62, 0 }
  0xf2   : > { %v1021_v46 = vand.u32 8388607, %v7940_v39  ;;  %5476 = vcosq.f32 %v894_v27  ;;  %v988_v44 = vshll.u32 %v987_v19, 23  ;;  %v1126_v29 = vor.u32 8388608, %v1125_v23 }
  0xf3   : > { %v1130_v52 = vsel %vm1129_vm14, %v1128_v62, 0  ;;  %v6293_v34 = vor.u32 %v984_v60, %v983_v30  ;;  %v6295_v58 = vshrl.u32 %v763_v20, 30  ;;  %v1024_v22 = vadd.s32 1, %v4864_v41 }
  0xf4   : > { %v1132_v42 = vand.u32 31, %v1130_v52  ;;  %5478 = vsinq.f32 %v894_v27  ;;  %v6300_v26 = vsel %vm6227_vm8, %v6018_v25, %v683_v63  ;;  %v6302_v31 = vand.u32 3, %v691_v43 }
  0xf5   : > { %v6305_v33 = vadd.s32 3, %v6288_v14  ;;  %v765_v0 = vshll.u32 %v6295_v58, 30  ;;  %v1022_v56 = vor.u32 8388608, %v1021_v46  ;;  %v989_v18 = vor.u32 4788187, %v988_v44 }
  0xf6   : > { %v1133_v50 = vsub.s32 32, %v1132_v42  ;;  %v758_v35 = vadd.s32 %v6250_v28, %v6254_v49  ;;  %v6310_v1 = vshll.u32 %v1126_v29, 8  ;;  %v1329_v5 = vand.u32 2139095040, %v6205_v10 }
  0xf7   : > { %v992_v27 = vcvt.s32.f32 %v6293_v34  ;;  %v6314_v19 = vsub.s32 %v762_v48, %v765_v0  ;;  %vm1025_vm2 = vcmp.gt.s32.totalorder %v1024_v22, 0  ;;  %v1135_v23 = vshll.u32 %v7950_v53, %v1132_v42 }
  0xf8   : > { %v1136_v38 = vshrl.u32 %v7948_v55, %v1133_v50  ;;  %v1138_v60 = vshll.u32 %v7948_v55, %v1132_v42  ;;  %v1139_v62 = vshrl.u32 %v7946_v57, %v1133_v50  ;;  %v1142_v41 = vshrl.u32 %v7944_v59, %v1133_v50 }
  0xf9   : > { %v768_v28 = vsub.s32 0, %v6314_v19  ;;  %v1131_v49 = vshrl.u32 %v1130_v52, 5  ;;  %v1141_v63 = vshll.u32 %v7946_v57, %v1132_v42  ;;  %v6323_v43 = vshll.u32 %v1022_v56, 8 }
  0xfa   : > { %v1137_v48 = vor.u32 %v1136_v38, %v1135_v23  ;;  %v1140_v30 = vor.u32 %v1139_v62, %v1138_v60  ;;  %v1144_v20 = vshll.u32 %v7944_v59, %v1132_v42  ;;  %v1145_v46 = vshrl.u32 %v7942_v61, %v1133_v50 }
  0xfb   : > { %v990_v44 = vand.u32 2147483647, %v989_v18  ;;  %v4853_v29 = vmin.u32 %v768_v28, %v6314_v19  ;;  %v1143_v34 = vor.u32 %v1142_v41, %v1141_v63  ;;  %v1026_v0 = vsel %vm1025_vm2, %v1024_v22, 0 }
  0xfc   : > { %vm704_vm3 = vcmp.lt.s32.totalorder %v6119_v37, 0  ;;  %v788_v52 = vsub.s32 4, %v6295_v58  ;;  %v1146_v39 = vor.u32 %v1145_v46, %v1144_v20  ;;  %v1147_v56 = vshll.u32 %v7942_v61, %v1132_v42 }
  0xfd   : > { %v8033_v21 = vmov 1326507024   ;;  %v770_v23 = vclz %v4853_v29  ;;  %v1134_v60 = vshrl.u32 %v7950_v53, %v1133_v50  ;;  %vm1150_vm4 = vcmp.lt.s32.totalorder %v1131_v49, 1 }
  0xfe   : > { %v1148_v38 = vshrl.u32 %v8033_v21, %v1133_v50  ;;  %vm1151_vm5 = vcmp.lt.s32.totalorder %v1131_v49, 2  ;;  %vm1152_vm6 = vcmp.lt.s32.totalorder %v1131_v49, 3  ;;  %vm1153_vm7 = vcmp.lt.s32.totalorder %v1131_v49, 4 }
  0xff   : > { %v1158_v62 = vsel %vm1150_vm4, %v1137_v48, %v1140_v30  ;;  %v6334_v41 = vpop.eup %5476  ;;  %v4854_v22 = vadd.s32 4294967294, %v770_v23  ;;  %v1155_v28 = vsel %vm1153_vm7, %v1143_v34, 2102212464  ;;  %v1159_v63 = vsel %vm1153_vm7, %v1146_v39, 920167782 }
 0x100   : > { %v1149_v18 = vor.u32 %v1148_v38, %v1147_v56  ;;  %v1162_v40 = vsel %vm1150_vm4, %v1140_v30, %v1143_v34  ;;  %v1154_v20 = vsel %vm1150_vm4, %v1134_v60, %v1137_v48  ;;  %v1156_v46 = vsel %vm1152_vm6, %v1140_v30, %v1155_v28 }
 0x101   : > { %v1160_v42 = vsel %vm1152_vm6, %v1143_v34, %v1159_v63  ;;  %v6336_v59 = vpop.eup %5478  ;;  %vm4855_vm8 = vcmp.lt.s32.totalorder %v4854_v22, 0  ;;  %v6339_v56 = vshrl.u32 %v1026_v0, 5  ;;  %v1157_v34 = vsel %vm1151_vm5, %v1154_v20, %v1156_v46 }
 0x102   : > { %v1163_v61 = vsel %vm1153_vm7, %v1149_v18, 1326507024  ;;  %v1161_v50 = vsel %vm1151_vm5, %v1158_v62, %v1160_v42  ;;  %v773_v38 = vsel %vm4855_vm8, 0, %v4854_v22  ;;  %v6348_v60 = vshrl.u32 %v1329_v5, 23 }
 0x103   : > { %v1164_v29 = vsel %vm1152_vm6, %v1146_v39, %v1163_v61  ;;  %v6343_v23 = vmul.u32.u64.low %v6310_v1, %v1161_v50  ;;  %v6344_v55 = vmul.u32.u64.high %v6310_v1, %v1161_v50, %v6343_v23  ;;  %v774_v48 = vsub.s32 32, %v773_v38 }
 0x104   : > { %v1165_v57 = vsel %vm1151_vm5, %v1162_v40, %v1164_v29  ;;  %v778_v30 = vsub.s32 4294967266, %v773_v38  ;;  %v6350_v18 = vmul.f32 %v992_v27, %v990_v44  ;;  %v1028_v62 = vand.u32 31, %v1026_v0 }
 0x105   : > { %v6353_v61 = vmul.u32.u64.low %v6310_v1, %v1165_v57  ;;  %v6354_v39 = vmul.u32.u64.high %v6310_v1, %v1165_v57, %v6353_v61  ;;  %v775_v40 = vshll.u32 %v6314_v19, %v773_v38  ;;  %v776_v22 = vshrl.u32 %v758_v35, %v774_v48  ;;  %v6465_v48 = vld [vmem:[%s8021_s1] ss:$0 sm:$0xff] }
 0x106   : > { %v779_v28 = vadd.s32 127, %v778_v30  ;;  %v789_v63 = vsel %vm704_vm3, %v788_v52, %v6295_v58  ;;  %v1173_v49 = vmul.u32 %v6310_v1, %v1157_v34  ;;  %v1176_v5 = vadd.s32 1, %v6344_v55 }
 0x107   : > { %v1029_v20 = vsub.s32 32, %v1028_v62  ;;  %vm1046_vm10 = vcmp.lt.s32.totalorder %v6339_v56, 1  ;;  %v1031_v57 = vshll.u32 %v7950_v53, %v1028_v62  ;;  %v8034_v44 = vmov 2475754826  }
 0x108   : > { %v780_v27 = vshll.u32 %v779_v28, 23  ;;  %v1034_v0 = vshll.u32 %v8034_v44, %v1028_v62  ;;  %vm1047_vm11 = vcmp.lt.s32.totalorder %v6339_v56, 2  ;;  %v777_v35 = vor.u32 %v776_v22, %v775_v40 }
 0x109   : > { %vm1175_vm12 = vc.u32 %v6354_v39, %v6343_v23  ;;  %v1032_v58 = vshrl.u32 %v8034_v44, %v1029_v20  ;;  %v8035_v19 = vmov 2131351028   ;;  %v8036_v50 = vmov 2102212464  }
 0x10a   : > { %v1037_v1 = vshll.u32 %v8035_v19, %v1028_v62  ;;  %v781_v52 = vor.u32 4788187, %v780_v27  ;;  %v1177_v46 = vsel %vm1175_vm12, %v1176_v5, %v6344_v55  ;;  %v1035_v42 = vshrl.u32 %v8035_v19, %v1029_v20 }
 0x10b   : > { %v1040_v29 = vshll.u32 %v8036_v50, %v1028_v62  ;;  %v8037_v38 = vand.u32 2147483647, %v6119_v37  ;;  %v1178_v30 = vadd.s32 %v1177_v46, %v1173_v49  ;;  %v1033_v34 = vor.u32 %v1032_v58, %v1031_v57 }
 0x10c   : > { %v1038_v61 = vshrl.u32 %v8036_v50, %v1029_v20  ;;  %v8040_v40 = vmov 920167782   ;;  %v782_v28 = vand.u32 2147483647, %v781_v52  ;;  %v1036_v27 = vor.u32 %v1035_v42, %v1034_v0 }
 0x10d   : > { %vm6375_vm13 = vcmp.le.f32.partialorder %v8037_v38, 0.7853982  ;;  %v1041_v22 = vshrl.u32 %v8040_v40, %v1029_v20  ;;  %v1043_v55 = vshll.u32 %v8040_v40, %v1028_v62  ;;  %v1044_v5 = vshrl.u32 %v8033_v21, %v1029_v20 }
 0x10e   : > { %v1179_v53 = vadd.s32 536870912, %v1178_v30  ;;  %v1039_v17 = vor.u32 %v1038_v61, %v1037_v1  ;;  %vm1048_vm0 = vcmp.lt.s32.totalorder %v6339_v56, 3  ;;  %v784_v38 = vcvt.s32.f32 %v777_v35 }
 0x10f   : > { %v1042_v16 = vor.u32 %v1041_v22, %v1040_v29  ;;  %v1045_v15 = vor.u32 %v1044_v5, %v1043_v55  ;;  %vm1049_vm1 = vcmp.lt.s32.totalorder %v6339_v56, 4  ;;  %v1054_v49 = vsel %vm1046_vm10, %v1033_v34, %v1036_v27 }
 0x110   : > { %v1180_v57 = vshrl.u32 %v1179_v53, 30  ;;  %v8041_v58 = vmov 683565275   ;;  %v1051_v0 = vsel %vm1049_vm1, %v1039_v17, 2102212464  ;;  %v785_v62 = vmul.f32 %v784_v38, %v782_v28 }
 0x111   : > { %v1030_v52 = vshrl.u32 %v8041_v58, %v1029_v20  ;;  %v1055_v46 = vsel %vm1049_vm1, %v1042_v16, 920167782  ;;  %vm1120_vm14 = vcmp.lt.s32.totalorder %v6194_v51, 0  ;;  %v1058_v35 = vsel %vm1046_vm10, %v1036_v27, %v1039_v17 }
 0x112   : > { %v1056_v1 = vsel %vm1048_vm0, %v1039_v17, %v1055_v46  ;;  %v1059_v42 = vsel %vm1049_vm1, %v1045_v15, 1326507024  ;;  %v994_v29 = vxor.u32 2147483648, %v6350_v18  ;;  %v1181_v61 = vshll.u32 %v1180_v57, 30 }
 0x113   : > { %v1050_v53 = vsel %vm1046_vm10, %v1030_v52, %v1033_v34  ;;  %v1057_v20 = vsel %vm1047_vm11, %v1054_v49, %v1056_v1  ;;  %v1052_v22 = vsel %vm1048_vm0, %v1036_v27, %v1051_v0  ;;  %v1060_v28 = vsel %vm1048_vm0, %v1042_v16, %v1059_v42 }
 0x114   : > { %v6403_v55 = vmul.u32.u64.low %v6323_v43, %v1057_v20  ;;  %v6404_v5 = vmul.u32.u64.high %v6323_v43, %v1057_v20, %v6403_v55  ;;  %v6407_v15 = vand.u32 3, %v6305_v33  ;;  %v6410_v17 = vand.u32 3, %v6288_v14 }
 0x115   : > { %v6412_v34 = vsub.s32 %v1178_v30, %v1181_v61  ;;  %v1061_v38 = vsel %vm1047_vm11, %v1058_v35, %v1060_v28  ;;  %v786_v49 = vxor.u32 2147483648, %v785_v62  ;;  %v791_v27 = vsel %vm6375_vm13, 0, %v789_v63 }
 0x116   : > { %8042 = vst [vmem:[#allocation23_spill] sm:$0xff] %v6407_v15  ;;  %8043 = vst [vmem:[#allocation24_spill] sm:$0xff] %v6410_v17  ;;  %v6419_v16 = vmul.u32.u64.low %v6323_v43, %v1061_v38  ;;  %v6420_v52 = vmul.u32.u64.high %v6323_v43, %v1061_v38, %v6419_v16  ;;  %5480 = vcosq.f32 %v6300_v26  ;;  %v1204_v0 = vsub.s32 4, %v1180_v57 }
 0x117   : > { %v1184_v33 = vsub.s32 0, %v6412_v34  ;;  %v1053_v14 = vsel %vm1047_vm11, %v1050_v53, %v1052_v22  ;;  %v995_v30 = vsel %vm912_vm9, %v994_v29, %v6350_v18  ;;  %v1072_v46 = vadd.s32 1, %v6404_v5 }
 0x118   : > { %v4876_v63 = vadd.s32 4294967169, %v6348_v60  ;;  %v8044_v1 = vand.u32 2147483647, %v6205_v10  ;;  %5482 = vsinq.f32 %v6300_v26  ;;  %v795_v42 = vadd.s32 3, %v791_v27 }
 0x119   : > { %v8045_v61 = vand.u32 2147483647, %v6194_v51  ;;  %v4869_v56 = vmin.u32 %v1184_v33, %v6412_v34  ;;  %v787_v18 = vsel %vm704_vm3, %v786_v49, %v785_v62  ;;  %v1069_v29 = vmul.u32 %v6323_v43, %v1053_v14  ;;  %v544_v62 = vpop.permute.xlu0 %543 }
 0x11a   : > { %v1333_v35 = vand.u32 8388607, %v8044_v1  ;;  %vm1071_vm9 = vc.u32 %v6420_v52, %v6403_v55  ;;  %v1336_v60 = vadd.s32 1, %v4876_v63  ;;  %v998_v26 = vsel %vm6245_vm15, %v6025_v32, %v995_v30 }
 0x11b   : > { %vm6436_vm2 = vcmp.le.f32.partialorder %v8045_v61, 0.7853982  ;;  %v1186_v53 = vclz %v4869_v56  ;;  %v1205_v22 = vsel %vm1120_vm14, %v1204_v0, %v1180_v57  ;;  %v1073_v28 = vsel %vm1071_vm9, %v1072_v46, %v6404_v5  ;;  %v559_v46 = vpop.permute.xlu1 %558 }
 0x11c   : > { %v6451_v38 = vand.u32 3, %v791_v27  ;;  %v1074_v16 = vadd.s32 %v1073_v28, %v1069_v29  ;;  %v1334_v33 = vor.u32 8388608, %v1333_v35  ;;  %vm1337_vm3 = vcmp.gt.s32.totalorder %v1336_v60, 0 }
 0x11d   : > { %v790_v43 = vsel %vm6375_vm13, %v6119_v37, %v787_v18  ;;  %v6456_v49 = vand.u32 3, %v795_v42  ;;  %v4870_v45 = vadd.s32 4294967294, %v1186_v53  ;;  %v1338_v14 = vsel %vm1337_vm3, %v1336_v60, 0 }
 0x11e   : > { %5484 = vcosq.f32 %v998_v26  ;;  %v1207_v57 = vsel %vm6436_vm2, 0, %v1205_v22  ;;  %v1075_v0 = vadd.s32 536870912, %v1074_v16  ;;  %v1340_v5 = vand.u32 31, %v1338_v14 }
 0x11f   : > { %5486 = vsinq.f32 %v998_v26  ;;  %v1174_v27 = vadd.s32 %v6343_v23, %v6354_v39  ;;  %vm4871_vm15 = vcmp.lt.s32.totalorder %v4870_v45, 0  ;;  %v6468_v30 = vmul.f32 %v6465_v48, %v544_v62 }
 0x120   : > { %5488 = vcosq.f32 %v790_v43  ;;  %v1189_v63 = vsel %vm4871_vm15, 0, %v4870_v45  ;;  %v6470_v1 = vshrl.u32 %v1075_v0, 30  ;;  %v1341_v35 = vsub.s32 32, %v1340_v5 }
 0x121   : > { %5490 = vsinq.f32 %v790_v43  ;;  %v1194_v42 = vsub.s32 4294967266, %v1189_v63  ;;  %v6472_v61 = vadd.s32 3, %v1207_v57  ;;  %v6474_v23 = vand.u32 3, %v1207_v57 }
 0x122   : > { %v1190_v39 = vsub.s32 32, %v1189_v63  ;;  %v1077_v56 = vshll.u32 %v6470_v1, 30  ;;  %v6477_v18 = vshll.u32 %v1334_v33, 8  ;;  %v6480_v29 = vmul.f32 %v6465_v48, %v559_v46 }
 0x123   : > { %8048 = vst [vmem:[#allocation25_spill] sm:$0xff] %v6474_v23  ;;  %v1195_v60 = vadd.s32 127, %v1194_v42  ;;  %v6483_v26 = vadd.s32 %v6403_v55, %v6420_v52  ;;  %v1347_v53 = vshrl.u32 %v8035_v19, %v1341_v35  ;;  %v6487_v28 = vpop.eup %5480  ;;  %v6491_v43 = vshrl.u32 %v1338_v14, 5 }
 0x124   : > { %8049 = vst [vmem:[#allocation26_spill] sm:$0xff] %v6480_v29  ;;  %v6489_v62 = vsub.s32 %v1074_v16, %v1077_v56  ;;  %v1350_v33 = vshrl.u32 %v8036_v50, %v1341_v35  ;;  %v1225_v45 = vand.u32 2139095040, %v6468_v30  ;;  %v1343_v0 = vshll.u32 %v8041_v58, %v1340_v5 }
 0x125   : > { %v1196_v57 = vshll.u32 %v1195_v60, 23  ;;  %v1344_v55 = vshrl.u32 %v8034_v44, %v1341_v35  ;;  %v1346_v52 = vshll.u32 %v8034_v44, %v1340_v5  ;;  %v6498_v46 = vpop.eup %5482  ;;  %v1191_v42 = vshll.u32 %v6412_v34, %v1189_v63 }
 0x126   : > { %v1192_v22 = vshrl.u32 %v1174_v27, %v1190_v39  ;;  %v1080_v16 = vsub.s32 0, %v6489_v62  ;;  %v1349_v14 = vshll.u32 %v8035_v19, %v1340_v5  ;;  %v1352_v12 = vshll.u32 %v8036_v50, %v1340_v5 }
 0x127   : > { %v1197_v56 = vor.u32 4788187, %v1196_v57  ;;  %v1348_v13 = vor.u32 %v1347_v53, %v1346_v52  ;;  %v1353_v60 = vshrl.u32 %v8040_v40, %v1341_v35  ;;  %v1355_v7 = vshll.u32 %v8040_v40, %v1340_v5 }
 0x128   : > { %v4865_v11 = vmin.u32 %v1080_v16, %v6489_v62  ;;  %v1351_v8 = vor.u32 %v1350_v33, %v1349_v14  ;;  %v1356_v2 = vshrl.u32 %v8033_v21, %v1341_v35  ;;  %vm1016_vm4 = vcmp.lt.s32.totalorder %v6197_v54, 0 }
 0x129   : > { %v1345_v34 = vor.u32 %v1344_v55, %v1343_v0  ;;  %v1354_v27 = vor.u32 %v1353_v60, %v1352_v12  ;;  %v1226_v63 = vshrl.u32 %v1225_v45, 23  ;;  %v8050_v39 = vand.u32 2147483647, %v6468_v30 }
 0x12a   : > { %v1193_v53 = vor.u32 %v1192_v22, %v1191_v42  ;;  %v1082_v52 = vclz %v4865_v11  ;;  %v1100_v3 = vsub.s32 4, %v6470_v1  ;;  %v1357_v4 = vor.u32 %v1356_v2, %v1355_v7 }
 0x12b   : > { %v6511_v57 = vand.u32 8388607, %v8050_v39  ;;  %v6514_v16 = vpop.eup %5484  ;;  %v1198_v33 = vand.u32 2147483647, %v1197_v56  ;;  %v1342_v5 = vshrl.u32 %v8041_v58, %v1341_v35  ;;  %vm1358_vm5 = vcmp.lt.s32.totalorder %v6491_v43, 1 }
 0x12c   : > { %8051 = vst [vmem:[#allocation27_spill] sm:$0xff] %v6514_v16  ;;  %vm1361_vm6 = vcmp.lt.s32.totalorder %v6491_v43, 4  ;;  %v6519_v12 = vpop.eup %5486  ;;  %v8053_v45 = vand.u32 2147483647, %v6197_v54  ;;  %v4866_v11 = vadd.s32 4294967294, %v1082_v52  ;;  %vm1360_vm8 = vcmp.lt.s32.totalorder %v6491_v43, 3 }
 0x12d   : > { %8052 = vst [vmem:[#allocation28_spill] sm:$0xff] %v6519_v12  ;;  %v1367_v2 = vsel %vm1361_vm6, %v1354_v27, 920167782  ;;  %v1370_v7 = vsel %vm1358_vm5, %v1348_v13, %v1351_v8  ;;  %v6530_v35 = vpop.eup %5488  ;;  %v1363_v22 = vsel %vm1361_vm6, %v1351_v8, 2102212464  ;;  %v1366_v55 = vsel %vm1358_vm5, %v1345_v34, %v1348_v13 }
 0x12e   : > { %vm6523_vm7 = vcmp.le.f32.partialorder %v8053_v45, 0.7853982  ;;  %v1368_v42 = vsel %vm1360_vm8, %v1351_v8, %v1367_v2  ;;  %v1371_v14 = vsel %vm1361_vm6, %v1357_v4, 1326507024  ;;  %v6536_v56 = vpop.eup %5490  ;;  %v1200_v60 = vcvt.s32.f32 %v1193_v53 }
 0x12f   : > { %vm4867_vm10 = vcmp.lt.s32.totalorder %v4866_v11, 0  ;;  %vm1359_vm11 = vcmp.lt.s32.totalorder %v6491_v43, 2  ;;  %v1372_v39 = vsel %vm1360_vm8, %v1354_v27, %v1371_v14  ;;  %v1362_v45 = vsel %vm1358_vm5, %v1342_v5, %v1345_v34 }
 0x130   : > { %v1085_v52 = vsel %vm4867_vm10, 0, %v4866_v11  ;;  %v1373_v6 = vsel %vm1359_vm11, %v1370_v7, %v1372_v39  ;;  %v4872_v23 = vadd.s32 4294967169, %v1226_v63  ;;  %v1364_v4 = vsel %vm1360_vm8, %v1348_v13, %v1363_v22 }
 0x131   : > { %v1086_v17 = vsub.s32 32, %v1085_v52  ;;  %v1090_v8 = vsub.s32 4294967266, %v1085_v52  ;;  %v1369_v53 = vsel %vm1359_vm11, %v1366_v55, %v1368_v42  ;;  %v1201_v2 = vmul.f32 %v1200_v60, %v1198_v33 }
 0x132   : > { %v6550_v36 = vmul.u32.u64.low %v6477_v18, %v1373_v6  ;;  %v6551_v27 = vmul.u32.u64.high %v6477_v18, %v1373_v6, %v6550_v36  ;;  %v1232_v11 = vadd.s32 1, %v4872_v23  ;;  %v1087_v34 = vshll.u32 %v6489_v62, %v1085_v52 }
 0x133   : > { %v1088_v5 = vshrl.u32 %v6483_v26, %v1086_v17  ;;  %v1091_v7 = vadd.s32 127, %v1090_v8  ;;  %v1101_v63 = vsel %vm1016_vm4, %v1100_v3, %v6470_v1  ;;  %v1365_v13 = vsel %vm1359_vm11, %v1362_v45, %v1364_v4 }
 0x134   : > { %v6561_v22 = vmul.u32.u64.low %v6477_v18, %v1369_v53  ;;  %v6562_v33 = vmul.u32.u64.high %v6477_v18, %v1369_v53, %v6561_v22  ;;  %vm1233_vm12 = vcmp.gt.s32.totalorder %v1232_v11, 0  ;;  %v6566_v6 = vand.u32 3, %v6472_v61 }
 0x135   : > { %v1089_v36 = vor.u32 %v1088_v5, %v1087_v34  ;;  %v1092_v23 = vshll.u32 %v1091_v7, 23  ;;  %v1234_v17 = vsel %vm1233_vm12, %v1232_v11, 0  ;;  %v1202_v26 = vxor.u32 2147483648, %v1201_v2 }
 0x136   : > { %8056 = vst [vmem:[#allocation29_spill] sm:$0xff] %v6566_v6  ;;  %v6570_v62 = vsel %vm6523_vm7, 0, %v1101_v63  ;;  %v1230_v3 = vor.u32 8388608, %v6511_v57  ;;  %v1236_v1 = vand.u32 31, %v1234_v17  ;;  %v1381_v55 = vmul.u32 %v6477_v18, %v1365_v13 }
 0x137   : > { %v1093_v43 = vor.u32 4788187, %v1092_v23  ;;  %vm1383_vm13 = vc.u32 %v6551_v27, %v6561_v22  ;;  %v1537_v61 = vand.u32 2139095040, %v6480_v29  ;;  %v1096_v42 = vcvt.s32.f32 %v1089_v36 }
 0x138   : > { %v1384_v14 = vadd.s32 1, %v6562_v33  ;;  %v6578_v60 = vshrl.u32 %v1234_v17, 5  ;;  %v1237_v39 = vsub.s32 32, %v1236_v1  ;;  %v1239_v45 = vshll.u32 %v8041_v58, %v1236_v1 }
 0x139   : > { %v1094_v52 = vand.u32 2147483647, %v1093_v43  ;;  %v1242_v57 = vshll.u32 %v8034_v44, %v1236_v1  ;;  %v1245_v8 = vshll.u32 %v8035_v19, %v1236_v1  ;;  %v1248_v11 = vshll.u32 %v8036_v50, %v1236_v1 }
 0x13a   : > { %v1385_v18 = vsel %vm1383_vm13, %v1384_v14, %v6562_v33  ;;  %v1240_v4 = vshrl.u32 %v8034_v44, %v1237_v39  ;;  %v1243_v53 = vshrl.u32 %v8035_v19, %v1237_v39  ;;  %v1246_v5 = vshrl.u32 %v8036_v50, %v1237_v39 }
 0x13b   : > { %v1386_v34 = vadd.s32 %v1385_v18, %v1381_v55  ;;  %v1249_v7 = vshrl.u32 %v8040_v40, %v1237_v39  ;;  %v1251_v63 = vshll.u32 %v8040_v40, %v1236_v1  ;;  %v1097_v13 = vmul.f32 %v1096_v42, %v1094_v52 }
 0x13c   : > { %v1241_v36 = vor.u32 %v1240_v4, %v1239_v45  ;;  %v1244_v23 = vor.u32 %v1243_v53, %v1242_v57  ;;  %v1252_v17 = vshrl.u32 %v8033_v21, %v1237_v39  ;;  %v1247_v33 = vor.u32 %v1246_v5, %v1245_v8 }
 0x13d   : > { %v1387_v43 = vadd.s32 536870912, %v1386_v34  ;;  %v1250_v14 = vor.u32 %v1249_v7, %v1248_v11  ;;  %v1203_v16 = vsel %vm1120_vm14, %v1202_v26, %v1201_v2  ;;  %v1107_v55 = vadd.s32 3, %v6570_v62 }
 0x13e   : > { %vm1328_vm0 = vcmp.lt.s32.totalorder %v6205_v10, 0  ;;  %v1253_v18 = vor.u32 %v1252_v17, %v1251_v63  ;;  %v1270_v12 = vshll.u32 %v1230_v3, 8  ;;  %vm1254_vm1 = vcmp.lt.s32.totalorder %v6578_v60, 1 }
 0x13f   : > { %v1388_v1 = vshrl.u32 %v1387_v43, 30  ;;  %vm1257_vm9 = vcmp.lt.s32.totalorder %v6578_v60, 4  ;;  %v1538_v42 = vshrl.u32 %v1537_v61, 23  ;;  %v1098_v52 = vxor.u32 2147483648, %v1097_v13  ;;  %v554_v43 = vpop.permute.xlu0 %553 }
 0x140   : > { %v1238_v45 = vshrl.u32 %v8041_v58, %v1237_v39  ;;  %v1262_v57 = vsel %vm1254_vm1, %v1241_v36, %v1244_v23  ;;  %v1263_v8 = vsel %vm1257_vm9, %v1250_v14, 920167782  ;;  %v8057_v4 = vand.u32 2147483647, %v6205_v10 }
 0x141   : > { %v1389_v26 = vshll.u32 %v1388_v1, 30  ;;  %vm1255_vm3 = vcmp.lt.s32.totalorder %v6578_v60, 2  ;;  %vm1256_vm15 = vcmp.lt.s32.totalorder %v6578_v60, 3  ;;  %v1259_v3 = vsel %vm1257_vm9, %v1247_v33, 2102212464 }
 0x142   : > { %vm6601_vm14 = vcmp.le.f32.partialorder %v8057_v4, 0.7853982  ;;  %v1258_v53 = vsel %vm1254_vm1, %v1238_v45, %v1241_v36  ;;  %v1264_v11 = vsel %vm1256_vm15, %v1247_v33, %v1263_v8  ;;  %v1266_v61 = vsel %vm1254_vm1, %v1244_v23, %v1247_v33 }
 0x143   : > { %v1267_v5 = vsel %vm1257_vm9, %v1253_v18, 1326507024  ;;  %v6607_v7 = vsub.s32 %v1386_v34, %v1389_v26  ;;  %v1412_v39 = vsub.s32 4, %v1388_v1  ;;  %v1265_v63 = vsel %vm1255_vm3, %v1262_v57, %v1264_v11 }
 0x144   : > { %v1268_v17 = vsel %vm1256_vm15, %v1250_v14, %v1267_v5  ;;  %v1260_v4 = vsel %vm1256_vm15, %v1244_v23, %v1259_v3  ;;  %v6613_v15 = vmul.u32.u64.low %v1270_v12, %v1265_v63  ;;  %v6614_v32 = vmul.u32.u64.high %v1270_v12, %v1265_v63, %v6613_v15  ;;  %v569_v63 = vpop.permute.xlu1 %568 }
 0x145   : > { %v1269_v6 = vsel %vm1255_vm3, %v1266_v61, %v1268_v17  ;;  %v1206_v36 = vsel %vm6436_vm2, %v6194_v51, %v1203_v16  ;;  %v1099_v34 = vsel %vm1016_vm4, %v1098_v52, %v1097_v13  ;;  %v1392_v33 = vsub.s32 0, %v6607_v7 }
 0x146   : > { %v8060_v14 = vand.u32 2147483647, %v6480_v29  ;;  %v6625_v23 = vmul.u32.u64.low %v1270_v12, %v1269_v6  ;;  %v6626_v45 = vmul.u32.u64.high %v1270_v12, %v1269_v6, %v6625_v23  ;;  %v4884_v57 = vadd.s32 4294967169, %v1538_v42 }
 0x147   : > { %v6629_v8 = vmul.f32 %v6465_v48, %v554_v43  ;;  %v6632_v26 = vand.u32 3, %v6570_v62  ;;  %v4877_v20 = vmin.u32 %v1392_v33, %v6607_v7  ;;  %v1413_v16 = vsel %vm1328_vm0, %v1412_v39, %v1388_v1 }
 0x148   : > { %v1541_v18 = vand.u32 8388607, %v8060_v14  ;;  %v1261_v13 = vsel %vm1255_vm3, %v1258_v53, %v1260_v4  ;;  %5492 = vcosq.f32 %v1206_v36  ;;  %v1102_v6 = vsel %vm6523_vm7, %v6197_v54, %v1099_v34 }
 0x149   : > { %8061 = vst [vmem:[#allocation30_spill] sm:$0xff] %v6632_v26  ;;  %v1280_v42 = vadd.s32 1, %v6614_v32  ;;  %v1544_v52 = vadd.s32 1, %v4884_v57  ;;  %5494 = vsinq.f32 %v1206_v36  ;;  %v6643_v3 = vand.u32 3, %v1107_v55 }
 0x14a   : > { %v1394_v62 = vclz %v4877_v20  ;;  %v1542_v11 = vor.u32 8388608, %v1541_v18  ;;  %v1415_v61 = vsel %vm6601_vm14, 0, %v1413_v16  ;;  %v1277_v1 = vmul.u32 %v1270_v12, %v1261_v13 }
 0x14b   : > { %8062 = vst [vmem:[#allocation31_spill] sm:$0xff] %v6643_v3  ;;  %vm1279_vm2 = vc.u32 %v6626_v45, %v6613_v15  ;;  %vm1545_vm4 = vcmp.gt.s32.totalorder %v1544_v52, 0  ;;  %5496 = vcosq.f32 %v1102_v6  ;;  %v1382_v55 = vadd.s32 %v6561_v22, %v6551_v27 }
 0x14c   : > { %v4878_v60 = vadd.s32 4294967294, %v1394_v62  ;;  %v1281_v0 = vsel %vm1279_vm2, %v1280_v42, %v6614_v32  ;;  %v1546_v53 = vsel %vm1545_vm4, %v1544_v52, 0  ;;  %5498 = vsinq.f32 %v1102_v6 }
 0x14d   : > { %v1282_v5 = vadd.s32 %v1281_v0, %v1277_v1  ;;  %v1548_v39 = vand.u32 31, %v1546_v53  ;;  %v6652_v17 = vadd.s32 3, %v1415_v61  ;;  %v6654_v12 = vand.u32 3, %v1415_v61 }
 0x14e   : > { %vm4879_vm5 = vcmp.lt.s32.totalorder %v4878_v60, 0  ;;  %v6656_v43 = vshll.u32 %v1542_v11, 8  ;;  %v1433_v32 = vand.u32 2139095040, %v6629_v8  ;;  %v6661_v27 = vmul.f32 %v6465_v48, %v569_v63 }
 0x14f   : > { %8063 = vst [vmem:[#allocation32_spill] sm:$0xff] %v6654_v12  ;;  %v1397_v4 = vsel %vm4879_vm5, 0, %v4878_v60  ;;  %v1283_v36 = vadd.s32 536870912, %v1282_v5  ;;  %v1549_v34 = vsub.s32 32, %v1548_v39  ;;  %v1551_v23 = vshll.u32 %v8041_v58, %v1548_v39 }
 0x150   : > { %v1398_v33 = vsub.s32 32, %v1397_v4  ;;  %v1402_v14 = vsub.s32 4294967266, %v1397_v4  ;;  %v1399_v16 = vshll.u32 %v6607_v7, %v1397_v4  ;;  %v1547_v62 = vshrl.u32 %v1546_v53, 5 }
 0x151   : > { %v1284_v22 = vshrl.u32 %v1283_v36, 30  ;;  %v1552_v57 = vshrl.u32 %v8034_v44, %v1549_v34  ;;  %v1555_v20 = vshrl.u32 %v8035_v19, %v1549_v34  ;;  %v1558_v42 = vshrl.u32 %v8036_v50, %v1549_v34 }
 0x152   : > { %v1400_v13 = vshrl.u32 %v1382_v55, %v1398_v33  ;;  %v1403_v6 = vadd.s32 127, %v1402_v14  ;;  %v1554_v11 = vshll.u32 %v8034_v44, %v1548_v39  ;;  %v1434_v61 = vshrl.u32 %v1433_v32, 23 }
 0x153   : > { %v1285_v52 = vshll.u32 %v1284_v22, 30  ;;  %v1553_v0 = vor.u32 %v1552_v57, %v1551_v23  ;;  %v1557_v63 = vshll.u32 %v8035_v19, %v1548_v39  ;;  %vm1224_vm6 = vcmp.lt.s32.totalorder %v6468_v30, 0 }
 0x154   : > { %v1401_v1 = vor.u32 %v1400_v13, %v1399_v16  ;;  %v1404_v60 = vshll.u32 %v1403_v6, 23  ;;  %v1556_v18 = vor.u32 %v1555_v20, %v1554_v11  ;;  %v1560_v7 = vshll.u32 %v8036_v50, %v1548_v39 }
 0x155   : > { %v6671_v36 = vsub.s32 %v1282_v5, %v1285_v52  ;;  %v1561_v55 = vshrl.u32 %v8040_v40, %v1549_v34  ;;  %v6675_v4 = vpop.eup %5492  ;;  %v1559_v33 = vor.u32 %v1558_v42, %v1557_v63  ;;  %v1563_v32 = vshll.u32 %v8040_v40, %v1548_v39 }
 0x156   : > { %8064 = vst [vmem:[#allocation33_spill] sm:$0xff] %v6675_v4  ;;  %v1405_v53 = vor.u32 4788187, %v1404_v60  ;;  %v1564_v14 = vshrl.u32 %v8033_v21, %v1549_v34  ;;  %v6679_v23 = vpop.eup %5494  ;;  %v4880_v5 = vadd.s32 4294967169, %v1434_v61  ;;  %v8066_v20 = vand.u32 2147483647, %v6629_v8 }
 0x157   : > { %8065 = vst [vmem:[#allocation34_spill] sm:$0xff] %v6679_v23  ;;  %v1288_v57 = vsub.s32 0, %v6671_v36  ;;  %v1562_v16 = vor.u32 %v1561_v55, %v1560_v7  ;;  %v1408_v52 = vcvt.s32.f32 %v1401_v1  ;;  %v1550_v11 = vshrl.u32 %v8041_v58, %v1549_v34 }
 0x158   : > { %v6684_v13 = vand.u32 8388607, %v8066_v20  ;;  %v1406_v6 = vand.u32 2147483647, %v1405_v53  ;;  %v1565_v60 = vor.u32 %v1564_v14, %v1563_v32  ;;  %v6687_v42 = vpop.eup %5496  ;;  %v8068_v39 = vand.u32 2147483647, %v6468_v30 }
 0x159   : > { %8067 = vst [vmem:[#allocation35_spill] sm:$0xff] %v6687_v42  ;;  %v4873_v7 = vmin.u32 %v1288_v57, %v6671_v36  ;;  %v1308_v61 = vsub.s32 4, %v1284_v22  ;;  %vm1566_vm8 = vcmp.lt.s32.totalorder %v1547_v62, 1  ;;  %vm1569_vm10 = vcmp.lt.s32.totalorder %v1547_v62, 4  ;;  %v6696_v55 = vpop.eup %5498 }
 0x15a   : > { %vm6691_vm7 = vcmp.le.f32.partialorder %v8068_v39, 0.7853982  ;;  %8071 = vst [vmem:[#allocation36_spill] sm:$0xff] %v6696_v55  ;;  %v1409_v53 = vmul.f32 %v1408_v52, %v1406_v6  ;;  %vm1567_vm11 = vcmp.lt.s32.totalorder %v1547_v62, 2  ;;  %v1571_v1 = vsel %vm1569_vm10, %v1559_v33, 2102212464 }
 0x15b   : > { %v1574_v34 = vsel %vm1566_vm8, %v1553_v0, %v1556_v18  ;;  %v1290_v32 = vclz %v4873_v7  ;;  %vm1568_vm12 = vcmp.lt.s32.totalorder %v1547_v62, 3  ;;  %v1575_v14 = vsel %vm1569_vm10, %v1562_v16, 920167782 }
 0x15c   : > { %v1578_v20 = vsel %vm1566_vm8, %v1556_v18, %v1559_v33  ;;  %v1570_v12 = vsel %vm1566_vm8, %v1550_v11, %v1553_v0  ;;  %v1572_v39 = vsel %vm1568_vm12, %v1556_v18, %v1571_v1  ;;  %v1576_v26 = vsel %vm1568_vm12, %v1559_v33, %v1575_v14 }
 0x15d   : > { %v1579_v4 = vsel %vm1569_vm10, %v1565_v60, 1326507024  ;;  %v1410_v23 = vxor.u32 2147483648, %v1409_v53  ;;  %v4874_v51 = vadd.s32 4294967294, %v1290_v32  ;;  %v1577_v57 = vsel %vm1567_vm11, %v1574_v34, %v1576_v26 }
 0x15e   : > { %v1580_v42 = vsel %vm1568_vm12, %v1562_v16, %v1579_v4  ;;  %v1309_v55 = vsel %vm1224_vm6, %v1308_v61, %v1284_v22  ;;  %v6703_v52 = vmul.u32.u64.low %v6656_v43, %v1577_v57  ;;  %v6704_v7 = vmul.u32.u64.high %v6656_v43, %v1577_v57, %v6703_v52 }
 0x15f   : > { %v1581_v6 = vsel %vm1567_vm11, %v1578_v20, %v1580_v42  ;;  %vm4875_vm13 = vcmp.lt.s32.totalorder %v4874_v51, 0  ;;  %v1573_v18 = vsel %vm1567_vm11, %v1570_v12, %v1572_v39  ;;  %v1278_v26 = vadd.s32 %v6613_v15, %v6626_v45 }
 0x160   : > { %v6709_v0 = vmul.u32.u64.low %v6656_v43, %v1581_v6  ;;  %v6710_v33 = vmul.u32.u64.high %v6656_v43, %v1581_v6, %v6709_v0  ;;  %v1293_v4 = vsel %vm4875_vm13, 0, %v4874_v51  ;;  %v1438_v22 = vor.u32 8388608, %v6684_v13 }
 0x161   : > { %v1440_v16 = vadd.s32 1, %v4880_v5  ;;  %v1411_v11 = vsel %vm1328_vm0, %v1410_v23, %v1409_v53  ;;  %v1294_v60 = vsub.s32 32, %v1293_v4  ;;  %v1298_v42 = vsub.s32 4294967266, %v1293_v4  ;;  %v564_v23 = vpop.permute.xlu0 %563 }
 0x162   : > { %v7981_v61 = vand.u32 2147483647, %v6661_v27  ;;  %v1311_v12 = vsel %vm6691_vm7, 0, %v1309_v55  ;;  %v1589_v62 = vmul.u32 %v6656_v43, %v1573_v18  ;;  %v1592_v1 = vadd.s32 1, %v6704_v7 }
 0x163   : > { %vm1441_vm1 = vcmp.gt.s32.totalorder %v1440_v16, 0  ;;  %v1295_v51 = vshll.u32 %v6671_v36, %v1293_v4  ;;  %v1296_v15 = vshrl.u32 %v1278_v26, %v1294_v60  ;;  %v1299_v45 = vadd.s32 127, %v1298_v42 }
 0x164   : > { %vm1591_vm9 = vc.u32 %v6710_v33, %v6703_v52  ;;  %v1414_v5 = vsel %vm6601_vm14, %v6205_v10, %v1411_v11  ;;  %v1442_v55 = vsel %vm1441_vm1, %v1440_v16, 0  ;;  %v1745_v43 = vand.u32 2139095040, %v6661_v27 }
 0x165   : > { %v1593_v13 = vsel %vm1591_vm9, %v1592_v1, %v6704_v7  ;;  %v6731_v53 = vand.u32 3, %v6652_v17  ;;  %v1297_v34 = vor.u32 %v1296_v15, %v1295_v51  ;;  %v1300_v36 = vshll.u32 %v1299_v45, 23 }
 0x166   : > { %v1594_v32 = vadd.s32 %v1593_v13, %v1589_v62  ;;  %v1315_v14 = vadd.s32 3, %v1311_v12  ;;  %v1444_v20 = vand.u32 31, %v1442_v55  ;;  %v6733_v39 = vshll.u32 %v1438_v22, 8 }
 0x167   : > { %8072 = vst [vmem:[#allocation37_spill] sm:$0xff] %v6731_v53  ;;  %v6736_v57 = vmul.f32 %v6465_v48, %v564_v23  ;;  %5500 = vcosq.f32 %v1414_v5  ;;  %v1301_v2 = vor.u32 4788187, %v1300_v36  ;;  %v6738_v6 = vand.u32 3, %v1311_v12 }
 0x168   : > { %v1595_v7 = vadd.s32 536870912, %v1594_v32  ;;  %vm1536_vm0 = vcmp.lt.s32.totalorder %v6480_v29, 0  ;;  %v6741_v18 = vshrl.u32 %v1442_v55, 5  ;;  %v1445_v17 = vsub.s32 32, %v1444_v20 }
 0x169   : > { %8073 = vst [vmem:[#allocation38_spill] sm:$0xff] %v6738_v6  ;;  %v1746_v0 = vshrl.u32 %v1745_v43, 23  ;;  %v6745_v26 = vand.u32 8388607, %v7981_v61  ;;  %v1302_v4 = vand.u32 2147483647, %v1301_v2  ;;  %v1304_v22 = vcvt.s32.f32 %v1297_v34 }
 0x16a   : > { %v1596_v16 = vshrl.u32 %v1595_v7, 30  ;;  %v1447_v11 = vshll.u32 %v8041_v58, %v1444_v20  ;;  %v1448_v60 = vshrl.u32 %v8034_v44, %v1445_v17  ;;  %v1450_v42 = vshll.u32 %v8034_v44, %v1444_v20 }
 0x16b   : > { %v1451_v12 = vshrl.u32 %v8035_v19, %v1445_v17  ;;  %v1454_v62 = vshrl.u32 %v8036_v50, %v1445_v17  ;;  %v1453_v51 = vshll.u32 %v8035_v19, %v1444_v20  ;;  %v1456_v15 = vshll.u32 %v8036_v50, %v1444_v20 }
 0x16c   : > { %v1597_v1 = vshll.u32 %v1596_v16, 30  ;;  %v1457_v45 = vshrl.u32 %v8040_v40, %v1445_v17  ;;  %v1305_v23 = vmul.f32 %v1304_v22, %v1302_v4  ;;  %v1620_v13 = vsub.s32 4, %v1596_v16 }
 0x16d   : > { %v1459_v55 = vshll.u32 %v8040_v40, %v1444_v20  ;;  %v1460_v43 = vshrl.u32 %v8033_v21, %v1445_v17  ;;  %v8074_v34 = vand.u32 2147483647, %v6480_v29  ;;  %v1449_v7 = vor.u32 %v1448_v60, %v1447_v11 }
 0x16e   : > { %v6763_v2 = vsub.s32 %v1594_v32, %v1597_v1  ;;  %v1452_v61 = vor.u32 %v1451_v12, %v1450_v42  ;;  %v1455_v6 = vor.u32 %v1454_v62, %v1453_v51  ;;  %5502 = vsinq.f32 %v1414_v5 }
 0x16f   : > { %vm6759_vm14 = vcmp.le.f32.partialorder %v8074_v34, 0.7853982  ;;  %v6765_v53 = vand.u32 3, %v1315_v14  ;;  %v1590_v4 = vadd.s32 %v6703_v52, %v6710_v33  ;;  %v1458_v20 = vor.u32 %v1457_v45, %v1456_v15 }
 0x170   : > { %v1600_v22 = vsub.s32 0, %v6763_v2  ;;  %v1461_v10 = vor.u32 %v1460_v43, %v1459_v55  ;;  %v4892_v3 = vadd.s32 4294967169, %v1746_v0  ;;  %v1750_v34 = vor.u32 8388608, %v6745_v26 }
 0x171   : > { %v1306_v54 = vxor.u32 2147483648, %v1305_v23  ;;  %v1446_v32 = vshrl.u32 %v8041_v58, %v1445_v17  ;;  %vm1462_vm3 = vcmp.lt.s32.totalorder %v6741_v18, 1  ;;  %vm1465_vm15 = vcmp.lt.s32.totalorder %v6741_v18, 4 }
 0x172   : > { %v4885_v5 = vmin.u32 %v1600_v22, %v6763_v2  ;;  %v1621_v14 = vsel %vm1536_vm0, %v1620_v13, %v1596_v16  ;;  %v1467_v52 = vsel %vm1465_vm15, %v1455_v6, 2102212464  ;;  %v1470_v33 = vsel %vm1462_vm3, %v1449_v7, %v1452_v61 }
 0x173   : > { %vm1463_vm2 = vcmp.lt.s32.totalorder %v6741_v18, 2  ;;  %vm1464_vm4 = vcmp.lt.s32.totalorder %v6741_v18, 3  ;;  %v1471_v0 = vsel %vm1465_vm15, %v1458_v20, 920167782  ;;  %v1474_v26 = vsel %vm1462_vm3, %v1452_v61, %v1455_v6 }
 0x174   : > { %v1602_v11 = vclz %v4885_v5  ;;  %v1466_v60 = vsel %vm1462_vm3, %v1446_v32, %v1449_v7  ;;  %v1472_v17 = vsel %vm1464_vm4, %v1455_v6, %v1471_v0  ;;  %v1475_v42 = vsel %vm1465_vm15, %v1461_v10, 1326507024  ;;  %v6779_v12 = vpop.eup %5500 }
 0x175   : > { %v1468_v62 = vsel %vm1464_vm4, %v1452_v61, %v1467_v52  ;;  %v1473_v1 = vsel %vm1463_vm2, %v1470_v33, %v1472_v17  ;;  %v1476_v51 = vsel %vm1464_vm4, %v1458_v20, %v1475_v42  ;;  %v1752_v16 = vadd.s32 1, %v4892_v3 }
 0x176   : > { %v4886_v15 = vadd.s32 4294967294, %v1602_v11  ;;  %v1477_v45 = vsel %vm1463_vm2, %v1474_v26, %v1476_v51  ;;  %v6786_v13 = vmul.u32.u64.low %v6733_v39, %v1473_v1  ;;  %v6787_v55 = vmul.u32.u64.high %v6733_v39, %v1473_v1, %v6786_v13 }
 0x177   : > { %v1623_v10 = vsel %vm6759_vm14, 0, %v1621_v14  ;;  %v6793_v6 = vmul.u32.u64.low %v6733_v39, %v1477_v45  ;;  %v6794_v61 = vmul.u32.u64.high %v6733_v39, %v1477_v45, %v6793_v6  ;;  %vm1753_vm5 = vcmp.gt.s32.totalorder %v1752_v16, 0 }
 0x178   : > { %v1307_v3 = vsel %vm1224_vm6, %v1306_v54, %v1305_v23  ;;  %vm4887_vm8 = vcmp.lt.s32.totalorder %v4886_v15, 0  ;;  %v1469_v43 = vsel %vm1463_vm2, %v1466_v60, %v1468_v62  ;;  %v1754_v7 = vsel %vm1753_vm5, %v1752_v16, 0 }
 0x179   : > { %v1605_v20 = vsel %vm4887_vm8, 0, %v4886_v15  ;;  %v1756_v22 = vand.u32 31, %v1754_v7  ;;  %v6800_v32 = vshll.u32 %v1750_v34, 8  ;;  %v7993_v5 = vand.u32 2147483647, %v6736_v57 }
 0x17a   : > { %v1606_v14 = vsub.s32 32, %v1605_v20  ;;  %v1610_v52 = vsub.s32 4294967266, %v1605_v20  ;;  %v1627_v33 = vadd.s32 3, %v1623_v10  ;;  %v1488_v0 = vadd.s32 1, %v6787_v55 }
 0x17b   : > { %v1310_v54 = vsel %vm6691_vm7, %v6468_v30, %v1307_v3  ;;  %v1485_v23 = vmul.u32 %v6733_v39, %v1469_v43  ;;  %vm1487_vm6 = vc.u32 %v6794_v61, %v6786_v13  ;;  %v1757_v18 = vsub.s32 32, %v1756_v22  ;;  %v6810_v26 = vpop.eup %5502 }
 0x17c   : > { %v1607_v34 = vshll.u32 %v6763_v2, %v1605_v20  ;;  %v1608_v11 = vshrl.u32 %v1590_v4, %v1606_v14  ;;  %v1611_v60 = vadd.s32 127, %v1610_v52  ;;  %v1489_v17 = vsel %vm1487_vm6, %v1488_v0, %v6787_v55 }
 0x17d   : > { %v1490_v42 = vadd.s32 %v1489_v17, %v1485_v23  ;;  %v1759_v62 = vshll.u32 %v8041_v58, %v1756_v22  ;;  %v1760_v63 = vshrl.u32 %v8034_v44, %v1757_v18  ;;  %v1763_v1 = vshrl.u32 %v8035_v19, %v1757_v18 }
 0x17e   : > { %v1609_v39 = vor.u32 %v1608_v11, %v1607_v34  ;;  %v1612_v51 = vshll.u32 %v1611_v60, 23  ;;  %vm1432_vm7 = vcmp.lt.s32.totalorder %v6629_v8, 0  ;;  %v1762_v16 = vshll.u32 %v8034_v44, %v1756_v22 }
 0x17f   : > { %v1766_v15 = vshrl.u32 %v8036_v50, %v1757_v18  ;;  %v1491_v2 = vadd.s32 536870912, %v1490_v42  ;;  %v1755_v4 = vshrl.u32 %v1754_v7, 5  ;;  %v1761_v45 = vor.u32 %v1760_v63, %v1759_v62 }
 0x180   : > { %v1765_v55 = vshll.u32 %v8035_v19, %v1756_v22  ;;  %v1613_v6 = vor.u32 4788187, %v1612_v51  ;;  %v1764_v3 = vor.u32 %v1763_v1, %v1762_v16  ;;  %v1768_v43 = vshll.u32 %v8036_v50, %v1756_v22 }
 0x181   : > { %v1769_v20 = vshrl.u32 %v8040_v40, %v1757_v18  ;;  %v1616_v14 = vcvt.s32.f32 %v1609_v39  ;;  %v6823_v52 = vand.u32 3, %v1623_v10  ;;  %v8078_v0 = vand.u32 2147483647, %v6629_v8 }
 0x182   : > { %v1492_v34 = vshrl.u32 %v1491_v2, 30  ;;  %v1772_v7 = vshrl.u32 %v8033_v21, %v1757_v18  ;;  %v1614_v11 = vand.u32 2147483647, %v1613_v6  ;;  %v1767_v60 = vor.u32 %v1766_v15, %v1765_v55 }
 0x183   : > { %8077 = vst [vmem:[#allocation39_spill] sm:$0xff] %v6823_v52  ;;  %vm6827_vm10 = vcmp.le.f32.partialorder %v8078_v0, 0.7853982  ;;  %v1770_v17 = vor.u32 %v1769_v20, %v1768_v43  ;;  %v1771_v62 = vshll.u32 %v8040_v40, %v1756_v22  ;;  %5504 = vcosq.f32 %v1310_v54 }
 0x184   : > { %v1493_v63 = vshll.u32 %v1492_v34, 30  ;;  %v1516_v1 = vsub.s32 4, %v1492_v34  ;;  %vm1774_vm11 = vcmp.lt.s32.totalorder %v1755_v4, 1  ;;  %v1617_v10 = vmul.f32 %v1616_v14, %v1614_v11 }
 0x185   : > { %v1773_v39 = vor.u32 %v1772_v7, %v1771_v62  ;;  %vm1777_vm12 = vcmp.lt.s32.totalorder %v1755_v4, 4  ;;  %v1782_v51 = vsel %vm1774_vm11, %v1761_v45, %v1764_v3  ;;  %v6834_v16 = vand.u32 3, %v1627_v33 }
 0x186   : > { %v6836_v0 = vsub.s32 %v1490_v42, %v1493_v63  ;;  %vm1776_vm13 = vcmp.lt.s32.totalorder %v1755_v4, 3  ;;  %v1783_v2 = vsel %vm1777_vm12, %v1770_v17, 920167782  ;;  %v1758_v15 = vshrl.u32 %v8041_v58, %v1757_v18 }
 0x187   : > { %8081 = vst [vmem:[#allocation40_spill] sm:$0xff] %v6834_v16  ;;  %vm1775_vm1 = vcmp.lt.s32.totalorder %v1755_v4, 2  ;;  %v1779_v22 = vsel %vm1777_vm12, %v1767_v60, 2102212464  ;;  %v1784_v55 = vsel %vm1776_vm13, %v1767_v60, %v1783_v2  ;;  %v1618_v6 = vxor.u32 2147483648, %v1617_v10  ;;  %v574_v2 = vpop.permute.xlu0 %573 }
 0x188   : > { %v1496_v43 = vsub.s32 0, %v6836_v0  ;;  %v1517_v20 = vsel %vm1432_vm7, %v1516_v1, %v1492_v34  ;;  %v1785_v33 = vsel %vm1775_vm1, %v1782_v51, %v1784_v55  ;;  %5506 = vsinq.f32 %v1310_v54 }
 0x189   : > { %v1786_v42 = vsel %vm1774_vm11, %v1764_v3, %v1767_v60  ;;  %v1787_v14 = vsel %vm1777_vm12, %v1773_v39, 1326507024  ;;  %v1641_v18 = vand.u32 2139095040, %v6736_v57  ;;  %v1778_v11 = vsel %vm1774_vm11, %v1758_v15, %v1761_v45  ;;  %v5466_v39 = vld [vmem:[%s8082_s2] sm:$0xff]   ;;  %s5742_s2 = sshll.u32 %s5810_s14, 4  ;;  %s5743_s2 = int_to_ptr.vmem [resolvable:$false] %s5742_s2 }
 0x18a   : > { %v4881_v7 = vmin.u32 %v1496_v43, %v6836_v0  ;;  %v1780_v62 = vsel %vm1776_vm13, %v1764_v3, %v1779_v22  ;;  %v1788_v63 = vsel %vm1776_vm13, %v1770_v17, %v1787_v14  ;;  %v1519_v34 = vsel %vm6827_vm10, 0, %v1517_v20 }
 0x18b   : > { %v1789_v1 = vsel %vm1775_vm1, %v1786_v42, %v1788_v63  ;;  %v6857_v54 = vmul.u32.u64.low %v6800_v32, %v1785_v33  ;;  %v6858_v60 = vmul.u32.u64.high %v6800_v32, %v1785_v33, %v6857_v54  ;;  %v1619_v45 = vsel %vm1536_vm0, %v1618_v6, %v1617_v10 }
 0x18c   : > { %v1498_v51 = vclz %v4881_v7  ;;  %v6866_v3 = vmul.u32.u64.low %v6800_v32, %v1789_v1  ;;  %v6867_v17 = vmul.u32.u64.high %v6800_v32, %v1789_v1, %v6866_v3  ;;  %v1781_v15 = vsel %vm1775_vm1, %v1778_v11, %v1780_v62 }
 0x18d   : > { %v1642_v22 = vshrl.u32 %v1641_v18, 23  ;;  %v1645_v55 = vand.u32 8388607, %v7993_v5  ;;  %v1486_v43 = vadd.s32 %v6786_v13, %v6794_v61  ;;  %v1523_v33 = vadd.s32 3, %v1519_v34 }
 0x18e   : > { %v4882_v20 = vadd.s32 4294967294, %v1498_v51  ;;  %v7989_v42 = vmov 0.0   ;;  %v1622_v10 = vsel %vm6759_vm14, %v6480_v29, %v1619_v45  ;;  %v1800_v4 = vadd.s32 1, %v6858_v60 }
 0x18f   : > { %5144 = vmatprep.subr.bf16.mxu0 %v7989_v42  ;;  %5174 = vmatprep.subr.bf16.mxu1 %v7989_v42  ;;  %v4888_v6 = vadd.s32 4294967169, %v1642_v22  ;;  %v6881_v14 = vmul.f32 %v6465_v48, %v574_v2  ;;  %vm5808_vm9 = vmmov 0   ;;  %v6885_v13 = vand.u32 3, %v1519_v34 }
 0x190   : > { %5145 = vmatpush3.bf16.msra.mxu0 %v5466_v39  ;;  %5146 = vmatprep.mubr.msk.bf16.mxu0 %vm5808_vm9, %v7989_v42  ;;  %vm4883_vm0 = vcmp.lt.s32.totalorder %v4882_v20, 0  ;;  %v1797_v61 = vmul.u32 %v6800_v32, %v1781_v15  ;;  %vm1799_vm3 = vc.u32 %v6867_v17, %v6857_v54  ;;  %v6892_v36 = vpop.eup %5504  ;;  %v1646_v7 = vor.u32 8388608, %v1645_v55 }
 0x191   : > { %8083 = vst [vmem:[#allocation41_spill] sm:$0xff] %v6885_v13  ;;  %5178 = vmatprep.mubr.msk.bf16.mxu1 %vm5808_vm9, %v7989_v42  ;;  %5206 = vmatprep.subr.bf16.mxu0 %v7989_v42  ;;  %v1501_v48 = vsel %vm4883_vm0, 0, %v4882_v20  ;;  %v1801_v18 = vsel %vm1799_vm3, %v1800_v4, %v6858_v60  ;;  %v1648_v11 = vadd.s32 1, %v4888_v6  ;;  %5508 = vcosq.f32 %v1622_v10 }
 0x192   : > { %v1502_v62 = vsub.s32 32, %v1501_v48  ;;  %v1506_v63 = vsub.s32 4294967266, %v1501_v48  ;;  %vm1744_vm14 = vcmp.lt.s32.totalorder %v6661_v27, 0  ;;  %v1802_v32 = vadd.s32 %v1801_v18, %v1797_v61 }
 0x193   : > { %v1503_v34 = vshll.u32 %v6836_v0, %v1501_v48  ;;  %vm1649_vm15 = vcmp.gt.s32.totalorder %v1648_v11, 0  ;;  %v7992_v1 = vand.u32 2147483647, %v6881_v14  ;;  %v7991_v39 = vlaneseq }
 0x194   : > { %v1504_v45 = vshrl.u32 %v1486_v43, %v1502_v62  ;;  %v1507_v51 = vadd.s32 127, %v1506_v63  ;;  %v1803_v3 = vadd.s32 536870912, %v1802_v32  ;;  %v1650_v2 = vsel %vm1649_vm15, %v1648_v11, 0 }
 0x195   : > { %5510 = vsinq.f32 %v1622_v10  ;;  %v6898_v60 = vand.u32 3, %v1523_v33  ;;  %v1652_v15 = vand.u32 31, %v1650_v2  ;;  %v6900_v22 = vshll.u32 %v1646_v7, 8  ;;  %v6902_v55 = vpop.eup %5506 }
 0x196   : > { %v1505_v20 = vor.u32 %v1504_v45, %v1503_v34  ;;  %v1508_v4 = vshll.u32 %v1507_v51, 23  ;;  %v8085_v0 = vand.u32 2147483647, %v6661_v27  ;;  %v6911_v43 = vadd.s32 %v6857_v54, %v6867_v17 }
 0x197   : > { %8084 = vst [vmem:[#allocation42_spill] sm:$0xff] %v6898_v60  ;;  %v1804_v61 = vshrl.u32 %v1803_v3, 30  ;;  %v1653_v10 = vsub.s32 32, %v1652_v15  ;;  %v1849_v33 = vand.u32 2139095040, %v6881_v14  ;;  %v6916_v48 = vand.u32 8388607, %v7992_v1 }
 0x198   : > { %vm6906_vm2 = vcmp.le.f32.partialorder %v8085_v0, 0.7853982  ;;  %v6919_v18 = vand.u32 127, %v7991_v39  ;;  %v1509_v7 = vor.u32 4788187, %v1508_v4  ;;  %v1651_v63 = vshrl.u32 %v1650_v2, 5 }
 0x199   : > { %v1805_v11 = vshll.u32 %v1804_v61, 30  ;;  %v1828_v62 = vsub.s32 4, %v1804_v61  ;;  %v1655_v34 = vshll.u32 %v8041_v58, %v1652_v15  ;;  %v1656_v54 = vshrl.u32 %v8034_v44, %v1653_v10 }
 0x19a   : > { %v1659_v17 = vshrl.u32 %v8035_v19, %v1653_v10  ;;  %v1662_v45 = vshrl.u32 %v8036_v50, %v1653_v10  ;;  %v1510_v51 = vand.u32 2147483647, %v1509_v7  ;;  %v1512_v3 = vcvt.s32.f32 %v1505_v20 }
 0x19b   : > { %v6925_v0 = vsub.s32 %v1802_v32, %v1805_v11  ;;  %v1661_v42 = vshll.u32 %v8035_v19, %v1652_v15  ;;  %v1829_v4 = vsel %vm1744_vm14, %v1828_v62, %v1804_v61  ;;  %v1658_v39 = vshll.u32 %v8034_v44, %v1652_v15 }
 0x19c   : > { %v1664_v2 = vshll.u32 %v8036_v50, %v1652_v15  ;;  %v1850_v1 = vshrl.u32 %v1849_v33, 23  ;;  %v1513_v5 = vmul.f32 %v1512_v3, %v1510_v51  ;;  %v1657_v13 = vor.u32 %v1656_v54, %v1655_v34 }
 0x19d   : > { %v1808_v52 = vsub.s32 0, %v6925_v0  ;;  %v1663_v16 = vor.u32 %v1662_v45, %v1661_v42  ;;  %v1660_v29 = vor.u32 %v1659_v17, %v1658_v39  ;;  %v1665_v20 = vshrl.u32 %v8040_v40, %v1653_v10 }
 0x19e   : > { %v1667_v32 = vshll.u32 %v8040_v40, %v1652_v15  ;;  %v1668_v7 = vshrl.u32 %v8033_v21, %v1653_v10  ;;  %v1514_v11 = vxor.u32 2147483648, %v1513_v5  ;;  %v1654_v62 = vshrl.u32 %v8041_v58, %v1653_v10  ;;  %v6939_v33 = vpop.eup %5508 }
 0x19f   : > { %v4893_v61 = vmin.u32 %v1808_v52, %v6925_v0  ;;  %v1854_v60 = vor.u32 8388608, %v6916_v48  ;;  %8088 = vst [vmem:[#allocation43_spill] sm:$0xff] %v6939_v33  ;;  %v1831_v34 = vsel %vm6906_vm2, 0, %v1829_v4  ;;  %v1666_v42 = vor.u32 %v1665_v20, %v1664_v2 }
 0x1a0   : > { %v1669_v39 = vor.u32 %v1668_v7, %v1667_v32  ;;  %vm1673_vm4 = vcmp.lt.s32.totalorder %v1651_v63, 4  ;;  %v1515_v15 = vsel %vm1432_vm7, %v1514_v11, %v1513_v5  ;;  %vm1670_vm5 = vcmp.lt.s32.totalorder %v1651_v63, 1 }
 0x1a1   : > { %v1810_v54 = vclz %v4893_v61  ;;  %v1675_v17 = vsel %vm1673_vm4, %v1663_v16, 2102212464  ;;  %vm1671_vm8 = vcmp.lt.s32.totalorder %v1651_v63, 2  ;;  %vm1672_vm6 = vcmp.lt.s32.totalorder %v1651_v63, 3 }
 0x1a2   : > { %v1678_v52 = vsel %vm1670_vm5, %v1657_v13, %v1660_v29  ;;  %v1679_v10 = vsel %vm1673_vm4, %v1666_v42, 920167782  ;;  %v6947_v48 = vpop.eup %5510  ;;  %v1518_v45 = vsel %vm6827_vm10, %v6629_v8, %v1515_v15  ;;  %v1674_v3 = vsel %vm1670_vm5, %v1654_v62, %v1657_v13 }
 0x1a3   : > { %8089 = vst [vmem:[#allocation44_spill] sm:$0xff] %v6947_v48  ;;  %v4894_v51 = vadd.s32 4294967294, %v1810_v54  ;;  %v1680_v4 = vsel %vm1672_vm6, %v1663_v16, %v1679_v10  ;;  %v1676_v2 = vsel %vm1672_vm6, %v1660_v29, %v1675_v17  ;;  %v1682_v20 = vsel %vm1670_vm5, %v1660_v29, %v1663_v16 }
 0x1a4   : > { %v1681_v5 = vsel %vm1671_vm8, %v1678_v52, %v1680_v4  ;;  %v1683_v32 = vsel %vm1673_vm4, %v1669_v39, 1326507024  ;;  %v1835_v48 = vadd.s32 3, %v1831_v34  ;;  %v4896_v15 = vadd.s32 4294967169, %v1850_v1 }
 0x1a5   : > { %vm4895_vm7 = vcmp.lt.s32.totalorder %v4894_v51, 0  ;;  %v1684_v7 = vsel %vm1672_vm6, %v1666_v42, %v1683_v32  ;;  %v6955_v11 = vmul.u32.u64.low %v6900_v22, %v1681_v5  ;;  %v6956_v61 = vmul.u32.u64.high %v6900_v22, %v1681_v5, %v6955_v11  ;;  %v8102_v32 = vld [vmem:[#allocation24_spill] sm:$0xff] }
 0x1a6   : > { %v1813_v33 = vsel %vm4895_vm7, 0, %v4894_v51  ;;  %v1685_v23 = vsel %vm1671_vm8, %v1682_v20, %v1684_v7  ;;  %v6959_v62 = vand.u32 3, %v1831_v34  ;;  %v1677_v17 = vsel %vm1671_vm8, %v1674_v3, %v1676_v2 }
 0x1a7   : > { %v1814_v54 = vsub.s32 32, %v1813_v33  ;;  %v1818_v13 = vsub.s32 4294967266, %v1813_v33  ;;  %5512 = vcosq.f32 %v1518_v45  ;;  %v1856_v42 = vadd.s32 1, %v4896_v15 }
 0x1a8   : > { %v6963_v29 = vmul.u32.u64.low %v6900_v22, %v1685_v23  ;;  %v6964_v16 = vmul.u32.u64.high %v6900_v22, %v1685_v23, %v6963_v29  ;;  %v1815_v39 = vshll.u32 %v6925_v0, %v1813_v33  ;;  %v1696_v51 = vadd.s32 1, %v6956_v61 }
 0x1a9   : > { %v1816_v52 = vshrl.u32 %v6911_v43, %v1814_v54  ;;  %v1819_v10 = vadd.s32 127, %v1818_v13  ;;  %5514 = vsinq.f32 %v1518_v45  ;;  %v6969_v1 = vand.u32 3, %v1835_v48 }
 0x1aa   : > { %v1693_v34 = vmul.u32 %v6900_v22, %v1677_v17  ;;  %vm1857_vm10 = vcmp.gt.s32.totalorder %v1856_v42, 0  ;;  %v6972_v2 = vshll.u32 %v1854_v60, 8  ;;  %vm1695_vm11 = vc.u32 %v6964_v16, %v6955_v11 }
 0x1ab   : > { %v1817_v63 = vor.u32 %v1816_v52, %v1815_v39  ;;  %v1820_v3 = vshll.u32 %v1819_v10, 23  ;;  %v1858_v4 = vsel %vm1857_vm10, %v1856_v42, 0  ;;  %v695_v0 = vxor.u32 2147483648, %v6498_v46 }
 0x1ac   : > { %v1860_v5 = vand.u32 31, %v1858_v4  ;;  %v698_v43 = vxor.u32 2147483648, %v6487_v28  ;;  %vm1640_vm12 = vcmp.lt.s32.totalorder %v6736_v57, 0  ;;  %v6979_v48 = vadd.s32 %v6955_v11, %v6964_v16 }
 0x1ad   : > { %v1821_v33 = vor.u32 4788187, %v1820_v3  ;;  %v1697_v22 = vsel %vm1695_vm11, %v1696_v51, %v6956_v61  ;;  %v6982_v45 = vshrl.u32 %v1858_v4, 5  ;;  %v1824_v20 = vcvt.s32.f32 %v1817_v63 }
 0x1ae   : > { %v8090_v60 = vand.u32 2147483647, %v6736_v57  ;;  %v1698_v7 = vadd.s32 %v1697_v22, %v1693_v34  ;;  %v1861_v23 = vsub.s32 32, %v1860_v5  ;;  %v1863_v15 = vshll.u32 %v8041_v58, %v1860_v5 }
 0x1af   : > { %v1822_v54 = vand.u32 2147483647, %v1821_v33  ;;  %v1866_v13 = vshll.u32 %v8034_v44, %v1860_v5  ;;  %v1869_v11 = vshll.u32 %v8035_v19, %v1860_v5  ;;  %v1872_v61 = vshll.u32 %v8036_v50, %v1860_v5 }
 0x1b0   : > { %vm6986_vm13 = vcmp.le.f32.partialorder %v8090_v60, 0.7853982  ;;  %vm694_vm1 = vcmp.eq.s32.totalorder %v6302_v31, 0  ;;  %v1699_v17 = vadd.s32 536870912, %v1698_v7  ;;  %v1864_v29 = vshrl.u32 %v8034_v44, %v1861_v23 }
 0x1b1   : > { %v1867_v16 = vshrl.u32 %v8035_v19, %v1861_v23  ;;  %v1875_v42 = vshll.u32 %v8040_v40, %v1860_v5  ;;  %v1825_v39 = vmul.f32 %v1824_v20, %v1822_v54  ;;  %v1870_v52 = vshrl.u32 %v8036_v50, %v1861_v23 }
 0x1b2   : > { %v1873_v10 = vshrl.u32 %v8040_v40, %v1861_v23  ;;  %v1876_v51 = vshrl.u32 %v8033_v21, %v1861_v23  ;;  %v1700_v34 = vshrl.u32 %v1699_v17, 30  ;;  %v1862_v63 = vshrl.u32 %v8041_v58, %v1861_v23 }
 0x1b3   : > { %v1865_v3 = vor.u32 %v1864_v29, %v1863_v15  ;;  %v1868_v4 = vor.u32 %v1867_v16, %v1866_v13  ;;  %v1826_v33 = vxor.u32 2147483648, %v1825_v39  ;;  %v1871_v22 = vor.u32 %v1870_v52, %v1869_v11 }
 0x1b4   : > { %v1874_v60 = vor.u32 %v1873_v10, %v1872_v61  ;;  %vm1878_vm0 = vcmp.lt.s32.totalorder %v6982_v45, 1  ;;  %vm697_vm3 = vcmp.eq.s32.totalorder %v6302_v31, 2  ;;  %v1701_v44 = vshll.u32 %v1700_v34, 30  ;;  %v7006_v21 = vpop.eup %5512 }
 0x1b5   : > { %v1724_v19 = vsub.s32 4, %v1700_v34  ;;  %v1877_v5 = vor.u32 %v1876_v51, %v1875_v42  ;;  %vm1880_vm15 = vcmp.lt.s32.totalorder %v6982_v45, 3  ;;  %vm693_vm4 = vcmp.lt.s32.totalorder %v6302_v31, 2 }
 0x1b6   : > { %v1827_v50 = vsel %vm1744_vm14, %v1826_v33, %v1825_v39  ;;  %vm1881_vm5 = vcmp.lt.s32.totalorder %v6982_v45, 4  ;;  %v1882_v40 = vsel %vm1878_vm0, %v1862_v63, %v1865_v3  ;;  %v1886_v58 = vsel %vm1878_vm0, %v1865_v3, %v1868_v4  ;;  %v7025_v13 = vpop.eup %5514 }
 0x1b7   : > { %v1830_v20 = vsel %vm6906_vm2, %v6661_v27, %v1827_v50  ;;  %v7018_v23 = vsub.s32 %v1698_v7, %v1701_v44  ;;  %v1725_v15 = vsel %vm1640_vm12, %v1724_v19, %v1700_v34  ;;  %v1883_v54 = vsel %vm1881_vm5, %v1871_v22, 2102212464 }
 0x1b8   : > { %vm690_vm14 = vweird.f32 %v6018_v25  ;;  %5516 = vcosq.f32 %v1830_v20  ;;  %v1727_v11 = vsel %vm6986_vm13, 0, %v1725_v15  ;;  %v1884_v6 = vsel %vm1880_vm15, %v1868_v4, %v1883_v54 }
 0x1b9   : > { %v1887_v7 = vsel %vm1881_vm5, %v1874_v60, 920167782  ;;  %5518 = vsinq.f32 %v1830_v20  ;;  %v1704_v61 = vsub.s32 0, %v7018_v23  ;;  %vm1879_vm2 = vcmp.lt.s32.totalorder %v6982_v45, 2 }
 0x1ba   : > { %v696_v17 = vsel %vm694_vm1, %v6487_v28, %v695_v0  ;;  %v1731_v29 = vadd.s32 3, %v1727_v11  ;;  %v1888_v16 = vsel %vm1880_vm15, %v1871_v22, %v1887_v7  ;;  %v1890_v42 = vsel %vm1878_vm0, %v1868_v4, %v1871_v22 }
 0x1bb   : > { %v1891_v39 = vsel %vm1881_vm5, %v1877_v5, 1326507024  ;;  %v4889_v52 = vmin.u32 %v1704_v61, %v7018_v23  ;;  %v1885_v10 = vsel %vm1879_vm2, %v1882_v40, %v1884_v6  ;;  %v1889_v51 = vsel %vm1879_vm2, %v1886_v58, %v1888_v16 }
 0x1bc   : > { %v1892_v34 = vsel %vm1880_vm15, %v1874_v60, %v1891_v39  ;;  %v7049_v63 = vand.u32 3, %v1727_v11  ;;  %v7052_v33 = vmul.u32.u64.low %v6972_v2, %v1889_v51  ;;  %v7053_v44 = vmul.u32.u64.high %v6972_v2, %v1889_v51, %v7052_v33 }
 0x1bd   : > { %v1893_v3 = vsel %vm1879_vm2, %v1890_v42, %v1892_v34  ;;  %v1706_v19 = vclz %v4889_v52  ;;  %vm597_vm8 = vcmp.lt.s32.totalorder %v6919_v18, 8  ;;  %v699_v45 = vsel %vm697_vm3, %v698_v43, %v6498_v46  ;;  %v5469_v18 = vld [vmem:[%s7928_s7] sm:$0xff]  }
 0x1be   : > { %v7056_v4 = vmul.u32.u64.low %v6972_v2, %v1893_v3  ;;  %v7057_v22 = vmul.u32.u64.high %v6972_v2, %v1893_v3, %v7056_v4  ;;  %vm794_vm6 = vweird.f32 %v6119_v37  ;;  %v7066_v60 = vand.u32 3, %v1731_v29 }
 0x1bf   : > { %v1901_v5 = vmul.u32 %v6972_v2, %v1885_v10  ;;  %v700_v50 = vsel %vm693_vm4, %v696_v17, %v699_v45  ;;  %v799_v40 = vxor.u32 2147483648, %v6536_v56  ;;  %v4890_v58 = vadd.s32 4294967294, %v1706_v19 }
 0x1c0   : > { %vm797_vm7 = vcmp.lt.s32.totalorder %v6456_v49, 2  ;;  %vm798_vm10 = vcmp.eq.s32.totalorder %v6456_v49, 0  ;;  %v802_v20 = vxor.u32 2147483648, %v6530_v35  ;;  %v1904_v15 = vadd.s32 1, %v7053_v44 }
 0x1c1   : > { %v701_v54 = vsel %vm690_vm14, nan, %v700_v50  ;;  %v800_v11 = vsel %vm798_vm10, %v6530_v35, %v799_v40  ;;  %vm801_vm11 = vcmp.eq.s32.totalorder %v6456_v49, 2  ;;  %vm4891_vm1 = vcmp.lt.s32.totalorder %v4890_v58, 0 }
 0x1c2   : > { %vm1903_vm0 = vc.u32 %v7057_v22, %v7052_v33  ;;  %v803_v31 = vsel %vm801_vm11, %v802_v20, %v6536_v56  ;;  %vm2044_vm3 = vcmp.lt.s32.totalorder %v6284_v9, 2  ;;  %v1709_v2 = vsel %vm4891_vm1, 0, %v4890_v58 }
 0x1c3   : > { %vm1848_vm15 = vcmp.lt.s32.totalorder %v6881_v14, 0  ;;  %v1905_v6 = vsel %vm1903_vm0, %v1904_v15, %v7053_v44  ;;  %v804_v7 = vsel %vm797_vm7, %v800_v11, %v803_v31  ;;  %vm2045_vm4 = vcmp.eq.s32.totalorder %v6284_v9, 0 }
 0x1c4   : > { %v1710_v61 = vsub.s32 32, %v1709_v2  ;;  %v1714_v17 = vsub.s32 4294967266, %v1709_v2  ;;  %v8093_v29 = vand.u32 2147483647, %v6881_v14  ;;  %v1906_v16 = vadd.s32 %v1905_v6, %v1901_v5 }
 0x1c5   : > { %v2047_v42 = vsel %vm2045_vm4, %v6487_v28, %v695_v0  ;;  %v1711_v39 = vshll.u32 %v7018_v23, %v1709_v2  ;;  %v7097_v52 = vadd.s32 %v7052_v33, %v7057_v22  ;;  %vm2048_vm2 = vcmp.eq.s32.totalorder %v6284_v9, 2  ;;  %v7101_v10 = vpop.eup %5516 }
 0x1c6   : > { %vm7088_vm5 = vcmp.le.f32.partialorder %v8093_v29, 0.7853982  ;;  %vm2148_vm7 = vcmp.eq.s32.totalorder %v6451_v38, 0  ;;  %v1712_v51 = vshrl.u32 %v6979_v48, %v1710_v61  ;;  %v1715_v34 = vadd.s32 127, %v1714_v17  ;;  %v7107_v0 = vpop.eup %5518  ;;  %v8096_v61 = vld [vmem:[#allocation18_spill] sm:$0xff] }
 0x1c7   : > { %v1907_v3 = vadd.s32 536870912, %v1906_v16  ;;  %v2050_v44 = vsel %vm2048_vm2, %v698_v43, %v6498_v46  ;;  %v805_v23 = vsel %vm794_vm6, nan, %v804_v7  ;;  %v2150_v19 = vsel %vm2148_vm7, %v6530_v35, %v799_v40 }
 0x1c8   : > { %v2051_v33 = vsel %vm2044_vm3, %v2047_v42, %v2050_v44  ;;  %vm2151_vm10 = vcmp.eq.s32.totalorder %v6451_v38, 2  ;;  %v1713_v4 = vor.u32 %v1712_v51, %v1711_v39  ;;  %v1716_v48 = vshll.u32 %v1715_v34, 23  ;;  %v8097_v42 = vld [vmem:[#allocation23_spill] sm:$0xff] }
 0x1c9   : > { %v1908_v22 = vshrl.u32 %v1907_v3, 30  ;;  %v2052_v45 = vsel %vm690_vm14, nan, %v2051_v33  ;;  %vm2147_vm11 = vcmp.lt.s32.totalorder %v6451_v38, 2  ;;  %v2153_v28 = vsel %vm2151_vm10, %v802_v20, %v6536_v56 }
 0x1ca   : > { %v3289_v46 = vsel %vm597_vm8, %v701_v54, %v2052_v45  ;;  %vm3324_vm1 = vcmask 130048   ;;  %v1717_v9 = vor.u32 4788187, %v1716_v48  ;;  %vm898_vm0 = vweird.f32 %v6015_v24 }
 0x1cb   : > { %v1909_v43 = vshll.u32 %v1908_v22, 30  ;;  %v1932_v5 = vsub.s32 4, %v1908_v22  ;;  %v1720_v35 = vcvt.s32.f32 %v1713_v4  ;;  %v2154_v50 = vsel %vm2147_vm11, %v2150_v19, %v2153_v28  ;;  %v8101_v19 = vld [vmem:[#allocation22_spill] sm:$0xff] }
 0x1cc   : > { %vm902_vm3 = vcmp.eq.s32.totalorder %v6258_v47, 0  ;;  %v903_v25 = vxor.u32 2147483648, %v6336_v59  ;;  %v1718_v40 = vand.u32 2147483647, %v1717_v9  ;;  %v2155_v56 = vsel %vm794_vm6, nan, %v2154_v50 }
 0x1cd   : > { %v7124_v58 = vsub.s32 %v1906_v16, %v1909_v43  ;;  %v1933_v38 = vsel %vm1848_vm15, %v1932_v5, %v1908_v22  ;;  %v3290_v15 = vsel %vm597_vm8, %v805_v23, %v2155_v56  ;;  %v906_v11 = vxor.u32 2147483648, %v6334_v41  ;;  %v8100_v23 = vld [vmem:[#allocation27_spill] sm:$0xff] }
 0x1ce   : > { %v7132_v20 = vsel %vm7088_vm5, 0, %v1933_v38  ;;  %v904_v54 = vsel %vm902_vm3, %v6334_v41, %v903_v25  ;;  %v1721_v31 = vmul.f32 %v1720_v35, %v1718_v40  ;;  %vm901_vm14 = vcmp.lt.s32.totalorder %v6258_v47, 2 }
 0x1cf   : > { %v1912_v2 = vsub.s32 0, %v7124_v58  ;;  %vm905_vm4 = vcmp.eq.s32.totalorder %v6258_v47, 2  ;;  %v7142_v37 = vadd.s32 3, %v7132_v20  ;;  %v3302_v6 = vpack.c.bf16 %v3290_v15, %v3289_v46  ;;  %v8098_v47 = vld [vmem:[#allocation28_spill] sm:$0xff] }
 0x1d0   : > { %v907_v7 = vsel %vm905_vm4, %v906_v11, %v6336_v59  ;;  %vm1002_vm6 = vweird.f32 %v8096_v61  ;;  %v1722_v17 = vxor.u32 2147483648, %v1721_v31  ;;  %vm1005_vm2 = vcmp.lt.s32.totalorder %v8097_v42, 2 }
 0x1d1   : > { %v4897_v29 = vmin.u32 %v1912_v2, %v7124_v58  ;;  %v908_v16 = vsel %vm901_vm14, %v904_v54, %v907_v7  ;;  %5147 = vmatmul.mubr.msk.bf16.vlgmr.msra.gmra.mxu0 %vm3324_vm1, %v3302_v6  ;;  %vm1006_vm7 = vcmp.eq.s32.totalorder %v8097_v42, 0  ;;  %v1007_v51 = vxor.u32 2147483648, %v8098_v47  ;;  %v8103_v54 = vld [vmem:[#allocation20_spill] sm:$0xff] }
 0x1d2   : > { %v909_v39 = vsel %vm898_vm0, nan, %v908_v16  ;;  %vm1009_vm10 = vcmp.eq.s32.totalorder %v8097_v42, 2  ;;  %v1723_v34 = vsel %vm1640_vm12, %v1722_v17, %v1721_v31  ;;  %v8099_v44 = vmov 0.0   ;;  %v8105_v6 = vld [vmem:[#allocation36_spill] sm:$0xff]  ;;  %v8106_v17 = vld [vmem:[#allocation35_spill] sm:$0xff]  ;;  %5207 = vmatpush3.bf16.msra.mxu0 %v5469_v18 }
 0x1d3   : > { %v1914_v3 = vclz %v4897_v29  ;;  %5150 = vmatprep.mubr.msk.bf16.mxu0 %vm5808_vm9, %v8099_v44  ;;  %v1010_v33 = vxor.u32 2147483648, %v8100_v23  ;;  %vm2250_vm11 = vcmp.lt.s32.totalorder %v8101_v19, 2  ;;  %v1726_v4 = vsel %vm6986_vm13, %v6736_v57, %v1723_v34  ;;  %5268 = vmatprep.subr.bf16.mxu0 %v8099_v44 }
 0x1d4   : > { %v1008_v48 = vsel %vm1006_vm7, %v8100_v23, %v1007_v51  ;;  %vm2251_vm3 = vcmp.eq.s32.totalorder %v8101_v19, 0  ;;  %vm2254_vm14 = vcmp.eq.s32.totalorder %v8101_v19, 2  ;;  %5520 = vcosq.f32 %v1726_v4 }
 0x1d5   : > { %v4898_v22 = vadd.s32 4294967294, %v1914_v3  ;;  %v1011_v45 = vsel %vm1009_vm10, %v1010_v33, %v8098_v47  ;;  %v2253_v28 = vsel %vm2251_vm3, %v6334_v41, %v903_v25  ;;  %5522 = vsinq.f32 %v1726_v4 }
 0x1d6   : > { %v1012_v46 = vsel %vm1005_vm2, %v1008_v48, %v1011_v45  ;;  %v2256_v9 = vsel %vm2254_vm14, %v906_v11, %v6336_v59  ;;  %vm2353_vm12 = vcmp.lt.s32.totalorder %v8102_v32, 2  ;;  %vm2354_vm4 = vcmp.eq.s32.totalorder %v8102_v32, 0  ;;  %v8104_v11 = vld [vmem:[#allocation31_spill] sm:$0xff]  ;;  %v8110_v48 = vld [vmem:[#allocation33_spill] sm:$0xff]  ;;  %v8111_v45 = vld [vmem:[#allocation30_spill] sm:$0xff] }
 0x1d7   : > { %vm4899_vm13 = vcmp.lt.s32.totalorder %v4898_v22, 0  ;;  %v1013_v43 = vsel %vm1002_vm6, nan, %v1012_v46  ;;  %v2257_v5 = vsel %vm2250_vm11, %v2253_v28, %v2256_v9  ;;  %v2356_v41 = vsel %vm2354_vm4, %v8100_v23, %v1007_v51  ;;  %v8108_v51 = vld [vmem:[#allocation29_spill] sm:$0xff] }
 0x1d8   : > { %v1917_v35 = vsel %vm4899_vm13, 0, %v4898_v22  ;;  %v2258_v50 = vsel %vm898_vm0, nan, %v2257_v5  ;;  %vm2357_vm7 = vcmp.eq.s32.totalorder %v8102_v32, 2  ;;  %vm1106_vm2 = vweird.f32 %v8103_v54 }
 0x1d9   : > { %v1918_v25 = vsub.s32 32, %v1917_v35  ;;  %v1919_v59 = vshll.u32 %v7124_v58, %v1917_v35  ;;  %v1922_v40 = vsub.s32 4294967266, %v1917_v35  ;;  %v2359_v38 = vsel %vm2357_vm7, %v1010_v33, %v8098_v47  ;;  %v8107_v47 = vld [vmem:[#allocation19_spill] sm:$0xff]  ;;  %v8109_v33 = vld [vmem:[#allocation34_spill] sm:$0xff]  ;;  %v8112_v35 = vld [vmem:[#allocation25_spill] sm:$0xff] }
 0x1da   : > { %v2360_v56 = vsel %vm2353_vm12, %v2356_v41, %v2359_v38  ;;  %v3291_v15 = vsel %vm597_vm8, %v909_v39, %v2258_v50  ;;  %vm1109_vm10 = vcmp.lt.s32.totalorder %v8104_v11, 2  ;;  %vm1110_vm0 = vcmp.eq.s32.totalorder %v8104_v11, 0 }
 0x1db   : > { %v1920_v24 = vshrl.u32 %v7097_v52, %v1918_v25  ;;  %v1923_v31 = vadd.s32 127, %v1922_v40  ;;  %v2361_v2 = vsel %vm1002_vm6, nan, %v2360_v56  ;;  %v1111_v7 = vxor.u32 2147483648, %v8105_v6 }
 0x1dc   : > { %v3292_v58 = vsel %vm597_vm8, %v1013_v43, %v2361_v2  ;;  %vm1113_vm11 = vcmp.eq.s32.totalorder %v8104_v11, 2  ;;  %v1114_v29 = vxor.u32 2147483648, %v8106_v17  ;;  %vm1210_vm3 = vweird.f32 %v8107_v47  ;;  %v8114_v47 = vld [vmem:[#allocation37_spill] sm:$0xff] }
 0x1dd   : > { %v1921_v16 = vor.u32 %v1920_v24, %v1919_v59  ;;  %v1924_v42 = vshll.u32 %v1923_v31, 23  ;;  %v3303_v39 = vpack.c.bf16 %v3292_v58, %v3291_v15  ;;  %v1112_v52 = vsel %vm1110_vm0, %v8106_v17, %v1111_v7 }
 0x1de   : > { %v1115_v61 = vsel %vm1113_vm11, %v1114_v29, %v8105_v6  ;;  %vm1213_vm6 = vcmp.lt.s32.totalorder %v8108_v51, 2  ;;  %vm1214_vm14 = vcmp.eq.s32.totalorder %v8108_v51, 0  ;;  %v1215_v19 = vxor.u32 2147483648, %v8109_v33 }
 0x1df   : > { %v1925_v34 = vor.u32 4788187, %v1924_v42  ;;  %v1928_v3 = vcvt.s32.f32 %v1921_v16  ;;  %5151 = vmatmul.mubr.msk.bf16.gmra.mxu0 %vm3324_vm1, %v3303_v39  ;;  %v1116_v23 = vsel %vm1109_vm10, %v1112_v52, %v1115_v61  ;;  %vm1217_vm12 = vcmp.eq.s32.totalorder %v8108_v51, 2  ;;  %v8113_v16 = vld [vmem:[#allocation21_spill] sm:$0xff] }
 0x1e0   : > { %5154 = vmatprep.mubr.msk.bf16.mxu0 %vm5808_vm9, %v8099_v44  ;;  %v1117_v4 = vsel %vm1106_vm2, nan, %v1116_v23  ;;  %v1218_v22 = vxor.u32 2147483648, %v8110_v48  ;;  %vm2456_vm13 = vcmp.lt.s32.totalorder %v8111_v45, 2  ;;  %v1216_v46 = vsel %vm1214_vm14, %v8110_v48, %v1215_v19 }
 0x1e1   : > { %v1926_v28 = vand.u32 2147483647, %v1925_v34  ;;  %vm2457_vm4 = vcmp.eq.s32.totalorder %v8111_v45, 0  ;;  %vm2460_vm7 = vcmp.eq.s32.totalorder %v8111_v45, 2  ;;  %v7213_v9 = vpop.eup %5520  ;;  %vm2559_vm10 = vcmp.lt.s32.totalorder %v8112_v35, 2  ;;  %v8115_v34 = vld [vmem:[#allocation38_spill] sm:$0xff] }
 0x1e2   : > { %v1219_v32 = vsel %vm1217_vm12, %v1218_v22, %v8109_v33  ;;  %v2459_v43 = vsel %vm2457_vm4, %v8106_v17, %v1111_v7  ;;  %v2462_v5 = vsel %vm2460_vm7, %v1114_v29, %v8105_v6  ;;  %v7219_v50 = vpop.eup %5522  ;;  %vm2560_vm0 = vcmp.eq.s32.totalorder %v8112_v35, 0 }
 0x1e3   : > { %v1929_v41 = vmul.f32 %v1928_v3, %v1926_v28  ;;  %v1220_v25 = vsel %vm1213_vm6, %v1216_v46, %v1219_v32  ;;  %v2463_v59 = vsel %vm2456_vm13, %v2459_v43, %v2462_v5  ;;  %v2562_v56 = vsel %vm2560_vm0, %v8110_v48, %v1215_v19  ;;  %v8116_v3 = vld [vmem:[#allocation32_spill] sm:$0xff]  ;;  %v8117_v32 = vld [vmem:[#allocation42_spill] sm:$0xff] }
 0x1e4   : > { %v1221_v40 = vsel %vm1210_vm3, nan, %v1220_v25  ;;  %v2464_v38 = vsel %vm1106_vm2, nan, %v2463_v59  ;;  %vm2563_vm11 = vcmp.eq.s32.totalorder %v8112_v35, 2  ;;  %vm1314_vm6 = vweird.f32 %v6468_v30  ;;  %v8118_v5 = vld [vmem:[#allocation26_spill] sm:$0xff]  ;;  %v8119_v35 = vld [vmem:[#allocation40_spill] sm:$0xff] }
 0x1e5   : > { %v1930_v15 = vxor.u32 2147483648, %v1929_v41  ;;  %v2565_v11 = vsel %vm2563_vm11, %v1218_v22, %v8109_v33  ;;  %v3293_v24 = vsel %vm597_vm8, %v1117_v4, %v2464_v38  ;;  %vm1317_vm14 = vcmp.lt.s32.totalorder %v6765_v53, 2 }
 0x1e6   : > { %v2566_v31 = vsel %vm2559_vm10, %v2562_v56, %v2565_v11  ;;  %vm1318_vm12 = vcmp.eq.s32.totalorder %v6765_v53, 0  ;;  %v1319_v54 = vxor.u32 2147483648, %v6902_v55  ;;  %vm1321_vm2 = vcmp.eq.s32.totalorder %v6765_v53, 2 }
 0x1e7   : > { %v1931_v2 = vsel %vm1848_vm15, %v1930_v15, %v1929_v41  ;;  %v2567_v58 = vsel %vm1210_vm3, nan, %v2566_v31  ;;  %v1322_v6 = vxor.u32 2147483648, %v6892_v36  ;;  %vm1418_vm13 = vweird.f32 %v8113_v16  ;;  %v8121_v15 = vld [vmem:[#allocation43_spill] sm:$0xff] }
 0x1e8   : > { %v1934_v7 = vsel %vm7088_vm5, %v6881_v14, %v1931_v2  ;;  %v3294_v17 = vsel %vm597_vm8, %v1221_v40, %v2567_v58  ;;  %v1320_v29 = vsel %vm1318_vm12, %v6892_v36, %v1319_v54  ;;  %vm1421_vm15 = vcmp.lt.s32.totalorder %v8114_v47, 2  ;;  %v8120_v40 = vld [vmem:[#allocation44_spill] sm:$0xff] }
 0x1e9   : > { %5524 = vcosq.f32 %v1934_v7  ;;  %v3304_v42 = vpack.c.bf16 %v3294_v17, %v3293_v24  ;;  %v1323_v39 = vsel %vm1321_vm2, %v1322_v6, %v6902_v55  ;;  %vm1422_vm3 = vcmp.eq.s32.totalorder %v8114_v47, 0  ;;  %v8122_v24 = vld [vmem:[#allocation41_spill] sm:$0xff]  ;;  %v8123_v17 = vld [vmem:[#allocation39_spill] sm:$0xff] }
 0x1ea   : > { %5526 = vsinq.f32 %v1934_v7  ;;  %v1324_v52 = vsel %vm1317_vm14, %v1320_v29, %v1323_v39  ;;  %v1423_v49 = vxor.u32 2147483648, %v6810_v26  ;;  %vm1425_vm5 = vcmp.eq.s32.totalorder %v8114_v47, 2 }
 0x1eb   : > { %5155 = vmatmul.mubr.msk.bf16.gmra.mxu0 %vm3324_vm1, %v3304_v42  ;;  %v1325_v61 = vsel %vm1314_vm6, nan, %v1324_v52  ;;  %v1426_v51 = vxor.u32 2147483648, %v6779_v12  ;;  %vm2662_vm4 = vcmp.lt.s32.totalorder %v8115_v34, 2  ;;  %vm2663_vm7 = vcmp.eq.s32.totalorder %v8115_v34, 0 }
 0x1ec   : > { %5158 = vmatprep.mubr.msk.bf16.mxu0 %vm5808_vm9, %v8099_v44  ;;  %v1424_v53 = vsel %vm1422_vm3, %v6779_v12, %v1423_v49  ;;  %vm2666_vm10 = vcmp.eq.s32.totalorder %v8115_v34, 2  ;;  %vm2765_vm0 = vcmp.lt.s32.totalorder %v8116_v3, 2  ;;  %v2665_v33 = vsel %vm2663_vm7, %v6892_v36, %v1319_v54 }
 0x1ed   : > { %v1427_v23 = vsel %vm1425_vm5, %v1426_v51, %v6810_v26  ;;  %v2668_v19 = vsel %vm2666_vm10, %v1322_v6, %v6902_v55  ;;  %vm2766_vm11 = vcmp.eq.s32.totalorder %v8116_v3, 0  ;;  %vm2769_vm14 = vcmp.eq.s32.totalorder %v8116_v3, 2 }
 0x1ee   : > { %v1428_v4 = vsel %vm1421_vm15, %v1424_v53, %v1427_v23  ;;  %v2669_v48 = vsel %vm2662_vm4, %v2665_v33, %v2668_v19  ;;  %v2768_v22 = vsel %vm2766_vm11, %v6779_v12, %v1423_v49  ;;  %v2771_v36 = vsel %vm2769_vm14, %v1426_v51, %v6810_v26 }
 0x1ef   : > { %v1429_v45 = vsel %vm1418_vm13, nan, %v1428_v4  ;;  %v2670_v28 = vsel %vm1314_vm6, nan, %v2669_v48  ;;  %vm1522_vm12 = vweird.f32 %v6629_v8  ;;  %v2772_v55 = vsel %vm2765_vm0, %v2768_v22, %v2771_v36 }
 0x1f0   : > { %v3295_v46 = vsel %vm597_vm8, %v1325_v61, %v2670_v28  ;;  %vm1525_vm2 = vcmp.lt.s32.totalorder %v8117_v32, 2  ;;  %vm1526_vm15 = vcmp.eq.s32.totalorder %v8117_v32, 0  ;;  %v2773_v12 = vsel %vm1418_vm13, nan, %v2772_v55 }
 0x1f1   : > { %v1527_v43 = vxor.u32 2147483648, %v7025_v13  ;;  %vm1529_vm3 = vcmp.eq.s32.totalorder %v8117_v32, 2  ;;  %v1530_v30 = vxor.u32 2147483648, %v7006_v21  ;;  %v3296_v26 = vsel %vm597_vm8, %v1429_v45, %v2773_v12 }
 0x1f2   : > { %vm1626_vm6 = vweird.f32 %v8118_v5  ;;  %vm1629_vm5 = vcmp.lt.s32.totalorder %v8119_v35, 2  ;;  %vm1630_vm4 = vcmp.eq.s32.totalorder %v8119_v35, 0  ;;  %v3305_v41 = vpack.c.bf16 %v3296_v26, %v3295_v46 }
 0x1f3   : > { %v1528_v25 = vsel %vm1526_vm15, %v7006_v21, %v1527_v43  ;;  %v1531_v59 = vsel %vm1529_vm3, %v1530_v30, %v7025_v13  ;;  %v1631_v38 = vxor.u32 2147483648, %v8120_v40  ;;  %vm1633_vm13 = vcmp.eq.s32.totalorder %v8119_v35, 2 }
 0x1f4   : > { %v1532_v56 = vsel %vm1525_vm2, %v1528_v25, %v1531_v59  ;;  %v1634_v11 = vxor.u32 2147483648, %v8121_v15  ;;  %vm2868_vm7 = vcmp.lt.s32.totalorder %v8122_v24, 2  ;;  %5159 = vmatmul.mubr.msk.bf16.gmra.mxu0 %vm3324_vm1, %v3305_v41  ;;  %vm2869_vm10 = vcmp.eq.s32.totalorder %v8122_v24, 0 }
 0x1f5   : > { %v1533_v31 = vsel %vm1522_vm12, nan, %v1532_v56  ;;  %v1632_v54 = vsel %vm1630_vm4, %v8121_v15, %v1631_v38  ;;  %vm2872_vm0 = vcmp.eq.s32.totalorder %v8122_v24, 2  ;;  %5162 = vmatprep.mubr.msk.bf16.mxu0 %vm5808_vm9, %v8099_v44  ;;  %v2871_v6 = vsel %vm2869_vm10, %v7006_v21, %v1527_v43  ;;  %v7408_v56 = vld [vmem:[%s8124_s3] ss:$0 sm:$0xff]  ;;  %s5744_s3 = scalar_lea.vmem %s5743_s2, 32 }
 0x1f6   : > { %v7308_v2 = vpop.eup %5524  ;;  %v1635_v58 = vsel %vm1633_vm13, %v1634_v11, %v8120_v40  ;;  %v2874_v7 = vsel %vm2872_vm0, %v1530_v30, %v7025_v13  ;;  %vm2971_vm11 = vcmp.lt.s32.totalorder %v8123_v17, 2  ;;  %vm2972_vm14 = vcmp.eq.s32.totalorder %v8123_v17, 0 }
 0x1f7   : > { %v7316_v29 = vpop.eup %5526  ;;  %v1636_v16 = vsel %vm1629_vm5, %v1632_v54, %v1635_v58  ;;  %v2875_v42 = vsel %vm2868_vm7, %v2871_v6, %v2874_v7  ;;  %vm2975_vm2 = vcmp.eq.s32.totalorder %v8123_v17, 2  ;;  %v2974_v13 = vsel %vm2972_vm14, %v8121_v15, %v1631_v38  ;;  %v5468_v38 = vld [vmem:[%s7925_s4] sm:$0xff]  }
 0x1f8   : > { %v1637_v39 = vsel %vm1626_vm6, nan, %v1636_v16  ;;  %v2876_v21 = vsel %vm1522_vm12, nan, %v2875_v42  ;;  %v2977_v47 = vsel %vm2975_vm2, %v1634_v11, %v8120_v40  ;;  %v1940_v52 = vand.u32 3, %v7142_v37 }
 0x1f9   : > { %v2978_v49 = vsel %vm2971_vm11, %v2974_v13, %v2977_v47  ;;  %v3297_v61 = vsel %vm597_vm8, %v1533_v31, %v2876_v21  ;;  %vm1730_vm15 = vweird.f32 %v6736_v57  ;;  %vm1733_vm3 = vcmp.lt.s32.totalorder %v7066_v60, 2 }
 0x1fa   : > { %v2979_v51 = vsel %vm1626_vm6, nan, %v2978_v49  ;;  %vm1734_vm5 = vcmp.eq.s32.totalorder %v7066_v60, 0  ;;  %v1735_v8 = vxor.u32 2147483648, %v7219_v50  ;;  %vm1737_vm12 = vcmp.eq.s32.totalorder %v7066_v60, 2 }
 0x1fb   : > { %v3298_v34 = vsel %vm597_vm8, %v1637_v39, %v2979_v51  ;;  %v1738_v37 = vxor.u32 2147483648, %v7213_v9  ;;  %vm1837_vm4 = vcmp.lt.s32.totalorder %v6969_v1, 2  ;;  %vm1838_vm6 = vcmp.eq.s32.totalorder %v6969_v1, 0 }
 0x1fc   : > { %v3306_v53 = vpack.c.bf16 %v3298_v34, %v3297_v61  ;;  %v1736_v3 = vsel %vm1734_vm5, %v7213_v9, %v1735_v8  ;;  %v1839_v23 = vxor.u32 2147483648, %v7107_v0  ;;  %vm1841_vm13 = vcmp.eq.s32.totalorder %v6969_v1, 2 }
 0x1fd   : > { %v1739_v33 = vsel %vm1737_vm12, %v1738_v37, %v7219_v50  ;;  %v1842_v19 = vxor.u32 2147483648, %v7101_v10  ;;  %vm3074_vm7 = vcmp.lt.s32.totalorder %v7049_v63, 2  ;;  %vm3075_vm10 = vcmp.eq.s32.totalorder %v7049_v63, 0 }
 0x1fe   : > { %5163 = vmatmul.mubr.msk.bf16.gmra.mxu0 %vm3324_vm1, %v3306_v53  ;;  %v1740_v4 = vsel %vm1733_vm3, %v1736_v3, %v1739_v33  ;;  %v1840_v48 = vsel %vm1838_vm6, %v7101_v10, %v1839_v23  ;;  %vm3078_vm0 = vcmp.eq.s32.totalorder %v7049_v63, 2  ;;  %v3077_v28 = vsel %vm3075_vm10, %v7213_v9, %v1735_v8 }
 0x1ff   : > { %5166 = vmatprep.mubr.msk.bf16.mxu0 %vm5808_vm9, %v8099_v44  ;;  %v1741_v22 = vsel %vm1730_vm15, nan, %v1740_v4  ;;  %v1843_v45 = vsel %vm1841_vm13, %v1842_v19, %v7107_v0  ;;  %v3080_v36 = vsel %vm3078_vm0, %v1738_v37, %v7219_v50  ;;  %v3279_v60 = vand.u32 3, %v7132_v20 }
 0x200   : > { %v1844_v55 = vsel %vm1837_vm4, %v1840_v48, %v1843_v45  ;;  %v3081_v46 = vsel %vm3074_vm7, %v3077_v28, %v3080_v36  ;;  %vm3178_vm11 = vcmp.eq.s32.totalorder %v6959_v62, 0  ;;  %vm1834_vm14 = vweird.f32 %v6661_v27 }
 0x201   : > { %v3082_v63 = vsel %vm1730_vm15, nan, %v3081_v46  ;;  %v3180_v32 = vsel %vm3178_vm11, %v7101_v10, %v1839_v23  ;;  %vm3181_vm2 = vcmp.eq.s32.totalorder %v6959_v62, 2  ;;  %v1845_v9 = vsel %vm1834_vm14, nan, %v1844_v55 }
 0x202   : > { %vm3177_vm3 = vcmp.lt.s32.totalorder %v6959_v62, 2  ;;  %v3183_v20 = vsel %vm3181_vm2, %v1842_v19, %v7107_v0  ;;  %v3299_v1 = vsel %vm597_vm8, %v1741_v22, %v3082_v63  ;;  %vm1941_vm5 = vcmp.lt.s32.totalorder %v1940_v52, 2 }
 0x203   : > { %v3184_v50 = vsel %vm3177_vm3, %v3180_v32, %v3183_v20  ;;  %vm1942_vm12 = vcmp.eq.s32.totalorder %v1940_v52, 0  ;;  %v1943_v27 = vxor.u32 2147483648, %v7316_v29  ;;  %vm1945_vm4 = vcmp.eq.s32.totalorder %v1940_v52, 2 }
 0x204   : > { %v3185_v12 = vsel %vm1834_vm14, nan, %v3184_v50  ;;  %v1946_v57 = vxor.u32 2147483648, %v7308_v2  ;;  %vm3281_vm15 = vcmp.eq.s32.totalorder %v3279_v60, 0  ;;  %vm3284_vm6 = vcmp.eq.s32.totalorder %v3279_v60, 2 }
 0x205   : > { %v3300_v10 = vsel %vm597_vm8, %v1845_v9, %v3185_v12  ;;  %v1944_v62 = vsel %vm1942_vm12, %v7308_v2, %v1943_v27  ;;  %v3283_v0 = vsel %vm3281_vm15, %v7308_v2, %v1943_v27  ;;  %vm3280_vm13 = vcmp.lt.s32.totalorder %v3279_v60, 2 }
 0x206   : > { %v3307_v43 = vpack.c.bf16 %v3300_v10, %v3299_v1  ;;  %v1947_v30 = vsel %vm1945_vm4, %v1946_v57, %v7316_v29  ;;  %v3286_v26 = vsel %vm3284_vm6, %v1946_v57, %v7316_v29  ;;  %vm1938_vm7 = vweird.f32 %v6881_v14  ;;  %v5467_v14 = vld [vmem:[%s7925_s4 + $0x8] sm:$0xff]  }
 0x207   : > { %v1948_v5 = vsel %vm1941_vm5, %v1944_v62, %v1947_v30  ;;  %v3287_v35 = vsel %vm3280_vm13, %v3283_v0, %v3286_v26  ;;  %5175 = vmatpush3.bf16.msra.mxu1 %v5467_v14  ;;  %vm3594_vm10 = vcmask 261120   ;;  %vm3847_vm0 = vcmask 195584  }
 0x208   : > { %5167 = vmatmul.mubr.msk.bf16.gmra.mxu0 %vm3324_vm1, %v3307_v43  ;;  %v1949_v41 = vsel %vm1938_vm7, nan, %v1948_v5  ;;  %v3288_v25 = vsel %vm1938_vm7, nan, %v3287_v35  ;;  %5176 = vmatprep.subr.bf16.mxu1 %v8099_v44 }
 0x209   : > { %5170 = vmatprep.mubr.msk.bf16.mxu0 %vm5808_vm9, %v8099_v44  ;;  %v3301_v59 = vsel %vm597_vm8, %v1949_v41, %v3288_v25  ;;  %vm3869_vm8 = vcmask 1043456  }
 0x20a   : > { %v3308_v40 = vpack.c.bf16 %v3301_v59, %v3301_v59 }
 0x20b   : > { %5177 = vmatpush3.bf16.msra.mxu1 %v5468_v38  ;;  %v5470_v38 = vld [vmem:[%s7927_s6 + $0x8] ss:$0 sps:$4 sm:$0xff]  }
 0x20c   : > { %5236 = vmatprep.subr.bf16.mxu1 %v8099_v44 }
 0x210   : > { %5171 = vmatmul.mubr.msk.bf16.gmra.mxu0 %vm3324_vm1, %v3308_v40 }
 0x211   : > { %5208 = vmatprep.mubr.msk.bf16.mxu0 %vm5808_vm9, %v8099_v44 }
 0x291   : > { %v3380_v15 = vpop.f32.mrf.mxu0 }
 0x292   : > { %v7411_v11 = vadd.f32 %v7408_v56, %v3380_v15 }
 0x293   : > { %v5148_v24 = vpop.f32.mrf.mxu0 }
 0x294   : > { %v3434_v31 = vmin.f32 %v7411_v11, 20.0 }
 0x295   : > { %v3383_v54 = vpop.f32.mrf.mxu0 }
 0x296   : > { %v3447_v2 = vmul.f32 1.442695, %v3434_v31  ;;  %v3384_v58 = vadd.f32 %v7408_v56, %v3383_v54 }
 0x297   : > { %v5149_v6 = vpop.f32.mrf.mxu0 }
 0x298   : > { %5528 = vpow2.f32 %v3447_v2  ;;  %v3435_v7 = vmin.f32 %v3384_v58, 20.0 }
 0x29a   : > { %v3449_v17 = vmul.f32 1.442695, %v3435_v7 }
 0x29c   : > { %5530 = vpow2.f32 %v3449_v17 }
 0x29f   : > { %v3388_v29 = vpop.f32.mrf.mxu0 }
 0x2a0   : > { %v7416_v16 = vadd.f32 %v7408_v56, %v3388_v29  ;;  %v3871_v29 = vsel %vm3869_vm8, %v5470_v38, 0 }
 0x2a1   : > { %v5152_v42 = vpop.f32.mrf.mxu0 }
 0x2a2   : > { %v3436_v39 = vmin.f32 %v7416_v16, 20.0 }
 0x2a3   : > { %v3391_v21 = vpop.f32.mrf.mxu0 }
 0x2a4   : > { %v3451_v13 = vmul.f32 1.442695, %v3436_v39  ;;  %v7420_v47 = vadd.f32 %v7408_v56, %v3391_v21 }
 0x2a5   : > { %v5153_v52 = vpop.f32.mrf.mxu0  ;;  %v5529_v49 = vpop.eup %5528 }
 0x2a6   : > { %5532 = vpow2.f32 %v3451_v13  ;;  %v3437_v61 = vmin.f32 %v7420_v47, 20.0  ;;  %v3473_v51 = vadd.f32 1.0, %v5529_v49 }
 0x2a8   : > { %v3453_v8 = vmul.f32 1.442695, %v3437_v61  ;;  %v3486_v34 = vmul.f32 %v3473_v51, %v3473_v51 }
 0x2a9   : > { %v5531_v37 = vpop.eup %5530 }
 0x2aa   : > { %5534 = vpow2.f32 %v3453_v8  ;;  %v3525_v53 = vadd.f32 1.0, %v3486_v34  ;;  %v3474_v3 = vadd.f32 1.0, %v5531_v37  ;;  %v4961_v62 = vadd.f32 -1.0, %v3486_v34  ;;  %v5471_v8 = vld [vmem:[%s7927_s6] sm:$0xff]  }
 0x2ab   : > { %v3396_v23 = vpop.f32.mrf.mxu0 }
 0x2ac   : > { %v7424_v33 = vadd.f32 %v7408_v56, %v3396_v23  ;;  %v3487_v19 = vmul.f32 %v3474_v3, %v3474_v3  ;;  %5536 = vrcp.f32 %v3525_v53  ;;  %v3512_v59 = vmul.f32 %v4961_v62, %v7411_v11 }
 0x2ad   : > { %v5156_v4 = vpop.f32.mrf.mxu0 }
 0x2ae   : > { %v3438_v48 = vmin.f32 %v7424_v33, 20.0  ;;  %v3526_v22 = vadd.f32 1.0, %v3487_v19  ;;  %v4962_v0 = vadd.f32 -1.0, %v3487_v19 }
 0x2af   : > { %v3399_v45 = vpop.f32.mrf.mxu0 }
 0x2b0   : > { %v3455_v28 = vmul.f32 1.442695, %v3438_v48  ;;  %v7428_v36 = vadd.f32 %v7408_v56, %v3399_v45  ;;  %5538 = vrcp.f32 %v3526_v22  ;;  %v3513_v40 = vmul.f32 %v4962_v0, %v3384_v58 }
 0x2b1   : > { %v5157_v60 = vpop.f32.mrf.mxu0 }
 0x2b2   : > { %5540 = vpow2.f32 %v3455_v28  ;;  %v3439_v55 = vmin.f32 %v7428_v36, 20.0 }
 0x2b3   : > { %v5533_v46 = vpop.eup %5532 }
 0x2b4   : > { %v3475_v63 = vadd.f32 1.0, %v5533_v46  ;;  %v3457_v32 = vmul.f32 1.442695, %v3439_v55  ;;  %v3404_v9 = vpop.f32.mrf.mxu0 }
 0x2b5   : > { %v7432_v1 = vadd.f32 %v7408_v56, %v3404_v9 }
 0x2b6   : > { %v3488_v20 = vmul.f32 %v3475_v63, %v3475_v63  ;;  %5542 = vpow2.f32 %v3457_v32  ;;  %v5160_v27 = vpop.f32.mrf.mxu0 }
 0x2b7   : > { %v5535_v50 = vpop.eup %5534  ;;  %v3440_v10 = vmin.f32 %v7432_v1, 20.0 }
 0x2b8   : > { %v3527_v12 = vadd.f32 1.0, %v3488_v20  ;;  %v3476_v57 = vadd.f32 1.0, %v5535_v50  ;;  %v3407_v43 = vpop.f32.mrf.mxu0  ;;  %v4963_v37 = vadd.f32 -1.0, %v3488_v20 }
 0x2b9   : > { %v3459_v26 = vmul.f32 1.442695, %v3440_v10  ;;  %v7436_v5 = vadd.f32 %v7408_v56, %v3407_v43  ;;  %v5537_v41 = vpop.eup %5536 }
 0x2ba   : > { %v3489_v30 = vmul.f32 %v3476_v57, %v3476_v57  ;;  %5544 = vrcp.f32 %v3527_v12  ;;  %v5161_v35 = vpop.f32.mrf.mxu0  ;;  %v3551_v31 = vmul.f32 %v5537_v41, %v3512_v59  ;;  %v3514_v28 = vmul.f32 %v4963_v37, %v7416_v16 }
 0x2bb   : > { %5546 = vpow2.f32 %v3459_v26  ;;  %v3441_v14 = vmin.f32 %v7436_v5, 20.0 }
 0x2bc   : > { %v3528_v25 = vadd.f32 1.0, %v3489_v30  ;;  %v4964_v53 = vadd.f32 -1.0, %v3489_v30 }
 0x2bd   : > { %v5539_v18 = vpop.eup %5538  ;;  %v3461_v2 = vmul.f32 1.442695, %v3441_v14 }
 0x2be   : > { %5548 = vrcp.f32 %v3528_v25  ;;  %v3412_v15 = vpop.f32.mrf.mxu0  ;;  %v3552_v54 = vmul.f32 %v5539_v18, %v3513_v40  ;;  %v3515_v60 = vmul.f32 %v4964_v53, %v7420_v47 }
 0x2bf   : > { %v5541_v24 = vpop.eup %5540  ;;  %v7444_v6 = vadd.f32 %v7408_v56, %v3412_v15  ;;  %5550 = vpow2.f32 %v3461_v2 }
 0x2c0   : > { %v3477_v7 = vadd.f32 1.0, %v5541_v24  ;;  %v5164_v11 = vpop.f32.mrf.mxu0  ;;  %v3564_v58 = vpack.c.bf16 %v3552_v54, %v3551_v31 }
 0x2c1   : > { %v3442_v17 = vmin.f32 %v7444_v6, 20.0 }
 0x2c2   : > { %v3490_v42 = vmul.f32 %v3477_v7, %v3477_v7  ;;  %v3415_v39 = vpop.f32.mrf.mxu0  ;;  %5179 = vmatmul.mubr.msk.bf16.vlgmr.msra.gmra.mxu1 %vm3594_vm10, %v3564_v58 }
 0x2c3   : > { %v5543_v21 = vpop.eup %5542  ;;  %v3463_v13 = vmul.f32 1.442695, %v3442_v17  ;;  %v7448_v52 = vadd.f32 %v7408_v56, %v3415_v39  ;;  %5182 = vmatprep.mubr.msk.bf16.mxu1 %vm5808_vm9, %v8099_v44  ;;  %5237 = vmatpush3.bf16.msra.mxu1 %v3871_v29 }
 0x2c4   : > { %v3529_v49 = vadd.f32 1.0, %v3490_v42  ;;  %v3478_v61 = vadd.f32 1.0, %v5543_v21  ;;  %v5165_v51 = vpop.f32.mrf.mxu0  ;;  %5238 = vmatprep.subr.bf16.mxu1 %v8099_v44  ;;  %v4965_v59 = vadd.f32 -1.0, %v3490_v42 }
 0x2c5   : > { %5552 = vpow2.f32 %v3463_v13  ;;  %v3443_v34 = vmin.f32 %v7448_v52, 20.0 }
 0x2c6   : > { %v3491_v3 = vmul.f32 %v3478_v61, %v3478_v61  ;;  %5554 = vrcp.f32 %v3529_v49 }
 0x2c7   : > { %v3465_v23 = vmul.f32 1.442695, %v3443_v34  ;;  %v5545_v19 = vpop.eup %5544  ;;  %5239 = vmatpush3.bf16.msra.mxu1 %v5471_v8 }
 0x2c8   : > { %v3530_v4 = vadd.f32 1.0, %v3491_v3  ;;  %v3420_v48 = vpop.f32.mrf.mxu0  ;;  %v5547_v22 = vpop.eup %5546  ;;  %5300 = vmatprep.subr.bf16.mxu1 %v8099_v44  ;;  %v3553_v9 = vmul.f32 %v5545_v19, %v3514_v28  ;;  %v4966_v40 = vadd.f32 -1.0, %v3491_v3 }
 0x2c9   : > { %5556 = vpow2.f32 %v3465_v23  ;;  %v7459_v45 = vadd.f32 %v7408_v56, %v3420_v48  ;;  %v3479_v55 = vadd.f32 1.0, %v5547_v22 }
 0x2ca   : > { %5558 = vrcp.f32 %v3530_v4  ;;  %v5168_v46 = vpop.f32.mrf.mxu0  ;;  %v3517_v7 = vmul.f32 %v4966_v40, %v7428_v36 }
 0x2cb   : > { %v5549_v63 = vpop.eup %5548  ;;  %v3444_v32 = vmin.f32 %v7459_v45, 20.0  ;;  %v3492_v50 = vmul.f32 %v3479_v55, %v3479_v55 }
 0x2cc   : > { %v3554_v20 = vmul.f32 %v5549_v63, %v3515_v60  ;;  %v3423_v27 = vpop.f32.mrf.mxu0  ;;  %v5551_v10 = vpop.eup %5550 }
 0x2cd   : > { %v3467_v12 = vmul.f32 1.442695, %v3444_v32  ;;  %v7466_v57 = vadd.f32 %v7408_v56, %v3423_v27  ;;  %v3531_v0 = vadd.f32 1.0, %v3492_v50  ;;  %v3480_v43 = vadd.f32 1.0, %v5551_v10 }
 0x2ce   : > { %v3565_v62 = vpack.c.bf16 %v3554_v20, %v3553_v9  ;;  %v5169_v16 = vpop.f32.mrf.mxu0  ;;  %v4967_v8 = vadd.f32 -1.0, %v3492_v50 }
 0x2cf   : > { %5560 = vpow2.f32 %v3467_v12  ;;  %v3445_v47 = vmin.f32 %v7466_v57, 20.0  ;;  %v3493_v26 = vmul.f32 %v3480_v43, %v3480_v43 }
 0x2d0   : > { %v3428_v30 = vpop.f32.mrf.mxu0  ;;  %5183 = vmatmul.mubr.msk.bf16.gmra.mxu1 %vm3594_vm10, %v3565_v62  ;;  %5562 = vrcp.f32 %v3531_v0  ;;  %v3518_v3 = vmul.f32 %v4967_v8, %v7432_v1 }
 0x2d1   : > { %v3469_v35 = vmul.f32 1.442695, %v3445_v47  ;;  %v7471_v41 = vadd.f32 %v7408_v56, %v3428_v30  ;;  %5186 = vmatprep.mubr.msk.bf16.mxu1 %vm5808_vm9, %v8099_v44  ;;  %v3532_v38 = vadd.f32 1.0, %v3493_v26  ;;  %v3516_v56 = vmul.f32 %v4965_v59, %v7424_v33 }
 0x2d2   : > { %v5553_v25 = vpop.eup %5552  ;;  %v5172_v14 = vpop.f32.mrf.mxu0  ;;  %v4968_v34 = vadd.f32 -1.0, %v3493_v26 }
 0x2d3   : > { %v3481_v18 = vadd.f32 1.0, %v5553_v25  ;;  %5564 = vpow2.f32 %v3469_v35  ;;  %v3446_v15 = vmin.f32 %v7471_v41, 20.0  ;;  %v5555_v31 = vpop.eup %5554 }
 0x2d4   : > { %v3431_v24 = vpop.f32.mrf.mxu0  ;;  %5566 = vrcp.f32 %v3532_v38  ;;  %v3555_v39 = vmul.f32 %v5555_v31, %v3516_v56  ;;  %v3519_v23 = vmul.f32 %v4968_v34, %v7436_v5  ;;  %v8129_v31 = vld [vmem:[#allocation6_spill] sm:$0xff]  ;;  %v8132_v56 = vld [vmem:[#allocation11_spill] sm:$0xff]  ;;  %v4974_v34 = vld [vmem:[%s7926_s5] ss:$0 sm:$0xff] }
 0x2d5   : > { %v3494_v54 = vmul.f32 %v3481_v18, %v3481_v18  ;;  %v3471_v11 = vmul.f32 1.442695, %v3446_v15 }
 0x2d6   : > { %v5557_v2 = vpop.eup %5556  ;;  %v5173_v58 = vpop.f32.mrf.mxu0 }
 0x2d7   : > { %v5559_v17 = vpop.eup %5558  ;;  %v3533_v29 = vadd.f32 1.0, %v3494_v54  ;;  %v3482_v42 = vadd.f32 1.0, %v5557_v2  ;;  %5568 = vpow2.f32 %v3471_v11  ;;  %v4969_v55 = vadd.f32 -1.0, %v3494_v54  ;;  %v8131_v2 = vld [vmem:[#allocation10_spill] sm:$0xff]  ;;  %v8134_v11 = vld [vmem:[#allocation12_spill] sm:$0xff]  ;;  %v8135_v58 = vld [vmem:[#allocation13_spill] sm:$0xff] }
 0x2d8   : > { %v3556_v21 = vmul.f32 %v5559_v17, %v3517_v7  ;;  %v8133_v7 = vpack.c.bf16 %v8131_v2, %v8132_v56  ;;  %v8136_v17 = vpack.c.bf16 %v8134_v11, %v8135_v58  ;;  %v5472_v58 = vld [vmem:[%s7930_s9 + $0x8] sm:$0xff]  }
 0x2d9   : > { %v3495_v13 = vmul.f32 %v3482_v42, %v3482_v42  ;;  %5570 = vrcp.f32 %v3533_v29  ;;  %v3520_v5 = vmul.f32 %v4969_v55, %v7444_v6  ;;  %v8137_v29 = vld [vmem:[#allocation14_spill] sm:$0xff]  ;;  %v8138_v42 = vld [vmem:[#allocation15_spill] sm:$0xff] }
 0x2da   : > { %v3566_v49 = vpack.c.bf16 %v3556_v21, %v3555_v39  ;;  %v8139_v39 = vpack.c.bf16 %v8137_v29, %v8138_v42  ;;  %v8140_v21 = vld [vmem:[#allocation16_spill] sm:$0xff] }
 0x2db   : > { %v3534_v61 = vadd.f32 1.0, %v3495_v13  ;;  %v4970_v32 = vadd.f32 -1.0, %v3495_v13  ;;  %v8141_v13 = vld [vmem:[#allocation17_spill] sm:$0xff] }
 0x2dc   : > { %v5561_v51 = vpop.eup %5560  ;;  %5187 = vmatmul.mubr.msk.bf16.gmra.mxu1 %vm3594_vm10, %v3566_v49  ;;  %v8142_v49 = vpack.c.bf16 %v8140_v21, %v8141_v13 }
 0x2dd   : > { %5572 = vrcp.f32 %v3534_v61  ;;  %v3483_v33 = vadd.f32 1.0, %v5561_v51  ;;  %5190 = vmatprep.mubr.msk.bf16.mxu1 %vm5808_vm9, %v8099_v44  ;;  %v5563_v36 = vpop.eup %5562  ;;  %v3521_v27 = vmul.f32 %v4970_v32, %v7448_v52  ;;  %v5737_v61 = vld [vmem:[%s5946_s24 + $0x60] sm:$0xff]  ;;  %s488_s24 = sand.u32 1, %s5790_s21  }
 0x2de   : > { %v3557_v22 = vmul.f32 %v5563_v36, %v3518_v3  ;;  %v3710_v51 = vpack.c.bf16 %v5737_v61, %v5737_v61  ;;  %s489_s0 = scalar_lea.vmem [#allocation3], %s488_s24  ;;  %s4775_s19 = scalar_lea.sflag [#allocation4], %s488_s24 }
 0x2df   : > { %v3496_v37 = vmul.f32 %v3483_v33, %v3483_v33  ;;  %s4787_s27 = sshll.u32 %s489_s0, 4  ;;  %s4788_s27 = int_to_ptr.vmem [resolvable:$true] %s4787_s27 }
 0x2e0   : > { %v5565_v53 = vpop.eup %5564  ;;  %s5738_s1 = scalar_lea.vmem %s4788_s27, 16  ;;  %p5745_p0 = scmp.lt.s32.totalorder %s4788_s27, %s5743_s2 }
 0x2e1   : > { %v3535_v19 = vadd.f32 1.0, %v3496_v37  ;;  %v3484_v4 = vadd.f32 1.0, %v5565_v53  ;;  %v5567_v48 = vpop.eup %5566  ;;  %v4971_v43 = vadd.f32 -1.0, %v3496_v37  ;;  %p5739_p11 = scmp.ne.s32.totalorder %s4788_s27, %s5738_s1  ;;  %p5746_p1 = scmp.lt.s32.totalorder %s5744_s3, %s5738_s1 }
 0x2e2   : > { %v3558_v28 = vmul.f32 %v5567_v48, %v3519_v23 }
 0x2e3   : > { %v3497_v60 = vmul.f32 %v3484_v4, %v3484_v4  ;;  %5574 = vrcp.f32 %v3535_v19  ;;  %v3522_v26 = vmul.f32 %v4971_v43, %v7459_v45  ;;  %v8125_v45 = vld [vmem:[#allocation9_spill] sm:$0xff]  ;;  %p5740_p12 = pnand %p5739_p11, %p5932_p5  ;;  %p5747_p2 = por %p5746_p1, %p5745_p0 }
 0x2e4   : > { %v5569_v46 = vpop.eup %5568  ;;  %v3567_v63 = vpack.c.bf16 %v3558_v28, %v3557_v22 }
 0x2e5   : > { %v3536_v9 = vadd.f32 1.0, %v3497_v60  ;;  %v3485_v20 = vadd.f32 1.0, %v5569_v46  ;;  %v4972_v47 = vadd.f32 -1.0, %v3497_v60  ;;  %p5741_p13 = pneg %p5740_p12 }
 0x2e6   : > { %5191 = vmatmul.mubr.msk.bf16.gmra.mxu1 %vm3594_vm10, %v3567_v63  ;;  %v5571_v50 = vpop.eup %5570 }
 0x2e7   : > { %5576 = vrcp.f32 %v3536_v9  ;;  %v3498_v1 = vmul.f32 %v3485_v20, %v3485_v20  ;;  %5194 = vmatprep.mubr.msk.bf16.mxu1 %vm5808_vm9, %v8099_v44  ;;  %v3559_v62 = vmul.f32 %v5571_v50, %v3520_v5  ;;  %v3523_v6 = vmul.f32 %v4972_v47, %v7466_v57  ;;  %v8126_v57 = vld [vmem:[#allocation8_spill] sm:$0xff]  ;;  %p5748_p3 = pnand %p5747_p2, %p5741_p13 }
 0x2e8   : > { %v8127_v24 = vpack.c.bf16 %v8125_v45, %v8126_v57 }
 0x2e9   : > { %v3537_v10 = vadd.f32 1.0, %v3498_v1  ;;  %v4973_v59 = vadd.f32 -1.0, %v3498_v1 }
 0x2ea   : > { %v5573_v12 = vpop.eup %5572 }
 0x2eb   : > { %v3560_v0 = vmul.f32 %v5573_v12, %v3521_v27  ;;  %5578 = vrcp.f32 %v3537_v10  ;;  %v3524_v38 = vmul.f32 %v4973_v59, %v7471_v41  ;;  %v8128_v41 = vld [vmem:[#allocation7_spill] sm:$0xff] }
 0x2ec   : > { %v8130_v54 = vpack.c.bf16 %v8128_v41, %v8129_v31 }
 0x2ed   : > { %v3568_v16 = vpack.c.bf16 %v3560_v0, %v3559_v62 }
 0x2ef   : > { %5195 = vmatmul.mubr.msk.bf16.gmra.mxu1 %vm3594_vm10, %v3568_v16 }
 0x2f0   : > { %5198 = vmatprep.mubr.msk.bf16.mxu1 %vm5808_vm9, %v8099_v44  ;;  %v5575_v30 = vpop.eup %5574 }
 0x2f1   : > { %v3561_v52 = vmul.f32 %v5575_v30, %v3522_v26 }
 0x2f4   : > { %v5577_v35 = vpop.eup %5576 }
 0x2f5   : > { %v3562_v25 = vmul.f32 %v5577_v35, %v3523_v6 }
 0x2f7   : > { %v3569_v40 = vpack.c.bf16 %v3562_v25, %v3561_v52 }
 0x2f8   : > { %v5579_v14 = vpop.eup %5578 }
 0x2f9   : > { %5199 = vmatmul.mubr.msk.bf16.gmra.mxu1 %vm3594_vm10, %v3569_v40  ;;  %v3563_v18 = vmul.f32 %v5579_v14, %v3524_v38 }
 0x2fa   : > { %5202 = vmatprep.mubr.msk.bf16.mxu1 %vm5808_vm9, %v8099_v44 }
 0x2fb   : > { %v3570_v15 = vpack.c.bf16 %v3563_v18, %v3563_v18 }
 0x301   : > { %5203 = vmatmul.mubr.msk.bf16.gmra.mxu1 %vm3594_vm10, %v3570_v15 }
 0x302   : > { %5240 = vmatprep.mubr.msk.bf16.mxu1 %vm5808_vm9, %v8099_v44 }
 0x309   : > { %5241 = vmatmul.mubr.msk.bf16.vlgmr.msra.gmra.mxu1 %vm3847_vm0, %v8127_v24 }
 0x30a   : > { %5244 = vmatprep.mubr.msk.bf16.mxu1 %vm5808_vm9, %v8099_v44 }
 0x311   : > { %5245 = vmatmul.mubr.msk.bf16.gmra.mxu1 %vm3847_vm0, %v8130_v54 }
 0x312   : > { %5248 = vmatprep.mubr.msk.bf16.mxu1 %vm5808_vm9, %v8099_v44 }
 0x319   : > { %5249 = vmatmul.mubr.msk.bf16.gmra.mxu1 %vm3847_vm0, %v8133_v7 }
 0x31a   : > { %5252 = vmatprep.mubr.msk.bf16.mxu1 %vm5808_vm9, %v8099_v44 }
 0x321   : > { %5253 = vmatmul.mubr.msk.bf16.gmra.mxu1 %vm3847_vm0, %v8136_v17 }
 0x322   : > { %5256 = vmatprep.mubr.msk.bf16.mxu1 %vm5808_vm9, %v8099_v44 }
 0x329   : > { %5257 = vmatmul.mubr.msk.bf16.gmra.mxu1 %vm3847_vm0, %v8139_v39 }
 0x32a   : > { %5260 = vmatprep.mubr.msk.bf16.mxu1 %vm5808_vm9, %v8099_v44 }
 0x331   : > { %5261 = vmatmul.mubr.msk.bf16.gmra.mxu1 %vm3847_vm0, %v8142_v49 }
 0x332   : > { %5264 = vmatprep.mubr.msk.bf16.mxu1 %vm5808_vm9, %v8099_v44 }
 0x339   : > { %5265 = vmatmul.mubr.msk.bf16.gmra.mxu1 %vm3847_vm0, %v3710_v51 }
 0x33a   : > { %5304 = vmatprep.mubr.msk.bf16.mxu1 %vm5808_vm9, %v8099_v44 }
 0x382   : > { %v3650_v8 = vpop.f32.mrf.mxu1 }
 0x383   : > { %v3651_v37 = vadd.f32 %v4974_v34, %v3650_v8 }
 0x384   : > { %v5180_v33 = vpop.f32.mrf.mxu1 }
 0x386   : > { %v3653_v36 = vpop.f32.mrf.mxu1 }
 0x387   : > { %v3654_v53 = vadd.f32 %v4974_v34, %v3653_v36 }
 0x388   : > { %v5181_v3 = vpop.f32.mrf.mxu1 }
 0x389   : > { %v3714_v23 = vpack.c.bf16 %v3654_v53, %v3651_v37  ;;  %v5473_v53 = vld [vmem:[%s7930_s9] sm:$0xff]  }
 0x38b   : > { %5209 = vmatmul.mubr.msk.bf16.vlgmr.msra.gmra.mxu0 %vm3324_vm1, %v3714_v23 }
 0x38c   : > { %5212 = vmatprep.mubr.msk.bf16.mxu0 %vm5808_vm9, %v8099_v44  ;;  %5269 = vmatpush3.bf16.msra.mxu0 %v5472_v58 }
 0x38d   : > { %5270 = vmatprep.subr.bf16.mxu0 %v8099_v44 }
 0x390   : > { %v3658_v19 = vpop.f32.mrf.mxu1  ;;  %5271 = vmatpush3.bf16.msra.mxu0 %v5473_v53 }
 0x391   : > { %v3659_v22 = vadd.f32 %v4974_v34, %v3658_v19  ;;  %5332 = vmatprep.subr.mxu0 %v8099_v44 }
 0x392   : > { %v5184_v4 = vpop.f32.mrf.mxu1 }
 0x394   : > { %v3661_v48 = vpop.f32.mrf.mxu1 }
 0x395   : > { %v3662_v28 = vadd.f32 %v4974_v34, %v3661_v48 }
 0x396   : > { %v5185_v60 = vpop.f32.mrf.mxu1 }
 0x397   : > { %v3715_v55 = vpack.c.bf16 %v3662_v28, %v3659_v22 }
 0x399   : > { %5213 = vmatmul.mubr.msk.bf16.gmra.mxu0 %vm3324_vm1, %v3715_v55 }
 0x39a   : > { %5216 = vmatprep.mubr.msk.bf16.mxu0 %vm5808_vm9, %v8099_v44 }
 0x39c   : > { %v3666_v46 = vpop.f32.mrf.mxu1 }
 0x39d   : > { %v3667_v9 = vadd.f32 %v4974_v34, %v3666_v46 }
 0x39e   : > { %v5188_v63 = vpop.f32.mrf.mxu1 }
 0x39f   : > { %v5474_v63 = vld [vmem:[%s7932_s11 + $0x8] sm:$0xff]  }
 0x3a0   : > { %v3669_v32 = vpop.f32.mrf.mxu1  ;;  %5301 = vmatpush3.bf16.msra.mxu1 %v5474_v63 }
 0x3a1   : > { %v3670_v20 = vadd.f32 %v4974_v34, %v3669_v32  ;;  %5302 = vmatprep.subr.bf16.mxu1 %v8099_v44 }
 0x3a2   : > { %v5189_v50 = vpop.f32.mrf.mxu1 }
 0x3a3   : > { %v3716_v1 = vpack.c.bf16 %v3670_v20, %v3667_v9  ;;  %v7588_v9 = vld [vmem:[%s7929_s8] ss:$0 sm:$0xff] }
 0x3a5   : > { %5217 = vmatmul.mubr.msk.bf16.gmra.mxu0 %vm3324_vm1, %v3716_v1 }
 0x3a6   : > { %5220 = vmatprep.mubr.msk.bf16.mxu0 %vm5808_vm9, %v8099_v44  ;;  %v3674_v5 = vpop.f32.mrf.mxu1 }
 0x3a7   : > { %v3675_v10 = vadd.f32 %v4974_v34, %v3674_v5 }
 0x3a8   : > { %v5192_v27 = vpop.f32.mrf.mxu1 }
 0x3aa   : > { %v3677_v12 = vpop.f32.mrf.mxu1 }
 0x3ab   : > { %v3678_v62 = vadd.f32 %v4974_v34, %v3677_v12 }
 0x3ac   : > { %v5193_v0 = vpop.f32.mrf.mxu1 }
 0x3ad   : > { %v3717_v16 = vpack.c.bf16 %v3678_v62, %v3675_v10 }
 0x3af   : > { %v3682_v43 = vpop.f32.mrf.mxu1  ;;  %5221 = vmatmul.mubr.msk.bf16.gmra.mxu0 %vm3324_vm1, %v3717_v16 }
 0x3b0   : > { %5224 = vmatprep.mubr.msk.bf16.mxu0 %vm5808_vm9, %v8099_v44  ;;  %v3683_v26 = vadd.f32 %v4974_v34, %v3682_v43 }
 0x3b1   : > { %v5196_v47 = vpop.f32.mrf.mxu1 }
 0x3b3   : > { %v3685_v30 = vpop.f32.mrf.mxu1 }
 0x3b4   : > { %v3686_v6 = vadd.f32 %v4974_v34, %v3685_v30 }
 0x3b5   : > { %v5197_v35 = vpop.f32.mrf.mxu1 }
 0x3b6   : > { %v3718_v52 = vpack.c.bf16 %v3686_v6, %v3683_v26 }
 0x3b8   : > { %5225 = vmatmul.mubr.msk.bf16.gmra.mxu0 %vm3324_vm1, %v3718_v52 }
 0x3b9   : > { %v3690_v25 = vpop.f32.mrf.mxu1  ;;  %5228 = vmatprep.mubr.msk.bf16.mxu0 %vm5808_vm9, %v8099_v44 }
 0x3ba   : > { %v3691_v14 = vadd.f32 %v4974_v34, %v3690_v25 }
 0x3bb   : > { %v5200_v59 = vpop.f32.mrf.mxu1 }
 0x3bd   : > { %v3693_v40 = vpop.f32.mrf.mxu1 }
 0x3be   : > { %v3694_v38 = vadd.f32 %v4974_v34, %v3693_v40 }
 0x3bf   : > { %v5201_v18 = vpop.f32.mrf.mxu1 }
 0x3c0   : > { %v3719_v15 = vpack.c.bf16 %v3694_v38, %v3691_v14 }
 0x3c1   : > { %v3698_v45 = vpop.f32.mrf.mxu1 }
 0x3c2   : > { %5229 = vmatmul.mubr.msk.bf16.gmra.mxu0 %vm3324_vm1, %v3719_v15  ;;  %v3699_v24 = vadd.f32 %v4974_v34, %v3698_v45 }
 0x3c3   : > { %v5204_v57 = vpop.f32.mrf.mxu1  ;;  %5232 = vmatprep.mubr.msk.bf16.mxu0 %vm5808_vm9, %v8099_v44 }
 0x3c4   : > { %v3720_v54 = vpack.c.bf16 %v3699_v24, %v3699_v24 }
 0x3c5   : > { %v3701_v41 = vpop.f32.mrf.mxu1 }
 0x3c7   : > { %v5205_v31 = vpop.f32.mrf.mxu1 }
 0x3c9   : > { %v3907_v2 = vpop.f32.mrf.mxu1 }
 0x3ca   : > { %5233 = vmatmul.mubr.msk.bf16.gmra.mxu0 %vm3324_vm1, %v3720_v54 }
 0x3cb   : > { %v5242_v56 = vpop.f32.mrf.mxu1  ;;  %5272 = vmatprep.mubr.msk.bf16.mxu0 %vm5808_vm9, %v8099_v44 }
 0x3cd   : > { %v3910_v7 = vpop.f32.mrf.mxu1 }
 0x3cf   : > { %v5243_v11 = vpop.f32.mrf.mxu1 }
 0x3d1   : > { %v3915_v17 = vpop.f32.mrf.mxu1 }
 0x3d3   : > { %v5246_v29 = vpop.f32.mrf.mxu1 }
 0x3d5   : > { %v3918_v42 = vpop.f32.mrf.mxu1 }
 0x3d7   : > { %v5247_v39 = vpop.f32.mrf.mxu1 }
 0x3d9   : > { %v3923_v21 = vpop.f32.mrf.mxu1 }
 0x3db   : > { %v5250_v13 = vpop.f32.mrf.mxu1 }
 0x3dd   : > { %v7561_v49 = vpop.f32.mrf.mxu1 }
 0x3df   : > { %v5251_v61 = vpop.f32.mrf.mxu1 }
 0x3e1   : > { %v7563_v51 = vpop.f32.mrf.mxu1 }
 0x3e3   : > { %v5254_v8 = vpop.f32.mrf.mxu1 }
 0x3e5   : > { %v7565_v34 = vpop.f32.mrf.mxu1 }
 0x3e7   : > { %v5255_v33 = vpop.f32.mrf.mxu1 }
 0x3e9   : > { %v7567_v36 = vpop.f32.mrf.mxu1 }
 0x3eb   : > { %v5258_v37 = vpop.f32.mrf.mxu1 }
 0x3ed   : > { %v7572_v3 = vpop.f32.mrf.mxu1 }
 0x3ef   : > { %v5259_v23 = vpop.f32.mrf.mxu1 }
 0x3f1   : > { %v7575_v19 = vpop.f32.mrf.mxu1 }
 0x3f3   : > { %v5262_v4 = vpop.f32.mrf.mxu1 }
 0x3f5   : > { %v7577_v48 = vpop.f32.mrf.mxu1 }
 0x3f7   : > { %v5263_v22 = vpop.f32.mrf.mxu1 }
 0x3f9   : > { %v7579_v28 = vpop.f32.mrf.mxu1 }
 0x3fb   : > { %v5266_v60 = vpop.f32.mrf.mxu1 }
 0x3fd   : > { %v3958_v55 = vpop.f32.mrf.mxu1 }
 0x3ff   : > { %v5267_v46 = vpop.f32.mrf.mxu1 }
 0x44b   : > { %v3784_v32 = vpop.f32.mrf.mxu0 }
 0x44c   : > { %v3908_v20 = vadd.f32 %v3907_v2, %v3784_v32 }
 0x44d   : > { %v5210_v50 = vpop.f32.mrf.mxu0 }
 0x44e   : > { %v7591_v1 = vadd.f32 %v7588_v9, %v3908_v20 }
 0x44f   : > { %v3787_v5 = vpop.f32.mrf.mxu0 }
 0x450   : > { %v3981_v27 = vmin.f32 %v7591_v1, 20.0  ;;  %v3911_v12 = vadd.f32 %v3910_v7, %v3787_v5 }
 0x451   : > { %v5211_v10 = vpop.f32.mrf.mxu0 }
 0x452   : > { %v3994_v62 = vmul.f32 1.442695, %v3981_v27  ;;  %v7595_v0 = vadd.f32 %v7588_v9, %v3911_v12 }
 0x454   : > { %5580 = vpow2.f32 %v3994_v62  ;;  %v3982_v16 = vmin.f32 %v7595_v0, 20.0 }
 0x456   : > { %v3996_v43 = vmul.f32 1.442695, %v3982_v16 }
 0x458   : > { %5582 = vpow2.f32 %v3996_v43 }
 0x459   : > { %v3792_v47 = vpop.f32.mrf.mxu0 }
 0x45a   : > { %v3916_v30 = vadd.f32 %v3915_v17, %v3792_v47 }
 0x45b   : > { %v5214_v26 = vpop.f32.mrf.mxu0 }
 0x45c   : > { %v7599_v6 = vadd.f32 %v7588_v9, %v3916_v30 }
 0x45d   : > { %v3795_v35 = vpop.f32.mrf.mxu0 }
 0x45e   : > { %v3983_v52 = vmin.f32 %v7599_v6, 20.0  ;;  %v3919_v25 = vadd.f32 %v3918_v42, %v3795_v35 }
 0x45f   : > { %v5215_v59 = vpop.f32.mrf.mxu0 }
 0x460   : > { %v3998_v40 = vmul.f32 1.442695, %v3983_v52  ;;  %v7603_v14 = vadd.f32 %v7588_v9, %v3919_v25 }
 0x461   : > { %v5581_v38 = vpop.eup %5580 }
 0x462   : > { %5584 = vpow2.f32 %v3998_v40  ;;  %v3984_v18 = vmin.f32 %v7603_v14, 20.0  ;;  %v4020_v15 = vadd.f32 1.0, %v5581_v38 }
 0x464   : > { %v4000_v45 = vmul.f32 1.442695, %v3984_v18  ;;  %v4033_v57 = vmul.f32 %v4020_v15, %v4020_v15 }
 0x465   : > { %v3800_v24 = vpop.f32.mrf.mxu0  ;;  %v5583_v41 = vpop.eup %5582 }
 0x466   : > { %5586 = vpow2.f32 %v4000_v45  ;;  %v3924_v31 = vadd.f32 %v3923_v21, %v3800_v24  ;;  %v4072_v54 = vadd.f32 1.0, %v4033_v57  ;;  %v4021_v2 = vadd.f32 1.0, %v5583_v41 }
 0x467   : > { %v5218_v56 = vpop.f32.mrf.mxu0  ;;  %v5002_v55 = vadd.f32 -1.0, %v4033_v57 }
 0x468   : > { %v7607_v7 = vadd.f32 %v7588_v9, %v3924_v31  ;;  %v4034_v11 = vmul.f32 %v4021_v2, %v4021_v2  ;;  %5588 = vrcp.f32 %v4072_v54 }
 0x469   : > { %v3803_v58 = vpop.f32.mrf.mxu0  ;;  %v4059_v16 = vmul.f32 %v5002_v55, %v7591_v1 }
 0x46a   : > { %v3985_v17 = vmin.f32 %v7607_v7, 20.0  ;;  %v3927_v29 = vadd.f32 %v7561_v49, %v3803_v58  ;;  %v4073_v42 = vadd.f32 1.0, %v4034_v11  ;;  %v5003_v20 = vadd.f32 -1.0, %v4034_v11 }
 0x46b   : > { %v5219_v39 = vpop.f32.mrf.mxu0 }
 0x46c   : > { %v4002_v13 = vmul.f32 1.442695, %v3985_v17  ;;  %v7612_v61 = vadd.f32 %v7588_v9, %v3927_v29  ;;  %5590 = vrcp.f32 %v4073_v42  ;;  %v4060_v30 = vmul.f32 %v5003_v20, %v7595_v0 }
 0x46e   : > { %5592 = vpow2.f32 %v4002_v13  ;;  %v3986_v21 = vmin.f32 %v7612_v61, 20.0 }
 0x46f   : > { %v5585_v8 = vpop.eup %5584  ;;  %v3808_v53 = vpop.f32.mrf.mxu0 }
 0x470   : > { %v4022_v33 = vadd.f32 1.0, %v5585_v8  ;;  %v4004_v37 = vmul.f32 1.442695, %v3986_v21  ;;  %v3932_v23 = vadd.f32 %v7563_v51, %v3808_v53 }
 0x471   : > { %v5222_v49 = vpop.f32.mrf.mxu0 }
 0x472   : > { %v4035_v4 = vmul.f32 %v4022_v33, %v4022_v33  ;;  %5594 = vpow2.f32 %v4004_v37  ;;  %v7617_v60 = vadd.f32 %v7588_v9, %v3932_v23 }
 0x473   : > { %v5587_v22 = vpop.eup %5586  ;;  %v3811_v32 = vpop.f32.mrf.mxu0 }
 0x474   : > { %v4074_v46 = vadd.f32 1.0, %v4035_v4  ;;  %v4023_v63 = vadd.f32 1.0, %v5587_v22  ;;  %v3987_v50 = vmin.f32 %v7617_v60, 20.0  ;;  %v3935_v5 = vadd.f32 %v7565_v34, %v3811_v32 }
 0x475   : > { %v5223_v12 = vpop.f32.mrf.mxu0  ;;  %v5589_v62 = vpop.eup %5588  ;;  %v5004_v58 = vadd.f32 -1.0, %v4035_v4 }
 0x476   : > { %v4036_v27 = vmul.f32 %v4023_v63, %v4023_v63  ;;  %v4006_v10 = vmul.f32 1.442695, %v3987_v50  ;;  %v7622_v51 = vadd.f32 %v7588_v9, %v3935_v5  ;;  %5596 = vrcp.f32 %v4074_v46 }
 0x477   : > { %v4098_v59 = vmul.f32 %v5589_v62, %v4059_v16  ;;  %v4061_v53 = vmul.f32 %v5004_v58, %v7599_v6 }
 0x478   : > { %v4075_v43 = vadd.f32 1.0, %v4036_v27  ;;  %v3816_v47 = vpop.f32.mrf.mxu0  ;;  %5598 = vpow2.f32 %v4006_v10  ;;  %v3988_v26 = vmin.f32 %v7622_v51, 20.0  ;;  %v5005_v17 = vadd.f32 -1.0, %v4036_v27 }
 0x479   : > { %v3940_v35 = vadd.f32 %v7567_v36, %v3816_v47  ;;  %v5591_v34 = vpop.eup %5590 }
 0x47a   : > { %5600 = vrcp.f32 %v4075_v43  ;;  %v5226_v52 = vpop.f32.mrf.mxu0  ;;  %v4099_v40 = vmul.f32 %v5591_v34, %v4060_v30  ;;  %v4008_v38 = vmul.f32 1.442695, %v3988_v26  ;;  %v4062_v23 = vmul.f32 %v5005_v17, %v7603_v14 }
 0x47b   : > { %v5593_v25 = vpop.eup %5592  ;;  %v7629_v18 = vadd.f32 %v7588_v9, %v3940_v35 }
 0x47c   : > { %v4024_v1 = vadd.f32 1.0, %v5593_v25  ;;  %v3819_v15 = vpop.f32.mrf.mxu0  ;;  %v4111_v45 = vpack.c.bf16 %v4099_v40, %v4098_v59  ;;  %5602 = vpow2.f32 %v4008_v38 }
 0x47d   : > { %v3989_v0 = vmin.f32 %v7629_v18, 20.0  ;;  %v3943_v57 = vadd.f32 %v7572_v3, %v3819_v15 }
 0x47e   : > { %v4037_v24 = vmul.f32 %v4024_v1, %v4024_v1  ;;  %v5227_v36 = vpop.f32.mrf.mxu0  ;;  %5273 = vmatmul.mubr.msk.bf16.vlgmr.msra.gmra.mxu0 %vm3594_vm10, %v4111_v45 }
 0x47f   : > { %v5595_v41 = vpop.eup %5594  ;;  %v4010_v31 = vmul.f32 1.442695, %v3989_v0  ;;  %v7634_v54 = vadd.f32 %v7588_v9, %v3943_v57  ;;  %5276 = vmatprep.mubr.msk.bf16.mxu0 %vm5808_vm9, %v8099_v44 }
 0x480   : > { %v4076_v2 = vadd.f32 1.0, %v4037_v24  ;;  %v4025_v56 = vadd.f32 1.0, %v5595_v41  ;;  %v5006_v30 = vadd.f32 -1.0, %v4037_v24 }
 0x481   : > { %5604 = vpow2.f32 %v4010_v31  ;;  %v3990_v11 = vmin.f32 %v7634_v54, 20.0 }
 0x482   : > { %v4038_v3 = vmul.f32 %v4025_v56, %v4025_v56  ;;  %v3824_v29 = vpop.f32.mrf.mxu0  ;;  %5606 = vrcp.f32 %v4076_v2  ;;  %v4063_v45 = vmul.f32 %v5006_v30, %v7607_v7 }
 0x483   : > { %v4012_v42 = vmul.f32 1.442695, %v3990_v11  ;;  %v3948_v39 = vadd.f32 %v7575_v19, %v3824_v29  ;;  %v5597_v8 = vpop.eup %5596 }
 0x484   : > { %v4077_v13 = vadd.f32 1.0, %v4038_v3  ;;  %v5230_v21 = vpop.f32.mrf.mxu0  ;;  %v4100_v46 = vmul.f32 %v5597_v8, %v4061_v53  ;;  %v5007_v26 = vadd.f32 -1.0, %v4038_v3 }
 0x485   : > { %5608 = vpow2.f32 %v4012_v42  ;;  %v7642_v33 = vadd.f32 %v7588_v9, %v3948_v39  ;;  %v5599_v37 = vpop.eup %5598 }
 0x486   : > { %5610 = vrcp.f32 %v4077_v13  ;;  %v3827_v4 = vpop.f32.mrf.mxu0  ;;  %v4026_v22 = vadd.f32 1.0, %v5599_v37  ;;  %v4064_v0 = vmul.f32 %v5007_v26, %v7612_v61 }
 0x487   : > { %v5601_v49 = vpop.eup %5600  ;;  %v3991_v55 = vmin.f32 %v7642_v33, 20.0  ;;  %v3951_v19 = vadd.f32 %v7577_v48, %v3827_v4 }
 0x488   : > { %v4101_v63 = vmul.f32 %v5601_v49, %v4062_v23  ;;  %v5231_v32 = vpop.f32.mrf.mxu0  ;;  %v4039_v20 = vmul.f32 %v4026_v22, %v4026_v22 }
 0x489   : > { %v4014_v50 = vmul.f32 1.442695, %v3991_v55  ;;  %v7649_v5 = vadd.f32 %v7588_v9, %v3951_v19  ;;  %v5603_v27 = vpop.eup %5602 }
 0x48a   : > { %v3832_v6 = vpop.f32.mrf.mxu0  ;;  %v4112_v12 = vpack.c.bf16 %v4101_v63, %v4100_v46  ;;  %v4078_v14 = vadd.f32 1.0, %v4039_v20  ;;  %v4027_v10 = vadd.f32 1.0, %v5603_v27  ;;  %v5008_v17 = vadd.f32 -1.0, %v4039_v20 }
 0x48b   : > { %5612 = vpow2.f32 %v4014_v50  ;;  %v3992_v62 = vmin.f32 %v7649_v5, 20.0  ;;  %v3956_v16 = vadd.f32 %v7579_v28, %v3832_v6 }
 0x48c   : > { %v5234_v43 = vpop.f32.mrf.mxu0  ;;  %5277 = vmatmul.mubr.msk.bf16.gmra.mxu0 %vm3594_vm10, %v4112_v12  ;;  %v4040_v48 = vmul.f32 %v4027_v10, %v4027_v10  ;;  %5614 = vrcp.f32 %v4078_v14  ;;  %v4065_v39 = vmul.f32 %v5008_v17, %v7617_v60 }
 0x48d   : > { %5280 = vmatprep.mubr.msk.bf16.mxu0 %vm5808_vm9, %v8099_v44  ;;  %v4016_v35 = vmul.f32 1.442695, %v3992_v62  ;;  %v7657_v34 = vadd.f32 %v7588_v9, %v3956_v16 }
 0x48e   : > { %v5605_v47 = vpop.eup %5604  ;;  %v3835_v52 = vpop.f32.mrf.mxu0  ;;  %v4079_v25 = vadd.f32 1.0, %v4040_v48  ;;  %v5009_v3 = vadd.f32 -1.0, %v4040_v48 }
 0x48f   : > { %v4028_v59 = vadd.f32 1.0, %v5605_v47  ;;  %5616 = vpow2.f32 %v4016_v35  ;;  %v3993_v28 = vmin.f32 %v7657_v34, 20.0  ;;  %v5607_v38 = vpop.eup %5606 }
 0x490   : > { %v5235_v40 = vpop.f32.mrf.mxu0  ;;  %5618 = vrcp.f32 %v4079_v25  ;;  %v4102_v41 = vmul.f32 %v5607_v38, %v4063_v45  ;;  %v4066_v13 = vmul.f32 %v5009_v3, %v7622_v51 }
 0x491   : > { %v4041_v1 = vmul.f32 %v4028_v59, %v4028_v59  ;;  %v4018_v57 = vmul.f32 1.442695, %v3993_v28 }
 0x492   : > { %v5609_v15 = vpop.eup %5608 }
 0x493   : > { %v5611_v24 = vpop.eup %5610  ;;  %v4080_v9 = vadd.f32 1.0, %v4041_v1  ;;  %v4029_v36 = vadd.f32 1.0, %v5609_v15  ;;  %5620 = vpow2.f32 %v4018_v57  ;;  %v5010_v22 = vadd.f32 -1.0, %v4041_v1 }
 0x494   : > { %v4103_v31 = vmul.f32 %v5611_v24, %v4064_v0 }
 0x495   : > { %v4042_v2 = vmul.f32 %v4029_v36, %v4029_v36  ;;  %5622 = vrcp.f32 %v4080_v9  ;;  %v4067_v51 = vmul.f32 %v5010_v22, %v7629_v18 }
 0x496   : > { %v4113_v56 = vpack.c.bf16 %v4103_v31, %v4102_v41 }
 0x497   : > { %v4081_v11 = vadd.f32 1.0, %v4042_v2  ;;  %v5011_v55 = vadd.f32 -1.0, %v4042_v2 }
 0x498   : > { %v5613_v58 = vpop.eup %5612  ;;  %5281 = vmatmul.mubr.msk.bf16.gmra.mxu0 %vm3594_vm10, %v4113_v56 }
 0x499   : > { %5624 = vrcp.f32 %v4081_v11  ;;  %v4030_v7 = vadd.f32 1.0, %v5613_v58  ;;  %5284 = vmatprep.mubr.msk.bf16.mxu0 %vm5808_vm9, %v8099_v44  ;;  %v5615_v29 = vpop.eup %5614  ;;  %v4068_v20 = vmul.f32 %v5011_v55, %v7634_v54 }
 0x49a   : > { %v4104_v53 = vmul.f32 %v5615_v29, %v4065_v39 }
 0x49b   : > { %v4043_v61 = vmul.f32 %v4030_v7, %v4030_v7 }
 0x49c   : > { %v5617_v42 = vpop.eup %5616 }
 0x49d   : > { %v5619_v21 = vpop.eup %5618  ;;  %v4082_v8 = vadd.f32 1.0, %v4043_v61  ;;  %v4031_v37 = vadd.f32 1.0, %v5617_v42  ;;  %v5012_v10 = vadd.f32 -1.0, %v4043_v61 }
 0x49e   : > { %v4105_v23 = vmul.f32 %v5619_v21, %v4066_v13 }
 0x49f   : > { %v4044_v4 = vmul.f32 %v4031_v37, %v4031_v37  ;;  %5626 = vrcp.f32 %v4082_v8  ;;  %v4069_v43 = vmul.f32 %v5012_v10, %v7642_v33  ;;  %v5475_v33 = vld [vmem:[%s7932_s11] sm:$0xff]  }
 0x4a0   : > { %v5621_v49 = vpop.eup %5620  ;;  %v4114_v19 = vpack.c.bf16 %v4105_v23, %v4104_v53  ;;  %5303 = vmatpush3.bf16.msra.mxu1 %v5475_v33 }
 0x4a1   : > { %v4083_v46 = vadd.f32 1.0, %v4044_v4  ;;  %v4032_v63 = vadd.f32 1.0, %v5621_v49  ;;  %v5013_v62 = vadd.f32 -1.0, %v4044_v4 }
 0x4a2   : > { %5285 = vmatmul.mubr.msk.bf16.gmra.mxu0 %vm3594_vm10, %v4114_v19  ;;  %v5623_v32 = vpop.eup %5622 }
 0x4a3   : > { %5628 = vrcp.f32 %v4083_v46  ;;  %v4045_v60 = vmul.f32 %v4032_v63, %v4032_v63  ;;  %5288 = vmatprep.mubr.msk.bf16.mxu0 %vm5808_vm9, %v8099_v44  ;;  %v4106_v6 = vmul.f32 %v5623_v32, %v4067_v51  ;;  %v4070_v18 = vmul.f32 %v5013_v62, %v7649_v5  ;;  %v7690_v5 = vld [vmem:[%s7931_s10] ss:$0 sm:$0xff] }
 0x4a5   : > { %v4084_v27 = vadd.f32 1.0, %v4045_v60  ;;  %v5014_v30 = vadd.f32 -1.0, %v4045_v60 }
 0x4a6   : > { %v5625_v50 = vpop.eup %5624 }
 0x4a7   : > { %v4107_v12 = vmul.f32 %v5625_v50, %v4068_v20  ;;  %5630 = vrcp.f32 %v4084_v27  ;;  %v4071_v52 = vmul.f32 %v5014_v30, %v7657_v34 }
 0x4a9   : > { %v4115_v14 = vpack.c.bf16 %v4107_v12, %v4106_v6 }
 0x4ab   : > { %5289 = vmatmul.mubr.msk.bf16.gmra.mxu0 %vm3594_vm10, %v4115_v14 }
 0x4ac   : > { %5292 = vmatprep.mubr.msk.bf16.mxu0 %vm5808_vm9, %v8099_v44  ;;  %v5627_v16 = vpop.eup %5626 }
 0x4ad   : > { %v4108_v54 = vmul.f32 %v5627_v16, %v4069_v43 }
 0x4b0   : > { %v5629_v48 = vpop.eup %5628 }
 0x4b1   : > { %v4109_v47 = vmul.f32 %v5629_v48, %v4070_v18 }
 0x4b3   : > { %v4116_v26 = vpack.c.bf16 %v4109_v47, %v4108_v54 }
 0x4b4   : > { %v5631_v35 = vpop.eup %5630 }
 0x4b5   : > { %5293 = vmatmul.mubr.msk.bf16.gmra.mxu0 %vm3594_vm10, %v4116_v26  ;;  %v4110_v25 = vmul.f32 %v5631_v35, %v4071_v52 }
 0x4b6   : > { %5296 = vmatprep.mubr.msk.bf16.mxu0 %vm5808_vm9, %v8099_v44 }
 0x4b7   : > { %v4117_v59 = vpack.c.bf16 %v4110_v25, %v4110_v25 }
 0x4bd   : > { %5297 = vmatmul.mubr.msk.bf16.gmra.mxu0 %vm3594_vm10, %v4117_v59 }
 0x4be   : > { %5358 = vmatprep.mubr.msk.f32.mxu0 %vm5808_vm9, %v8099_v44 }
 0x53e   : > { %v4196_v34 = vpop.f32.mrf.mxu0 }
 0x53f   : > { %v7693_v28 = vadd.f32 %v7690_v5, %v4196_v34 }
 0x540   : > { %v5274_v40 = vpop.f32.mrf.mxu0 }
 0x541   : > { %v4250_v38 = vmin.f32 %v7693_v28, 20.0 }
 0x542   : > { %v4199_v1 = vpop.f32.mrf.mxu0 }
 0x543   : > { %v4263_v15 = vmul.f32 1.442695, %v4250_v38  ;;  %v4200_v45 = vadd.f32 %v7690_v5, %v4199_v1 }
 0x544   : > { %v5275_v0 = vpop.f32.mrf.mxu0 }
 0x545   : > { %5632 = vpow2.f32 %v4263_v15  ;;  %v4251_v57 = vmin.f32 %v4200_v45, 20.0 }
 0x547   : > { %v4265_v24 = vmul.f32 1.442695, %v4251_v57 }
 0x549   : > { %5634 = vpow2.f32 %v4265_v24 }
 0x54c   : > { %v4204_v9 = vpop.f32.mrf.mxu0 }
 0x54d   : > { %v7698_v36 = vadd.f32 %v7690_v5, %v4204_v9 }
 0x54e   : > { %v5278_v41 = vpop.f32.mrf.mxu0 }
 0x54f   : > { %v4252_v31 = vmin.f32 %v7698_v36, 20.0 }
 0x550   : > { %v4207_v2 = vpop.f32.mrf.mxu0 }
 0x551   : > { %v4267_v56 = vmul.f32 1.442695, %v4252_v31  ;;  %v7702_v11 = vadd.f32 %v7690_v5, %v4207_v2 }
 0x552   : > { %v5279_v58 = vpop.f32.mrf.mxu0  ;;  %v5633_v17 = vpop.eup %5632 }
 0x553   : > { %5636 = vpow2.f32 %v4267_v56  ;;  %v4253_v3 = vmin.f32 %v7702_v11, 20.0  ;;  %v4289_v7 = vadd.f32 1.0, %v5633_v17 }
 0x555   : > { %v4269_v61 = vmul.f32 1.442695, %v4253_v3  ;;  %v4302_v29 = vmul.f32 %v4289_v7, %v4289_v7 }
 0x556   : > { %v5635_v42 = vpop.eup %5634 }
 0x557   : > { %5638 = vpow2.f32 %v4269_v61  ;;  %v4341_v39 = vadd.f32 1.0, %v4302_v29  ;;  %v4290_v13 = vadd.f32 1.0, %v5635_v42  ;;  %v5025_v10 = vadd.f32 -1.0, %v4302_v29 }
 0x558   : > { %v4212_v21 = vpop.f32.mrf.mxu0 }
 0x559   : > { %v7706_v8 = vadd.f32 %v7690_v5, %v4212_v21  ;;  %v4303_v37 = vmul.f32 %v4290_v13, %v4290_v13  ;;  %5640 = vrcp.f32 %v4341_v39  ;;  %v4328_v35 = vmul.f32 %v5025_v10, %v7693_v28 }
 0x55a   : > { %v5282_v53 = vpop.f32.mrf.mxu0 }
 0x55b   : > { %v4254_v23 = vmin.f32 %v7706_v8, 20.0  ;;  %v4342_v4 = vadd.f32 1.0, %v4303_v37  ;;  %v5026_v62 = vadd.f32 -1.0, %v4303_v37 }
 0x55c   : > { %v4215_v49 = vpop.f32.mrf.mxu0 }
 0x55d   : > { %v4271_v22 = vmul.f32 1.442695, %v4254_v23  ;;  %v7710_v55 = vadd.f32 %v7690_v5, %v4215_v49  ;;  %5642 = vrcp.f32 %v4342_v4  ;;  %v4329_v52 = vmul.f32 %v5026_v62, %v4200_v45 }
 0x55e   : > { %v5283_v19 = vpop.f32.mrf.mxu0 }
 0x55f   : > { %5644 = vpow2.f32 %v4271_v22  ;;  %v4255_v46 = vmin.f32 %v7710_v55, 20.0 }
 0x560   : > { %v5637_v63 = vpop.eup %5636 }
 0x561   : > { %v4291_v32 = vadd.f32 1.0, %v5637_v63  ;;  %v4273_v60 = vmul.f32 1.442695, %v4255_v46 }
 0x562   : > { %v4220_v20 = vpop.f32.mrf.mxu0 }
 0x563   : > { %v4304_v51 = vmul.f32 %v4291_v32, %v4291_v32  ;;  %5646 = vpow2.f32 %v4273_v60  ;;  %v7714_v27 = vadd.f32 %v7690_v5, %v4220_v20 }
 0x564   : > { %v5639_v50 = vpop.eup %5638  ;;  %v5286_v14 = vpop.f32.mrf.mxu0 }
 0x565   : > { %v4343_v6 = vadd.f32 1.0, %v4304_v51  ;;  %v4292_v12 = vadd.f32 1.0, %v5639_v50  ;;  %v4256_v16 = vmin.f32 %v7714_v27, 20.0  ;;  %v5027_v7 = vadd.f32 -1.0, %v4304_v51 }
 0x566   : > { %v4223_v18 = vpop.f32.mrf.mxu0  ;;  %v5641_v47 = vpop.eup %5640 }
 0x567   : > { %v4305_v43 = vmul.f32 %v4292_v12, %v4292_v12  ;;  %v4275_v48 = vmul.f32 1.442695, %v4256_v16  ;;  %v7718_v54 = vadd.f32 %v7690_v5, %v4223_v18  ;;  %5648 = vrcp.f32 %v4343_v6 }
 0x568   : > { %v5287_v26 = vpop.f32.mrf.mxu0  ;;  %v4367_v40 = vmul.f32 %v5641_v47, %v4328_v35  ;;  %v4330_v53 = vmul.f32 %v5027_v7, %v7698_v36 }
 0x569   : > { %v4344_v30 = vadd.f32 1.0, %v4305_v43  ;;  %5650 = vpow2.f32 %v4275_v48  ;;  %v4257_v25 = vmin.f32 %v7718_v54, 20.0  ;;  %v5028_v61 = vadd.f32 -1.0, %v4305_v43 }
 0x56a   : > { %v5643_v59 = vpop.eup %5642 }
 0x56b   : > { %5652 = vrcp.f32 %v4344_v30  ;;  %v4228_v33 = vpop.f32.mrf.mxu0  ;;  %v4368_v38 = vmul.f32 %v5643_v59, %v4329_v52  ;;  %v4277_v1 = vmul.f32 1.442695, %v4257_v25  ;;  %v4331_v23 = vmul.f32 %v5028_v61, %v7702_v11 }
 0x56c   : > { %v5645_v34 = vpop.eup %5644  ;;  %v7723_v15 = vadd.f32 %v7690_v5, %v4228_v33 }
 0x56d   : > { %v4293_v0 = vadd.f32 1.0, %v5645_v34  ;;  %v5290_v57 = vpop.f32.mrf.mxu0  ;;  %v4380_v24 = vpack.c.bf16 %v4368_v38, %v4367_v40  ;;  %5654 = vpow2.f32 %v4277_v1 }
 0x56e   : > { %v4258_v28 = vmin.f32 %v7723_v15, 20.0 }
 0x56f   : > { %v4306_v45 = vmul.f32 %v4293_v0, %v4293_v0  ;;  %v4231_v9 = vpop.f32.mrf.mxu0  ;;  %5305 = vmatmul.mubr.msk.bf16.vlgmr.msra.gmra.mxu1 %vm3594_vm10, %v4380_v24 }
 0x570   : > { %v5647_v41 = vpop.eup %5646  ;;  %v4279_v31 = vmul.f32 1.442695, %v4258_v28  ;;  %v7727_v2 = vadd.f32 %v7690_v5, %v4231_v9  ;;  %5308 = vmatprep.mubr.msk.bf16.mxu1 %vm5808_vm9, %v8099_v44 }
 0x571   : > { %v4345_v56 = vadd.f32 1.0, %v4306_v45  ;;  %v4294_v58 = vadd.f32 1.0, %v5647_v41  ;;  %v5291_v17 = vpop.f32.mrf.mxu0  ;;  %v5029_v18 = vadd.f32 -1.0, %v4306_v45 }
 0x572   : > { %5656 = vpow2.f32 %v4279_v31  ;;  %v4259_v3 = vmin.f32 %v7727_v2, 20.0 }
 0x573   : > { %v4307_v29 = vmul.f32 %v4294_v58, %v4294_v58  ;;  %5658 = vrcp.f32 %v4345_v56  ;;  %v4332_v38 = vmul.f32 %v5029_v18, %v7706_v8 }
 0x574   : > { %v4281_v42 = vmul.f32 1.442695, %v4259_v3  ;;  %v5649_v13 = vpop.eup %5648 }
 0x575   : > { %v4346_v39 = vadd.f32 1.0, %v4307_v29  ;;  %v4236_v21 = vpop.f32.mrf.mxu0  ;;  %v4369_v46 = vmul.f32 %v5649_v13, %v4330_v53  ;;  %v5030_v48 = vadd.f32 -1.0, %v4307_v29 }
 0x576   : > { %5660 = vpow2.f32 %v4281_v42  ;;  %v5651_v37 = vpop.eup %5650  ;;  %v7736_v4 = vadd.f32 %v7690_v5, %v4236_v21 }
 0x577   : > { %5662 = vrcp.f32 %v4346_v39  ;;  %v4295_v22 = vadd.f32 1.0, %v5651_v37  ;;  %v5294_v19 = vpop.f32.mrf.mxu0  ;;  %v4333_v1 = vmul.f32 %v5030_v48, %v7710_v55 }
 0x578   : > { %v5653_v49 = vpop.eup %5652  ;;  %v4260_v32 = vmin.f32 %v7736_v4, 20.0 }
 0x579   : > { %v4370_v63 = vmul.f32 %v5653_v49, %v4331_v23  ;;  %v4308_v60 = vmul.f32 %v4295_v22, %v4295_v22  ;;  %v4239_v51 = vpop.f32.mrf.mxu0 }
 0x57a   : > { %v5655_v20 = vpop.eup %5654  ;;  %v4283_v6 = vmul.f32 1.442695, %v4260_v32  ;;  %v7740_v36 = vadd.f32 %v7690_v5, %v4239_v51 }
 0x57b   : > { %v4381_v50 = vpack.c.bf16 %v4370_v63, %v4369_v46  ;;  %v4347_v11 = vadd.f32 1.0, %v4308_v60  ;;  %v4296_v12 = vadd.f32 1.0, %v5655_v20  ;;  %v5295_v14 = vpop.f32.mrf.mxu0  ;;  %v5031_v17 = vadd.f32 -1.0, %v4308_v60 }
 0x57c   : > { %5664 = vpow2.f32 %v4283_v6  ;;  %v4261_v10 = vmin.f32 %v7740_v36, 20.0 }
 0x57d   : > { %5309 = vmatmul.mubr.msk.bf16.gmra.mxu1 %vm3594_vm10, %v4381_v50  ;;  %v4309_v62 = vmul.f32 %v4296_v12, %v4296_v12  ;;  %v4244_v16 = vpop.f32.mrf.mxu0  ;;  %5666 = vrcp.f32 %v4347_v11  ;;  %v4334_v29 = vmul.f32 %v5031_v17, %v7714_v27 }
 0x57e   : > { %5312 = vmatprep.mubr.msk.bf16.mxu1 %vm5808_vm9, %v8099_v44  ;;  %v4285_v47 = vmul.f32 1.442695, %v4261_v10  ;;  %v7747_v30 = vadd.f32 %v7690_v5, %v4244_v16 }
 0x57f   : > { %v5657_v43 = vpop.eup %5656  ;;  %v4348_v26 = vadd.f32 1.0, %v4309_v62  ;;  %v5298_v52 = vpop.f32.mrf.mxu0  ;;  %v5032_v3 = vadd.f32 -1.0, %v4309_v62 }
 0x580   : > { %v4297_v35 = vadd.f32 1.0, %v5657_v43  ;;  %5668 = vpow2.f32 %v4285_v47  ;;  %v4262_v25 = vmin.f32 %v7747_v30, 20.0  ;;  %v5659_v59 = vpop.eup %5658 }
 0x581   : > { %5670 = vrcp.f32 %v4348_v26  ;;  %v4247_v34 = vpop.f32.mrf.mxu0  ;;  %v4371_v45 = vmul.f32 %v5659_v59, %v4332_v38  ;;  %v4335_v42 = vmul.f32 %v5032_v3, %v7718_v54 }
 0x582   : > { %v4310_v33 = vmul.f32 %v4297_v35, %v4297_v35  ;;  %v4287_v0 = vmul.f32 1.442695, %v4262_v25 }
 0x583   : > { %v5661_v40 = vpop.eup %5660  ;;  %v5299_v28 = vpop.f32.mrf.mxu0 }
 0x584   : > { %v5663_v57 = vpop.eup %5662  ;;  %v4349_v5 = vadd.f32 1.0, %v4310_v33  ;;  %v4298_v24 = vadd.f32 1.0, %v5661_v40  ;;  %5672 = vpow2.f32 %v4287_v0  ;;  %v5033_v19 = vadd.f32 -1.0, %v4310_v33 }
 0x585   : > { %v4372_v9 = vmul.f32 %v5663_v57, %v4333_v1 }
 0x586   : > { %v4311_v41 = vmul.f32 %v4298_v24, %v4298_v24  ;;  %5674 = vrcp.f32 %v4349_v5  ;;  %v4336_v54 = vmul.f32 %v5033_v19, %v7723_v15  ;;  %v4650_v5 = vld [vmem:[#allocation2] sm:$0x1]  ;;  %v5809_v24 = vmov 0  }
 0x587   : > { %v4382_v31 = vpack.c.bf16 %v4372_v9, %v4371_v45  ;;  %5464 = vset.pattern.permute.xlu1 %v5809_v24  ;;  %5465 = vset.pattern.permute.xlu0 %v5809_v24 }
 0x588   : > { %v4350_v56 = vadd.f32 1.0, %v4311_v41  ;;  %v5034_v46 = vadd.f32 -1.0, %v4311_v41  ;;  %4653 = vperm.xlu1 %5464, %v4650_v5  }
 0x589   : > { %5313 = vmatmul.mubr.msk.bf16.gmra.mxu1 %vm3594_vm10, %v4382_v31  ;;  %v5665_v58 = vpop.eup %5664 }
 0x58a   : > { %5676 = vrcp.f32 %v4350_v56  ;;  %5316 = vmatprep.mubr.msk.bf16.mxu1 %vm5808_vm9, %v8099_v44  ;;  %v4299_v8 = vadd.f32 1.0, %v5665_v58  ;;  %v5667_v55 = vpop.eup %5666  ;;  %v4337_v51 = vmul.f32 %v5034_v46, %v7727_v2 }
 0x58b   : > { %v4373_v37 = vmul.f32 %v5667_v55, %v4334_v29 }
 0x58c   : > { %v4312_v7 = vmul.f32 %v4299_v8, %v4299_v8  ;;  %v7781_v8 = vld [vmem:[%s7933_s12] ss:$0 sm:$0xff] }
 0x58d   : > { %v5669_v61 = vpop.eup %5668 }
 0x58e   : > { %v5671_v39 = vpop.eup %5670  ;;  %v4351_v13 = vadd.f32 1.0, %v4312_v7  ;;  %v4300_v21 = vadd.f32 1.0, %v5669_v61  ;;  %v5035_v14 = vadd.f32 -1.0, %v4312_v7 }
 0x58f   : > { %v4374_v53 = vmul.f32 %v5671_v39, %v4335_v42 }
 0x590   : > { %v4313_v23 = vmul.f32 %v4300_v21, %v4300_v21  ;;  %5678 = vrcp.f32 %v4351_v13  ;;  %v4338_v16 = vmul.f32 %v5035_v14, %v7736_v4 }
 0x591   : > { %v5673_v49 = vpop.eup %5672  ;;  %v4383_v22 = vpack.c.bf16 %v4374_v53, %v4373_v37 }
 0x592   : > { %v4352_v63 = vadd.f32 1.0, %v4313_v23  ;;  %v4301_v32 = vadd.f32 1.0, %v5673_v49  ;;  %v5036_v10 = vadd.f32 -1.0, %v4313_v23 }
 0x593   : > { %5317 = vmatmul.mubr.msk.bf16.gmra.mxu1 %vm3594_vm10, %v4383_v22  ;;  %v5675_v60 = vpop.eup %5674 }
 0x594   : > { %5680 = vrcp.f32 %v4352_v63  ;;  %v4314_v27 = vmul.f32 %v4301_v32, %v4301_v32  ;;  %5320 = vmatprep.mubr.msk.bf16.mxu1 %vm5808_vm9, %v8099_v44  ;;  %v4375_v6 = vmul.f32 %v5675_v60, %v4336_v54  ;;  %v4339_v15 = vmul.f32 %v5036_v10, %v7740_v36 }
 0x596   : > { %v4353_v50 = vadd.f32 1.0, %v4314_v27  ;;  %v5037_v48 = vadd.f32 -1.0, %v4314_v27 }
 0x597   : > { %v5677_v20 = vpop.eup %5676 }
 0x598   : > { %v4376_v11 = vmul.f32 %v5677_v20, %v4337_v51  ;;  %5682 = vrcp.f32 %v4353_v50  ;;  %v4340_v35 = vmul.f32 %v5037_v48, %v7747_v30 }
 0x59a   : > { %v4384_v12 = vpack.c.bf16 %v4376_v11, %v4375_v6 }
 0x59c   : > { %5321 = vmatmul.mubr.msk.bf16.gmra.mxu1 %vm3594_vm10, %v4384_v12 }
 0x59d   : > { %5324 = vmatprep.mubr.msk.bf16.mxu1 %vm5808_vm9, %v8099_v44  ;;  %v5679_v62 = vpop.eup %5678 }
 0x59e   : > { %v4377_v2 = vmul.f32 %v5679_v62, %v4338_v16 }
 0x5a1   : > { %v5681_v43 = vpop.eup %5680 }
 0x5a2   : > { %v4378_v18 = vmul.f32 %v5681_v43, %v4339_v15 }
 0x5a4   : > { %v4385_v47 = vpack.c.bf16 %v4378_v18, %v4377_v2 }
 0x5a5   : > { %v5683_v26 = vpop.eup %5682 }
 0x5a6   : > { %5325 = vmatmul.mubr.msk.bf16.gmra.mxu1 %vm3594_vm10, %v4385_v47  ;;  %v4379_v52 = vmul.f32 %v5683_v26, %v4340_v35 }
 0x5a7   : > { %5328 = vmatprep.mubr.msk.bf16.mxu1 %vm5808_vm9, %v8099_v44  ;;  %vm4772_vm9 = vcmask 843776  }
 0x5a8   : > { %v4386_v25 = vpack.c.bf16 %v4379_v52, %v4379_v52 }
 0x5ae   : > { %5329 = vmatmul.mubr.msk.bf16.gmra.mxu1 %vm3594_vm10, %v4386_v25 }
 0x62f   : > { %v7772_v4 = vpop.f32.mrf.mxu1 }
 0x631   : > { %v5306_v36 = vpop.f32.mrf.mxu1 }
 0x633   : > { %v7774_v59 = vpop.f32.mrf.mxu1 }
 0x635   : > { %v5307_v33 = vpop.f32.mrf.mxu1 }
 0x63d   : > { %v7776_v34 = vpop.f32.mrf.mxu1 }
 0x63f   : > { %v5310_v40 = vpop.f32.mrf.mxu1 }
 0x641   : > { %v4476_v38 = vpop.f32.mrf.mxu1 }
 0x642   : > { %v7819_v26 = vadd.f32 %v7781_v8, %v4476_v38 }
 0x643   : > { %v5311_v30 = vpop.f32.mrf.mxu1 }
 0x649   : > { %v4481_v1 = vpop.f32.mrf.mxu1 }
 0x64a   : > { %v7815_v15 = vadd.f32 %v7781_v8, %v4481_v1  ;;  %v7824_v1 = vadd.f32 %v7781_v8, %v7776_v34 }
 0x64b   : > { %v5314_v0 = vpop.f32.mrf.mxu1 }
 0x64c   : > { %v4523_v35 = vmin.f32 %v7815_v15, 20.0  ;;  %v4522_v0 = vmin.f32 %v7819_v26, 20.0 }
 0x64d   : > { %v4484_v57 = vpop.f32.mrf.mxu1 }
 0x64e   : > { %v7811_v14 = vadd.f32 %v7781_v8, %v4484_v57  ;;  %v4540_v57 = vmul.f32 1.442695, %v4523_v35 }
 0x64f   : > { %v5315_v28 = vpop.f32.mrf.mxu1 }
 0x650   : > { %v4524_v43 = vmin.f32 %v7811_v14, 20.0 }
 0x652   : > { %v4542_v52 = vmul.f32 1.442695, %v4524_v43 }
 0x653   : > { %v4489_v45 = vpop.f32.mrf.mxu1 }
 0x654   : > { %v7807_v6 = vadd.f32 %v7781_v8, %v4489_v45 }
 0x655   : > { %v5318_v9 = vpop.f32.mrf.mxu1 }
 0x656   : > { %v4525_v10 = vmin.f32 %v7807_v6, 20.0  ;;  %v7829_v9 = vadd.f32 %v7781_v8, %v7774_v59 }
 0x657   : > { %v4492_v41 = vpop.f32.mrf.mxu1 }
 0x658   : > { %v7803_v60 = vadd.f32 %v7781_v8, %v4492_v41  ;;  %v4544_v2 = vmul.f32 1.442695, %v4525_v10  ;;  %v4521_v41 = vmin.f32 %v7824_v1, 20.0 }
 0x659   : > { %v5319_v31 = vpop.f32.mrf.mxu1 }
 0x65a   : > { %v4526_v11 = vmin.f32 %v7803_v60, 20.0  ;;  %v4538_v31 = vmul.f32 1.442695, %v4522_v0 }
 0x65c   : > { %v4497_v56 = vpop.f32.mrf.mxu1  ;;  %v4546_v62 = vmul.f32 1.442695, %v4526_v11 }
 0x65d   : > { %v7795_v53 = vadd.f32 %v7781_v8, %v4497_v56 }
 0x65e   : > { %v5322_v58 = vpop.f32.mrf.mxu1 }
 0x65f   : > { %v4527_v54 = vmin.f32 %v7795_v53, 20.0 }
 0x660   : > { %v4500_v17 = vpop.f32.mrf.mxu1 }
 0x661   : > { %v7787_v42 = vadd.f32 %v7781_v8, %v4500_v17  ;;  %v4548_v12 = vmul.f32 1.442695, %v4527_v54 }
 0x662   : > { %v5323_v3 = vpop.f32.mrf.mxu1 }
 0x663   : > { %v4528_v49 = vmin.f32 %v7787_v42, 20.0  ;;  %v7834_v3 = vadd.f32 %v7781_v8, %v7772_v4 }
 0x665   : > { %v4550_v51 = vmul.f32 1.442695, %v4528_v49 }
 0x666   : > { %v4505_v55 = vpop.f32.mrf.mxu1 }
 0x667   : > { %v7784_v7 = vadd.f32 %v7781_v8, %v4505_v55  ;;  %v4520_v55 = vmin.f32 %v7829_v9, 20.0 }
 0x668   : > { %v5326_v61 = vpop.f32.mrf.mxu1 }
 0x669   : > { %v4529_v39 = vmin.f32 %v7784_v7, 20.0  ;;  %v4536_v61 = vmul.f32 1.442695, %v4521_v41  ;;  %v4534_v49 = vmul.f32 1.442695, %v4520_v55 }
 0x66a   : > { %v4508_v29 = vpop.f32.mrf.mxu1 }
 0x66b   : > { %v7791_v13 = vadd.f32 %v7781_v8, %v4508_v29  ;;  %v4552_v22 = vmul.f32 1.442695, %v4529_v39 }
 0x66c   : > { %v5327_v21 = vpop.f32.mrf.mxu1 }
 0x66d   : > { %v4530_v37 = vmin.f32 %v7791_v13, 20.0 }
 0x66e   : > { %v4513_v23 = vpop.f32.mrf.mxu1 }
 0x66f   : > { %v4554_v19 = vmul.f32 1.442695, %v4530_v37  ;;  %v7799_v46 = vadd.f32 %v7781_v8, %v4513_v23  ;;  %v4519_v23 = vmin.f32 %v7834_v3, 20.0 }
 0x670   : > { %v5330_v63 = vpop.f32.mrf.mxu1 }
 0x671   : > { %5684 = vpow2.f32 %v4554_v19  ;;  %v4531_v32 = vmin.f32 %v7799_v46, 20.0  ;;  %v4532_v54 = vmul.f32 1.442695, %v4519_v23 }
 0x672   : > { %v4516_v27 = vpop.f32.mrf.mxu1  ;;  %5686 = vpow2.f32 %v4552_v22 }
 0x673   : > { %v4556_v20 = vmul.f32 1.442695, %v4531_v32 }
 0x674   : > { %v5331_v50 = vpop.f32.mrf.mxu1 }
 0x675   : > { %5688 = vpow2.f32 %v4556_v20 }
 0x676   : > { %5690 = vpow2.f32 %v4550_v51 }
 0x677   : > { %5692 = vpow2.f32 %v4548_v12 }
 0x678   : > { %5694 = vpow2.f32 %v4546_v62 }
 0x679   : > { %5696 = vpow2.f32 %v4544_v2 }
 0x67a   : > { %5698 = vpow2.f32 %v4542_v52 }
 0x67e   : > { %v5685_v16 = vpop.eup %5684 }
 0x67f   : > { %v4569_v18 = vadd.f32 1.0, %v5685_v16  ;;  %v5687_v48 = vpop.eup %5686 }
 0x680   : > { %v4568_v25 = vadd.f32 1.0, %v5687_v48 }
 0x681   : > { %v4582_v36 = vmul.f32 %v4569_v18, %v4569_v18 }
 0x682   : > { %v5689_v47 = vpop.eup %5688  ;;  %v4581_v38 = vmul.f32 %v4568_v25, %v4568_v25 }
 0x683   : > { %v4570_v33 = vadd.f32 1.0, %v5689_v47  ;;  %v5691_v40 = vpop.eup %5690  ;;  %v4621_v24 = vadd.f32 1.0, %v4582_v36  ;;  %v5059_v4 = vadd.f32 -1.0, %v4582_v36 }
 0x684   : > { %v4567_v5 = vadd.f32 1.0, %v5691_v40  ;;  %v5693_v45 = vpop.eup %5692  ;;  %v4620_v58 = vadd.f32 1.0, %v4581_v38  ;;  %v5058_v62 = vadd.f32 -1.0, %v4581_v38 }
 0x685   : > { %v4583_v30 = vmul.f32 %v4570_v33, %v4570_v33  ;;  %v4566_v34 = vadd.f32 1.0, %v5693_v45  ;;  %v5695_v17 = vpop.eup %5694  ;;  %v4608_v16 = vmul.f32 %v5059_v4, %v7791_v13 }
 0x686   : > { %v4580_v56 = vmul.f32 %v4567_v5, %v4567_v5  ;;  %v4565_v29 = vadd.f32 1.0, %v5695_v17  ;;  %v5697_v21 = vpop.eup %5696  ;;  %v4607_v52 = vmul.f32 %v5058_v62, %v7784_v7 }
 0x687   : > { %v4622_v28 = vadd.f32 1.0, %v4583_v30  ;;  %v4579_v59 = vmul.f32 %v4566_v34, %v4566_v34  ;;  %v5060_v37 = vadd.f32 -1.0, %v4583_v30  ;;  %v5699_v22 = vpop.eup %5698  ;;  %v4564_v19 = vadd.f32 1.0, %v5697_v21 }
 0x688   : > { %v4619_v39 = vadd.f32 1.0, %v4580_v56  ;;  %v4578_v63 = vmul.f32 %v4565_v29, %v4565_v29  ;;  %v4563_v51 = vadd.f32 1.0, %v5699_v22  ;;  %v5057_v35 = vadd.f32 -1.0, %v4580_v56 }
 0x689   : > { %5700 = vrcp.f32 %v4622_v28  ;;  %v4618_v32 = vadd.f32 1.0, %v4579_v59  ;;  %v4609_v8 = vmul.f32 %v5060_v37, %v7799_v46  ;;  %v4577_v50 = vmul.f32 %v4564_v19, %v4564_v19 }
 0x68a   : > { %5702 = vpow2.f32 %v4540_v57  ;;  %v4617_v11 = vadd.f32 1.0, %v4578_v63  ;;  %v4576_v2 = vmul.f32 %v4563_v51, %v4563_v51  ;;  %v5056_v0 = vadd.f32 -1.0, %v4579_v59 }
 0x68b   : > { %5704 = vrcp.f32 %v4621_v24  ;;  %v4616_v18 = vadd.f32 1.0, %v4577_v50  ;;  %v4606_v57 = vmul.f32 %v5057_v35, %v7787_v42  ;;  %v5055_v41 = vadd.f32 -1.0, %v4578_v63 }
 0x68c   : > { %5706 = vpow2.f32 %v4538_v31  ;;  %v4615_v33 = vadd.f32 1.0, %v4576_v2  ;;  %v4605_v31 = vmul.f32 %v5056_v0, %v7795_v53  ;;  %v5053_v23 = vadd.f32 -1.0, %v4576_v2 }
 0x68d   : > { %5708 = vrcp.f32 %v4620_v58  ;;  %v4604_v29 = vmul.f32 %v5055_v41, %v7803_v60 }
 0x68e   : > { %5710 = vpow2.f32 %v4536_v61  ;;  %v5054_v61 = vadd.f32 -1.0, %v4577_v50  ;;  %v4602_v4 = vmul.f32 %v5053_v23, %v7811_v14 }
 0x68f   : > { %5712 = vrcp.f32 %v4619_v39 }
 0x690   : > { %5714 = vpow2.f32 %v4534_v49  ;;  %v4603_v49 = vmul.f32 %v5054_v61, %v7807_v6 }
 0x691   : > { %5716 = vrcp.f32 %v4618_v32 }
 0x692   : > { %5718 = vpow2.f32 %v4532_v54 }
 0x693   : > { %5720 = vrcp.f32 %v4617_v11 }
 0x694   : > { %5722 = vrcp.f32 %v4616_v18 }
 0x695   : > { %5724 = vrcp.f32 %v4615_v33 }
 0x696   : > { %v5701_v27 = vpop.eup %5700 }
 0x697   : > { %v5703_v20 = vpop.eup %5702  ;;  %v4648_v12 = vmul.f32 %v5701_v27, %v4609_v8 }
 0x698   : > { %v5705_v10 = vpop.eup %5704  ;;  %v4562_v43 = vadd.f32 1.0, %v5703_v20 }
 0x699   : > { %5333 = vmatpush3.xpose.msk.msra.mxu0 %vm3594_vm10, %v4648_v12  ;;  %v5707_v46 = vpop.eup %5706  ;;  %v4647_v48 = vmul.f32 %v5705_v10, %v4608_v16 }
 0x69a   : > { %5334 = vmatprep.subr.mxu0 %v8099_v44  ;;  %v5709_v47 = vpop.eup %5708  ;;  %v4561_v25 = vadd.f32 1.0, %v5707_v46  ;;  %v4575_v36 = vmul.f32 %v4562_v43, %v4562_v43 }
 0x69b   : > { %v5711_v13 = vpop.eup %5710  ;;  %v4646_v40 = vmul.f32 %v5709_v47, %v4607_v52  ;;  %v8143_v47 = vlaneseq }
 0x69c   : > { %v5713_v30 = vpop.eup %5712  ;;  %v4560_v5 = vadd.f32 1.0, %v5711_v13  ;;  %v4574_v38 = vmul.f32 %v4561_v25, %v4561_v25  ;;  %v4614_v24 = vadd.f32 1.0, %v4575_v36  ;;  %v5052_v32 = vadd.f32 -1.0, %v4575_v36  ;;  %v4654_v25 = vpop.permute.xlu1 %4653 }
 0x69d   : > { %5335 = vmatpush3.xpose.msk.msra.mxu0 %vm3594_vm10, %v4647_v48  ;;  %v5715_v7 = vpop.eup %5714  ;;  %v4645_v28 = vmul.f32 %v5713_v30, %v4606_v57  ;;  %v4657_v35 = vshrl.u32 %v8143_v47, 7 }
 0x69e   : > { %5336 = vmatprep.subr.mxu0 %v8099_v44  ;;  %v5717_v45 = vpop.eup %5716  ;;  %v4559_v34 = vadd.f32 1.0, %v5715_v7  ;;  %v4573_v56 = vmul.f32 %v4560_v5, %v4560_v5  ;;  %v4613_v58 = vadd.f32 1.0, %v4574_v38  ;;  %5726 = vrcp.f32 %v4614_v24 }
 0x69f   : > { %v5719_v42 = vpop.eup %5718  ;;  %v4644_v17 = vmul.f32 %v5717_v45, %v4605_v31  ;;  %v5051_v54 = vadd.f32 -1.0, %v4574_v38  ;;  %v4601_v51 = vmul.f32 %v5052_v32, %v7815_v15  ;;  %v4658_v52 = vsub.s32 0, %v4657_v35 }
 0x6a0   : > { %v5721_v55 = vpop.eup %5720  ;;  %v4558_v59 = vadd.f32 1.0, %v5719_v42  ;;  %v4572_v53 = vmul.f32 %v4559_v34, %v4559_v34  ;;  %v4612_v39 = vadd.f32 1.0, %v4573_v56  ;;  %5728 = vrcp.f32 %v4613_v58 }
 0x6a1   : > { %5337 = vmatpush3.xpose.msk.msra.mxu0 %vm3594_vm10, %v4646_v40  ;;  %v4643_v21 = vmul.f32 %v5721_v55, %v4604_v29  ;;  %v5723_v37 = vpop.eup %5722  ;;  %v5050_v11 = vadd.f32 -1.0, %v4573_v56  ;;  %v4600_v14 = vmul.f32 %v5051_v54, %v7819_v26 }
 0x6a2   : > { %5338 = vmatprep.subr.mxu0 %v8099_v44  ;;  %v4571_v22 = vmul.f32 %v4558_v59, %v4558_v59  ;;  %v4611_v19 = vadd.f32 1.0, %v4572_v53  ;;  %5730 = vrcp.f32 %v4612_v39  ;;  %v4642_v60 = vmul.f32 %v5723_v37, %v4603_v49  ;;  %v5725_v63 = vpop.eup %5724 }
 0x6a3   : > { %v4641_v27 = vmul.f32 %v5725_v63, %v4602_v4  ;;  %v5049_v62 = vadd.f32 -1.0, %v4572_v53  ;;  %v4599_v16 = vmul.f32 %v5050_v11, %v7824_v1 }
 0x6a4   : > { %v4610_v8 = vadd.f32 1.0, %v4571_v22  ;;  %5732 = vrcp.f32 %v4611_v19  ;;  %v5048_v46 = vadd.f32 -1.0, %v4571_v22 }
 0x6a5   : > { %5339 = vmatpush3.xpose.msk.msra.mxu0 %vm3594_vm10, %v4645_v28  ;;  %v4598_v2 = vmul.f32 %v5049_v62, %v7829_v9  ;;  %v4649_v9 = vld [vmem:[%s7934_s13] sm:$0x1] }
 0x6a6   : > { %5340 = vmatprep.subr.mxu0 %v8099_v44  ;;  %5734 = vrcp.f32 %v4610_v8  ;;  %v4597_v48 = vmul.f32 %v5048_v46, %v7834_v3  ;;  %v4659_v3 = vrot.slane %v4654_v25, %v4658_v52 }
 0x6a9   : > { %5341 = vmatpush3.xpose.msk.msra.mxu0 %vm3594_vm10, %v4644_v17 }
 0x6aa   : > { %5342 = vmatprep.subr.mxu0 %v8099_v44 }
 0x6ab   : > { %v5727_v6 = vpop.eup %5726 }
 0x6ac   : > { %v4640_v20 = vmul.f32 %v5727_v6, %v4601_v51 }
 0x6ad   : > { %5343 = vmatpush3.xpose.msk.msra.mxu0 %vm3594_vm10, %v4643_v21  ;;  %v5729_v50 = vpop.eup %5728 }
 0x6ae   : > { %5344 = vmatprep.subr.mxu0 %v8099_v44  ;;  %v4639_v12 = vmul.f32 %v5729_v50, %v4600_v14 }
 0x6af   : > { %v5731_v10 = vpop.eup %5730 }
 0x6b0   : > { %v4638_v15 = vmul.f32 %v5731_v10, %v4599_v16 }
 0x6b1   : > { %5345 = vmatpush3.xpose.msk.msra.mxu0 %vm3594_vm10, %v4642_v60  ;;  %v5733_v43 = vpop.eup %5732 }
 0x6b2   : > { %5346 = vmatprep.subr.mxu0 %v8099_v44  ;;  %v4637_v26 = vmul.f32 %v5733_v43, %v4598_v2 }
 0x6b3   : > { %v5735_v18 = vpop.eup %5734 }
 0x6b4   : > { %v4636_v1 = vmul.f32 %v5735_v18, %v4597_v48 }
 0x6b5   : > { %5347 = vmatpush3.xpose.msk.msra.mxu0 %vm3594_vm10, %v4641_v27 }
 0x6b6   : > { %5348 = vmatprep.subr.mxu0 %v8099_v44 }
 0x6b9   : > { %5349 = vmatpush3.xpose.msk.msra.mxu0 %vm3594_vm10, %v4640_v20 }
 0x6ba   : > { %5350 = vmatprep.subr.mxu0 %v8099_v44 }
 0x6bd   : > { %5351 = vmatpush3.xpose.msk.msra.mxu0 %vm3594_vm10, %v4639_v12 }
 0x6be   : > { %5352 = vmatprep.subr.mxu0 %v8099_v44 }
 0x6c1   : > { %5353 = vmatpush3.xpose.msk.msra.mxu0 %vm3594_vm10, %v4638_v15 }
 0x6c2   : > { %5354 = vmatprep.subr.mxu0 %v8099_v44 }
 0x6c5   : > { %5355 = vmatpush3.xpose.msk.msra.mxu0 %vm3594_vm10, %v4637_v26 }
 0x6c6   : > { %5356 = vmatprep.subr.mxu0 %v8099_v44 }
 0x6c9   : > { %5357 = vmatpush3.xpose.msk.msra.mxu0 %vm3594_vm10, %v4636_v1 }
 0x6cc   : > { %5359 = vmatmul.mubr.msk.f32.vlgmr.msra.gmra.mxu0 %vm3594_vm10, %v4649_v9 }
 0x78c   : > { %v4768_v44 = vpop.f32.mrf.mxu0 }
 0x78d   : > { %v4769_v13 = vadd.f32 %v4768_v44, %v4659_v3 }
 0x78e   : > { %v5360_v36 = vpop.f32.mrf.mxu0 }
 0x78f   : > { %4773 = vst.msk [vmem:[%s489_s0] sm:$0x1] %vm4772_vm9, %v4769_v13 }
 0x790   : > { %5751 = shalt.err (!%p5748_p3)
}
 0x791   : > { %s5752_s26 = scalar_lea.hbm %s7886_s18, 16  ;;  %s5756_s16 = scalar_lea.hbm %s7936_s15, 32 }
 0x792   : > { %p5753_p4 = scmp.ne.s32.totalorder %s7886_s18, %s5752_s26  ;;  %p5757_p9 = scmp.lt.s32.totalorder %s7886_s18, %s7936_s15 }
 0x793   : > { %p5758_p10 = scmp.lt.s32.totalorder %s5756_s16, %s5752_s26 }
 0x794   : > { %p5754_p7 = pnand %p5753_p4, %p5932_p5 }
 0x795   : > { %p5759_p11 = por %p5758_p10, %p5757_p9 }
 0x796   : > { %p5755_p8 = pneg %p5754_p7 }
 0x798   : > { %p5760_p12 = pnand %p5759_p11, %p5755_p8 }
 0x79a   : > { %5763 = shalt.err (!%p5760_p12)
}
 0x79b   : > { %5413 = dma.vmem_to_hbm [thread:$0]  (%p5932_p5), %s4788_s27, 16, %s7886_s18, %s4775_s19  }
 0x79c PF: > { %p5419_p13 = scmp.ge.s32.totalorder %s5798_s23, 2  ;;  %s4799_s1 = sand.u32 1, %s5786_s20  }
 0x79d   : > { %s4800_s2 = scalar_lea.sflag [#allocation4], %s4799_s1 }
 0x79e   : > { %p5416_p0 = pnand %p5419_p13, %p5936_p6 }
 0x7a0   : > { %p5417_p1 = pneg %p5416_p0 }
 0x7a2   : > { %5781 = dma.done.wait (%p5417_p1), %s4800_s2, 16  }
 0x7a3   : > { %5783 = vsyncadd (%p5417_p1), %s4800_s2, 4294967280  ;;  %p27_p2 = scmp.ge.s32.totalorder %s5919_s25, 4   ;;  %s8144_s20 = smov %s5790_s21 }
 0x7a4   : > { %s8145_s21 = smov %s5794_s22  ;;  %s8146_s22 = smov %s5930_s28 }
 0x7a5   : > { %s8147_s23 = smov %s5919_s25  ;;  %29 = sbr.rel (!%p27_p2) target bundleno = 8 (0x8), region = 115 }
 0x7aa   :  { %4804 = vsyncpa [#allocation4], 1 }
 0x7ab   :  { %4806 = vsyncpa [#allocation4 + $0x1], 1 }

</bundles_post_ra>
